<compile_context>
chip_gen: v5e
topology: v5e:2x2
jax: 0.10.0
libtpu: 0.0.40
codegen_flags: <defaults>
</compile_context>

<pallas_src>
import jax
import jax.numpy as jnp
from jax import lax
from jax.experimental import pallas as pl
from jax.experimental.pallas import tpu as pltpu

EPS = 1e-5


def _round_up(x, m):
    return (x + m - 1) // m * m


# --------------------------------------------------------------------------
# kernels
# --------------------------------------------------------------------------
def _conv3x3_bn_stats(h, w_ref, y_ref, s_ref, q_ref, xpad_ref, col_ref):
    """3x3 'SAME' conv of h ((NB,H,W,CP) f32 value) against w_ref
    ((9*CP, CP) bf16) via an explicit im2col slab and a single deep-K MXU
    matmul.  Writes the conv output (bf16) to y_ref and per-channel sum /
    sum-of-squares (BN batch-stat partials, f32) to s_ref / q_ref."""
    NB, H, W, CP = y_ref.shape
    Hp = H + 2
    Wp = xpad_ref.shape[2]          # W + 2 rounded up to a multiple of 8
    KP = col_ref.shape[-1]          # 9 * CP

    # Zero only the border strips (interior is fully overwritten below).
    # NOT gated on program_id == 0: on megacore parts the "parallel" grid
    # axis may be sharded across cores and a core starting at i > 0 would
    # otherwise see an uninitialized border in its private scratch.
    zdt = xpad_ref.dtype
    xpad_ref[:, 0:1, :, :] = jnp.zeros((NB, 1, Wp, CP), zdt)
    xpad_ref[:, Hp - 1:Hp, :, :] = jnp.zeros((NB, 1, Wp, CP), zdt)
    xpad_ref[:, :, 0:1, :] = jnp.zeros((NB, Hp, 1, CP), zdt)
    xpad_ref[:, :, W + 1:Wp, :] = jnp.zeros((NB, Hp, Wp - (W + 1), CP), zdt)
    xpad_ref[:, 1:H + 1, 1:W + 1, :] = h.astype(zdt)

    # im2col: 9 lane-aligned shifted copies (tap kk lands on lanes
    # [kk*CP, (kk+1)*CP)).  All tap accumulation then happens inside ONE
    # (M, 9*CP) x (9*CP, CP) matmul with f32 MXU accumulation -> no
    # accumulator read-modify-write traffic in VMEM.
    for kh in range(3):
        for kw in range(3):
            kk = 3 * kh + kw
            col_ref[:, :, :, kk * CP:(kk + 1) * CP] = \
                xpad_ref[:, kh:kh + H, kw:kw + W, :]

    M = NB * H * W
    acc = jnp.dot(col_ref[...].reshape(M, KP), w_ref[...],
                  preferred_element_type=jnp.float32)

    # BN batch-stat partials fused into the conv epilogue (acc still hot).
    s_ref[...] = jnp.sum(acc, axis=0).reshape(1, 1, CP)
    q_ref[...] = jnp.sum(acc * acc, axis=0).reshape(1, 1, CP)
    # Inter-pass activations stored as bf16 to halve HBM traffic.
    y_ref[...] = acc.astype(y_ref.dtype).reshape(NB, H, W, CP)


def _conv1_kernel(x_ref, w_ref, y_ref, s_ref, q_ref, xpad_ref, col_ref):
    _conv3x3_bn_stats(x_ref[...], w_ref, y_ref, s_ref, q_ref, xpad_ref,
                      col_ref)


def _conv2_kernel(y1_ref, scale_ref, shift_ref, w_ref, y_ref, s_ref, q_ref,
                  xpad_ref, col_ref):
    # bn1 (per-channel affine folded from batch stats) + relu fused into the
    # producer of conv2's input.
    h = jnp.maximum(
        y1_ref[...].astype(jnp.float32) * scale_ref[0] + shift_ref[0], 0.0)
    _conv3x3_bn_stats(h, w_ref, y_ref, s_ref, q_ref, xpad_ref, col_ref)


def _bn_add_relu_kernel(y2_ref, x_ref, scale_ref, shift_ref, o_ref):
    # bn2 + identity residual + relu (pure VPU, lane-dense, memory-bound).
    o_ref[...] = jnp.maximum(
        y2_ref[...].astype(jnp.float32) * scale_ref[0] + shift_ref[0]
        + x_ref[...], 0.0)


# --------------------------------------------------------------------------
# wrapper helpers
# --------------------------------------------------------------------------
def _bn_scale_shift(s, q, gamma, beta, count):
    """Fold training-mode BN (batch mean, biased var, eps, affine) into a
    per-channel scale/shift, reducing the per-tile partial sums."""
    total = jnp.sum(s, axis=0).reshape(-1)
    total_sq = jnp.sum(q, axis=0).reshape(-1)
    mean = total / count
    var = jnp.maximum(total_sq / count - mean * mean, 0.0)
    scale = gamma * lax.rsqrt(var + EPS)
    shift = beta - mean * scale
    cp = scale.shape[0]
    return scale.reshape(1, cp), shift.reshape(1, cp)


def _need_bytes(nb, H, W, CP):
    """Per-grid-step VMEM footprint of the conv passes (the largest)."""
    Wp = _round_up(W + 2, 8)
    xin = nb * H * W * CP * 4              # f32 input block
    yout = nb * H * W * CP * 2             # bf16 conv output block
    wgt = 9 * CP * CP * 2                  # bf16 weights
    xpad = nb * (H + 2) * Wp * CP * 2      # bf16 padded-input scratch
    col = nb * H * W * 9 * CP * 2          # bf16 im2col scratch
    acc = nb * H * W * CP * 4              # traced f32 accumulator (+ temps)
    # inputs/outputs double-buffered by the pipeline, scratch single-buffered
    return 2 * (xin + yout + wgt) + xpad + col + 2 * acc + (8 << 20)


def _vmem_ceiling():
    """Generation-dependent VMEM ceiling (v5e/v6e: 128 MiB, v7x: 64 MiB)."""
    try:
        phys = int(pltpu.get_tpu_info().vmem_capacity_bytes)
    except Exception:
        phys = 64 << 20                    # conservative fallback (v7x)
    return max(phys - (16 << 20), 32 << 20)


def _choose_nb(N, H, W, CP, ceiling):
    """Largest images-per-grid-step that divides N, keeps >= 2 grid steps
    (pipelining / megacore sharding) and fits the VMEM budget."""
    nb = 1
    for cand in range(1, N + 1):
        if N % cand:
            continue
        if N >= 2 and N // cand < 2:
            continue
        if _need_bytes(cand, H, W, CP) <= ceiling:
            nb = cand
    return nb


# --------------------------------------------------------------------------
# wrapper
# --------------------------------------------------------------------------
def basic_block_pallas(x_nchw, w1, g1, b1, w2, g2, b2):
    """x_nchw: (N, C, H, W) f32; w*: (3,3,C,C) HWIO; g*/b*: (C,).
    Returns relu(bn2(conv2(relu(bn1(conv1(x))))) + x) as (N, C, H, W) f32."""
    N, Cin, H, W = x_nchw.shape
    C = w1.shape[-1]
    assert Cin == C, "identity shortcut requires in_planes == planes"

    CP = _round_up(C, 128)                 # lane-dense channel count
    ceiling = _vmem_ceiling()
    NB = _choose_nb(N, H, W, CP, ceiling)
    G = N // NB
    vmem_limit = int(min(max(_need_bytes(NB, H, W, CP), 32 << 20), ceiling))

    # NCHW -> NHWC, channels zero-padded to CP (layout plumbing only; in a
    # full ResNet the residual stream would stay in padded NHWC between
    # blocks instead of paying this pad/slice + transpose per block).
    x = jnp.transpose(x_nchw, (0, 2, 3, 1))
    x_p = jnp.pad(x, ((0, 0), (0, 0), (0, 0), (0, CP - C)))

    # TODO(synk): for C < 128 the contraction could be built from real taps
    #             (K = 9*C padded once to a multiple of 128) instead of
    #             padding every tap's C to 128; per-tap CP padding is kept
    #             here so every im2col copy stays lane-aligned.
    def prep_w(w):                         # (3,3,Cin,C) -> (9*CP, CP) bf16
        wp = jnp.pad(w, ((0, 0), (0, 0), (0, CP - Cin), (0, CP - C)))
        return wp.reshape(9 * CP, CP).astype(jnp.bfloat16)

    w1_p, w2_p = prep_w(w1), prep_w(w2)
    g1_p, b1_p = jnp.pad(g1, (0, CP - C)), jnp.pad(b1, (0, CP - C))
    g2_p, b2_p = jnp.pad(g2, (0, CP - C)), jnp.pad(b2, (0, CP - C))

    grid = (G,)
    act_spec = pl.BlockSpec((NB, H, W, CP), lambda i: (i, 0, 0, 0))
    w_spec = pl.BlockSpec((9 * CP, CP), lambda i: (0, 0))
    vec_spec = pl.BlockSpec((1, CP), lambda i: (0, 0))
    stat_spec = pl.BlockSpec((1, 1, CP), lambda i: (i, 0, 0))

    y_shape = jax.ShapeDtypeStruct((N, H, W, CP), jnp.bfloat16)
    out_shape = jax.ShapeDtypeStruct((N, H, W, CP), jnp.float32)
    stat_shape = jax.ShapeDtypeStruct((G, 1, CP), jnp.float32)

    Wp = _round_up(W + 2, 8)               # sublane-aligned padded width
    conv_scratch = [pltpu.VMEM((NB, H + 2, Wp, CP), jnp.bfloat16),
                    pltpu.VMEM((NB, H, W, 9 * CP), jnp.bfloat16)]
    cparams = pltpu.CompilerParams(
        dimension_semantics=("parallel",),
        vmem_limit_bytes=vmem_limit)

    # ---- pass 1: conv1 + BN1 partial statistics ---------------------------
    y1, s1, q1 = pl.pallas_call(
        _conv1_kernel,
        grid=grid,
        in_specs=[act_spec, w_spec],
        out_specs=(act_spec, stat_spec, stat_spec),
        out_shape=(y_shape, stat_shape, stat_shape),
        scratch_shapes=conv_scratch,
        compiler_params=cparams,
    )(x_p, w1_p)
    scale1, shift1 = _bn_scale_shift(s1, q1, g1_p, b1_p, N * H * W)

    # ---- pass 2: bn1 + relu -> conv2 + BN2 partial statistics -------------
    y2, s2, q2 = pl.pallas_call(
        _conv2_kernel,
        grid=grid,
        in_specs=[act_spec, vec_spec, vec_spec, w_spec],
        out_specs=(act_spec, stat_spec, stat_spec),
        out_shape=(y_shape, stat_shape, stat_shape),
        scratch_shapes=conv_scratch,
        compiler_params=cparams,
    )(y1, scale1, shift1, w2_p)
    scale2, shift2 = _bn_scale_shift(s2, q2, g2_p, b2_p, N * H * W)

    # ---- pass 3: bn2 + residual add + relu --------------------------------
    out_p = pl.pallas_call(
        _bn_add_relu_kernel,
        grid=grid,
        in_specs=[act_spec, act_spec, vec_spec, vec_spec],
        out_specs=act_spec,
        out_shape=out_shape,
        compiler_params=cparams,
    )(y2, x_p, scale2, shift2)

    # drop channel padding, back to NCHW
    return jnp.transpose(out_p[:, :, :, :C], (0, 3, 1, 2))


# --------------------------- reference (plain JAX) --------------------------
def _conv3x3_ref(x_nhwc, w_hwio, conv_dtype):
    return lax.conv_general_dilated(
        x_nhwc.astype(conv_dtype), w_hwio.astype(conv_dtype),
        window_strides=(1, 1), padding="SAME",
        dimension_numbers=("NHWC", "HWIO", "NHWC"),
        preferred_element_type=jnp.float32)


def _bn_ref(y, g, b):
    mean = jnp.mean(y, axis=(0, 1, 2), keepdims=True)
    var = jnp.mean(jnp.square(y - mean), axis=(0, 1, 2), keepdims=True)
    return (y - mean) * lax.rsqrt(var + EPS) * g + b


def basic_block_ref(x_nchw, w1, g1, b1, w2, g2, b2, conv_dtype=jnp.float32):
    x = jnp.transpose(x_nchw, (0, 2, 3, 1))
    out = jnp.maximum(_bn_ref(_conv3x3_ref(x, w1, conv_dtype), g1, b1), 0.0)
    out = _bn_ref(_conv3x3_ref(out, w2, conv_dtype), g2, b2)
    out = jnp.maximum(out + x, 0.0)
    return jnp.transpose(out, (0, 3, 1, 2))


if __name__ == "__main__":
    # Small shapes: batch=2, in_planes=planes=8, spatial=16x16, stride=1,
    # downsample=None (identity shortcut).
    N, CIN, C, H, W = 2, 8, 8, 16, 16

    key = jax.random.PRNGKey(0)
    k_x, k_w1, k_w2, k_g1, k_b1, k_g2, k_b2 = jax.random.split(key, 7)

    x = jax.random.normal(k_x, (N, CIN, H, W), jnp.float32)
    w1 = jax.random.normal(k_w1, (3, 3, CIN, C), jnp.float32) * 0.1   # HWIO
    w2 = jax.random.normal(k_w2, (3, 3, C, C), jnp.float32) * 0.1
    g1 = 1.0 + 0.1 * jax.random.normal(k_g1, (C,), jnp.float32)
    b1 = 0.1 * jax.random.normal(k_b1, (C,), jnp.float32)
    g2 = 1.0 + 0.1 * jax.random.normal(k_g2, (C,), jnp.float32)
    b2 = 0.1 * jax.random.normal(k_b2, (C,), jnp.float32)

    out = basic_block_pallas(x, w1, g1, b1, w2, g2, b2)
    out = jax.block_until_ready(out)

    ref = basic_block_ref(x, w1, g1, b1, w2, g2, b2)
    assert out.shape == (N, C, H, W), out.shape
    # bf16 MXU operands + bf16 inter-pass activations (f32 accumulation) ->
    # loosened tolerance vs the f32 reference.
    err = float(jnp.max(jnp.abs(out - ref)))
    assert jnp.allclose(out, ref, atol=1e-1, rtol=1e-1), err

    print("KERNEL_OK")
</pallas_src>

<mosaic_0001>
module attributes {stable_mosaic.version = 11 : i64} {
  func.func @_conv1_kernel(%arg0: i32, %arg1: memref<1x16x16x128xf32, #tpu.memory_space<vmem>>, %arg2: memref<1152x128xbf16, #tpu.memory_space<vmem>>, %arg3: memref<1x16x16x128xbf16, #tpu.memory_space<vmem>>, %arg4: memref<1x1x128xf32, #tpu.memory_space<vmem>>, %arg5: memref<1x1x128xf32, #tpu.memory_space<vmem>>, %arg6: memref<1x18x24x128xbf16, #tpu.memory_space<vmem>>, %arg7: memref<1x16x16x1152xbf16, #tpu.memory_space<vmem>>) attributes {dimension_semantics = [#tpu.dimension_semantics<parallel>], iteration_bounds = array<i64: 2>, scalar_prefetch = 0 : i64, scratch_operands = 2 : i64, tpu.core_type = #tpu.core_type<tc>, window_params = [{transform_indices = @transform_0, window_bounds = array<i64: 1, 16, 16, 128>}, {pipeline_mode = #tpu.pipeline_mode<synchronous>, transform_indices = @transform_1, window_bounds = array<i64: 1152, 128>}, {transform_indices = @transform_2, window_bounds = array<i64: 1, 16, 16, 128>}, {transform_indices = @transform_3, window_bounds = array<i64: 1, 1, 128>}, {transform_indices = @transform_4, window_bounds = array<i64: 1, 1, 128>}]} {
    %c0 = arith.constant 0 : index
    %c0_0 = arith.constant 0 : index
    %c0_1 = arith.constant 0 : index
    %c0_2 = arith.constant 0 : index
    %0 = vector.load %arg1[%c0, %c0_0, %c0_1, %c0_2] : memref<1x16x16x128xf32, #tpu.memory_space<vmem>>, vector<1x16x16x128xf32>
    %cst = arith.constant 0.000000e+00 : bf16
    %1 = vector.broadcast %cst : bf16 to vector<1x1x24x128xbf16>
    %c0_3 = arith.constant 0 : index
    %c0_4 = arith.constant 0 : index
    %c0_5 = arith.constant 0 : index
    %c0_6 = arith.constant 0 : index
    %2 = vector.load %arg6[%c0_3, %c0_4, %c0_5, %c0_6] : memref<1x18x24x128xbf16, #tpu.memory_space<vmem>>, vector<1x1x24x128xbf16>
    tpu.vector_store %arg6[%c0_3, %c0_4, %c0_5, %c0_6], %1 {strides = array<i32>} : memref<1x18x24x128xbf16, #tpu.memory_space<vmem>>, vector<1x1x24x128xbf16>,
    %cst_7 = arith.constant 0.000000e+00 : bf16
    %3 = vector.broadcast %cst_7 : bf16 to vector<1x1x24x128xbf16>
    %c0_8 = arith.constant 0 : index
    %c17 = arith.constant 17 : index
    %c0_9 = arith.constant 0 : index
    %c0_10 = arith.constant 0 : index
    %4 = vector.load %arg6[%c0_8, %c17, %c0_9, %c0_10] : memref<1x18x24x128xbf16, #tpu.memory_space<vmem>>, vector<1x1x24x128xbf16>
    tpu.vector_store %arg6[%c0_8, %c17, %c0_9, %c0_10], %3 {strides = array<i32>} : memref<1x18x24x128xbf16, #tpu.memory_space<vmem>>, vector<1x1x24x128xbf16>,
    %cst_11 = arith.constant 0.000000e+00 : bf16
    %5 = vector.broadcast %cst_11 : bf16 to vector<1x18x1x128xbf16>
    %c0_12 = arith.constant 0 : index
    %c0_13 = arith.constant 0 : index
    %c0_14 = arith.constant 0 : index
    %c0_15 = arith.constant 0 : index
    %6 = vector.load %arg6[%c0_12, %c0_13, %c0_14, %c0_15] : memref<1x18x24x128xbf16, #tpu.memory_space<vmem>>, vector<1x18x1x128xbf16>
    tpu.vector_store %arg6[%c0_12, %c0_13, %c0_14, %c0_15], %5 {strides = array<i32>} : memref<1x18x24x128xbf16, #tpu.memory_space<vmem>>, vector<1x18x1x128xbf16>,
    %cst_16 = arith.constant 0.000000e+00 : bf16
    %7 = vector.broadcast %cst_16 : bf16 to vector<1x18x7x128xbf16>
    %c0_17 = arith.constant 0 : index
    %c0_18 = arith.constant 0 : index
    %c17_19 = arith.constant 17 : index
    %c0_20 = arith.constant 0 : index
    %8 = vector.load %arg6[%c0_17, %c0_18, %c17_19, %c0_20] : memref<1x18x24x128xbf16, #tpu.memory_space<vmem>>, vector<1x18x7x128xbf16>
    tpu.vector_store %arg6[%c0_17, %c0_18, %c17_19, %c0_20], %7 {strides = array<i32>} : memref<1x18x24x128xbf16, #tpu.memory_space<vmem>>, vector<1x18x7x128xbf16>,
    %9 = arith.truncf %0 : vector<1x16x16x128xf32> to vector<1x16x16x128xbf16>
    %c0_21 = arith.constant 0 : index
    %c1 = arith.constant 1 : index
    %c1_22 = arith.constant 1 : index
    %c0_23 = arith.constant 0 : index
    %10 = vector.load %arg6[%c0_21, %c1, %c1_22, %c0_23] : memref<1x18x24x128xbf16, #tpu.memory_space<vmem>>, vector<1x16x16x128xbf16>
    tpu.vector_store %arg6[%c0_21, %c1, %c1_22, %c0_23], %9 {strides = array<i32>} : memref<1x18x24x128xbf16, #tpu.memory_space<vmem>>, vector<1x16x16x128xbf16>,
    %c0_24 = arith.constant 0 : index
    %c0_25 = arith.constant 0 : index
    %c0_26 = arith.constant 0 : index
    %c0_27 = arith.constant 0 : index
    %11 = vector.load %arg6[%c0_24, %c0_25, %c0_26, %c0_27] : memref<1x18x24x128xbf16, #tpu.memory_space<vmem>>, vector<1x16x16x128xbf16>
    %c0_28 = arith.constant 0 : index
    %c0_29 = arith.constant 0 : index
    %c0_30 = arith.constant 0 : index
    %c0_31 = arith.constant 0 : index
    %12 = vector.load %arg7[%c0_28, %c0_29, %c0_30, %c0_31] : memref<1x16x16x1152xbf16, #tpu.memory_space<vmem>>, vector<1x16x16x128xbf16>
    tpu.vector_store %arg7[%c0_28, %c0_29, %c0_30, %c0_31], %11 {strides = array<i32>} : memref<1x16x16x1152xbf16, #tpu.memory_space<vmem>>, vector<1x16x16x128xbf16>,
    %c0_32 = arith.constant 0 : index
    %c0_33 = arith.constant 0 : index
    %c1_34 = arith.constant 1 : index
    %c0_35 = arith.constant 0 : index
    %13 = vector.load %arg6[%c0_32, %c0_33, %c1_34, %c0_35] : memref<1x18x24x128xbf16, #tpu.memory_space<vmem>>, vector<1x16x16x128xbf16>
    %c0_36 = arith.constant 0 : index
    %c0_37 = arith.constant 0 : index
    %c0_38 = arith.constant 0 : index
    %c128 = arith.constant 128 : index
    %14 = vector.load %arg7[%c0_36, %c0_37, %c0_38, %c128] : memref<1x16x16x1152xbf16, #tpu.memory_space<vmem>>, vector<1x16x16x128xbf16>
    tpu.vector_store %arg7[%c0_36, %c0_37, %c0_38, %c128], %13 {strides = array<i32>} : memref<1x16x16x1152xbf16, #tpu.memory_space<vmem>>, vector<1x16x16x128xbf16>,
    %c0_39 = arith.constant 0 : index
    %c0_40 = arith.constant 0 : index
    %c2 = arith.constant 2 : index
    %c0_41 = arith.constant 0 : index
    %15 = vector.load %arg6[%c0_39, %c0_40, %c2, %c0_41] : memref<1x18x24x128xbf16, #tpu.memory_space<vmem>>, vector<1x16x16x128xbf16>
    %c0_42 = arith.constant 0 : index
    %c0_43 = arith.constant 0 : index
    %c0_44 = arith.constant 0 : index
    %c256 = arith.constant 256 : index
    %16 = vector.load %arg7[%c0_42, %c0_43, %c0_44, %c256] : memref<1x16x16x1152xbf16, #tpu.memory_space<vmem>>, vector<1x16x16x128xbf16>
    tpu.vector_store %arg7[%c0_42, %c0_43, %c0_44, %c256], %15 {strides = array<i32>} : memref<1x16x16x1152xbf16, #tpu.memory_space<vmem>>, vector<1x16x16x128xbf16>,
    %c0_45 = arith.constant 0 : index
    %c1_46 = arith.constant 1 : index
    %c0_47 = arith.constant 0 : index
    %c0_48 = arith.constant 0 : index
    %17 = vector.load %arg6[%c0_45, %c1_46, %c0_47, %c0_48] : memref<1x18x24x128xbf16, #tpu.memory_space<vmem>>, vector<1x16x16x128xbf16>
    %c0_49 = arith.constant 0 : index
    %c0_50 = arith.constant 0 : index
    %c0_51 = arith.constant 0 : index
    %c384 = arith.constant 384 : index
    %18 = vector.load %arg7[%c0_49, %c0_50, %c0_51, %c384] : memref<1x16x16x1152xbf16, #tpu.memory_space<vmem>>, vector<1x16x16x128xbf16>
    tpu.vector_store %arg7[%c0_49, %c0_50, %c0_51, %c384], %17 {strides = array<i32>} : memref<1x16x16x1152xbf16, #tpu.memory_space<vmem>>, vector<1x16x16x128xbf16>,
    %c0_52 = arith.constant 0 : index
    %c1_53 = arith.constant 1 : index
    %c1_54 = arith.constant 1 : index
    %c0_55 = arith.constant 0 : index
    %19 = vector.load %arg6[%c0_52, %c1_53, %c1_54, %c0_55] : memref<1x18x24x128xbf16, #tpu.memory_space<vmem>>, vector<1x16x16x128xbf16>
    %c0_56 = arith.constant 0 : index
    %c0_57 = arith.constant 0 : index
    %c0_58 = arith.constant 0 : index
    %c512 = arith.constant 512 : index
    %20 = vector.load %arg7[%c0_56, %c0_57, %c0_58, %c512] : memref<1x16x16x1152xbf16, #tpu.memory_space<vmem>>, vector<1x16x16x128xbf16>
    tpu.vector_store %arg7[%c0_56, %c0_57, %c0_58, %c512], %19 {strides = array<i32>} : memref<1x16x16x1152xbf16, #tpu.memory_space<vmem>>, vector<1x16x16x128xbf16>,
    %c0_59 = arith.constant 0 : index
    %c1_60 = arith.constant 1 : index
    %c2_61 = arith.constant 2 : index
    %c0_62 = arith.constant 0 : index
    %21 = vector.load %arg6[%c0_59, %c1_60, %c2_61, %c0_62] : memref<1x18x24x128xbf16, #tpu.memory_space<vmem>>, vector<1x16x16x128xbf16>
    %c0_63 = arith.constant 0 : index
    %c0_64 = arith.constant 0 : index
    %c0_65 = arith.constant 0 : index
    %c640 = arith.constant 640 : index
    %22 = vector.load %arg7[%c0_63, %c0_64, %c0_65, %c640] : memref<1x16x16x1152xbf16, #tpu.memory_space<vmem>>, vector<1x16x16x128xbf16>
    tpu.vector_store %arg7[%c0_63, %c0_64, %c0_65, %c640], %21 {strides = array<i32>} : memref<1x16x16x1152xbf16, #tpu.memory_space<vmem>>, vector<1x16x16x128xbf16>,
    %c0_66 = arith.constant 0 : index
    %c2_67 = arith.constant 2 : index
    %c0_68 = arith.constant 0 : index
    %c0_69 = arith.constant 0 : index
    %23 = vector.load %arg6[%c0_66, %c2_67, %c0_68, %c0_69] : memref<1x18x24x128xbf16, #tpu.memory_space<vmem>>, vector<1x16x16x128xbf16>
    %c0_70 = arith.constant 0 : index
    %c0_71 = arith.constant 0 : index
    %c0_72 = arith.constant 0 : index
    %c768 = arith.constant 768 : index
    %24 = vector.load %arg7[%c0_70, %c0_71, %c0_72, %c768] : memref<1x16x16x1152xbf16, #tpu.memory_space<vmem>>, vector<1x16x16x128xbf16>
    tpu.vector_store %arg7[%c0_70, %c0_71, %c0_72, %c768], %23 {strides = array<i32>} : memref<1x16x16x1152xbf16, #tpu.memory_space<vmem>>, vector<1x16x16x128xbf16>,
    %c0_73 = arith.constant 0 : index
    %c2_74 = arith.constant 2 : index
    %c1_75 = arith.constant 1 : index
    %c0_76 = arith.constant 0 : index
    %25 = vector.load %arg6[%c0_73, %c2_74, %c1_75, %c0_76] : memref<1x18x24x128xbf16, #tpu.memory_space<vmem>>, vector<1x16x16x128xbf16>
    %c0_77 = arith.constant 0 : index
    %c0_78 = arith.constant 0 : index
    %c0_79 = arith.constant 0 : index
    %c896 = arith.constant 896 : index
    %26 = vector.load %arg7[%c0_77, %c0_78, %c0_79, %c896] : memref<1x16x16x1152xbf16, #tpu.memory_space<vmem>>, vector<1x16x16x128xbf16>
    tpu.vector_store %arg7[%c0_77, %c0_78, %c0_79, %c896], %25 {strides = array<i32>} : memref<1x16x16x1152xbf16, #tpu.memory_space<vmem>>, vector<1x16x16x128xbf16>,
    %c0_80 = arith.constant 0 : index
    %c2_81 = arith.constant 2 : index
    %c2_82 = arith.constant 2 : index
    %c0_83 = arith.constant 0 : index
    %27 = vector.load %arg6[%c0_80, %c2_81, %c2_82, %c0_83] : memref<1x18x24x128xbf16, #tpu.memory_space<vmem>>, vector<1x16x16x128xbf16>
    %c0_84 = arith.constant 0 : index
    %c0_85 = arith.constant 0 : index
    %c0_86 = arith.constant 0 : index
    %c1024 = arith.constant 1024 : index
    %28 = vector.load %arg7[%c0_84, %c0_85, %c0_86, %c1024] : memref<1x16x16x1152xbf16, #tpu.memory_space<vmem>>, vector<1x16x16x128xbf16>
    tpu.vector_store %arg7[%c0_84, %c0_85, %c0_86, %c1024], %27 {strides = array<i32>} : memref<1x16x16x1152xbf16, #tpu.memory_space<vmem>>, vector<1x16x16x128xbf16>,
    %c0_87 = arith.constant 0 : index
    %c0_88 = arith.constant 0 : index
    %c0_89 = arith.constant 0 : index
    %c0_90 = arith.constant 0 : index
    %29 = vector.load %arg7[%c0_87, %c0_88, %c0_89, %c0_90] : memref<1x16x16x1152xbf16, #tpu.memory_space<vmem>>, vector<1x16x16x1152xbf16>
    %30 = vector.shape_cast %29 : vector<1x16x16x1152xbf16> to vector<256x1152xbf16>
    %c0_91 = arith.constant 0 : index
    %c0_92 = arith.constant 0 : index
    %31 = vector.load %arg2[%c0_91, %c0_92] : memref<1152x128xbf16, #tpu.memory_space<vmem>>, vector<1152x128xbf16>
    %cst_93 = arith.constant dense<0.000000e+00> : vector<256x128xf32>
    %32 = tpu.matmul %30, %31, %cst_93 {dimension_numbers = #tpu.dot_dimension_numbers<[1], [0], [0], [1], [0, 0, 1, 1], [], []>} : vector<256x1152xbf16>, vector<1152x128xbf16>, vector<256x128xf32> -> vector<256x128xf32>
    %cst_94 = arith.constant dense<0.000000e+00> : vector<128xf32>
    %33 = vector.multi_reduction <add>, %32, %cst_94 [0] : vector<256x128xf32> to vector<128xf32>
    %34 = vector.shape_cast %33 : vector<128xf32> to vector<1x1x128xf32>
    %c0_95 = arith.constant 0 : index
    %c0_96 = arith.constant 0 : index
    %c0_97 = arith.constant 0 : index
    %35 = vector.load %arg4[%c0_95, %c0_96, %c0_97] : memref<1x1x128xf32, #tpu.memory_space<vmem>>, vector<1x1x128xf32>
    tpu.vector_store %arg4[%c0_95, %c0_96, %c0_97], %34 {strides = array<i32>} : memref<1x1x128xf32, #tpu.memory_space<vmem>>, vector<1x1x128xf32>,
    %36 = arith.mulf %32, %32 : vector<256x128xf32>
    %cst_98 = arith.constant dense<0.000000e+00> : vector<128xf32>
    %37 = vector.multi_reduction <add>, %36, %cst_98 [0] : vector<256x128xf32> to vector<128xf32>
    %38 = vector.shape_cast %37 : vector<128xf32> to vector<1x1x128xf32>
    %c0_99 = arith.constant 0 : index
    %c0_100 = arith.constant 0 : index
    %c0_101 = arith.constant 0 : index
    %39 = vector.load %arg5[%c0_99, %c0_100, %c0_101] : memref<1x1x128xf32, #tpu.memory_space<vmem>>, vector<1x1x128xf32>
    tpu.vector_store %arg5[%c0_99, %c0_100, %c0_101], %38 {strides = array<i32>} : memref<1x1x128xf32, #tpu.memory_space<vmem>>, vector<1x1x128xf32>,
    %40 = arith.truncf %32 : vector<256x128xf32> to vector<256x128xbf16>
    %41 = vector.shape_cast %40 : vector<256x128xbf16> to vector<1x16x16x128xbf16>
    %c0_102 = arith.constant 0 : index
    %c0_103 = arith.constant 0 : index
    %c0_104 = arith.constant 0 : index
    %c0_105 = arith.constant 0 : index
    %42 = vector.load %arg3[%c0_102, %c0_103, %c0_104, %c0_105] : memref<1x16x16x128xbf16, #tpu.memory_space<vmem>>, vector<1x16x16x128xbf16>
    tpu.vector_store %arg3[%c0_102, %c0_103, %c0_104, %c0_105], %41 {strides = array<i32>} : memref<1x16x16x128xbf16, #tpu.memory_space<vmem>>, vector<1x16x16x128xbf16>,
    return
  }
  func.func @transform_0(%arg0: i32) -> (i32, i32, i32, i32) {
    %c0_i32 = arith.constant 0 : i32
    %c0_i32_0 = arith.constant 0 : i32
    %c0_i32_1 = arith.constant 0 : i32
    %c0_i32_2 = arith.constant 0 : i32
    return %arg0, %c0_i32, %c0_i32_0, %c0_i32_1 : i32, i32, i32, i32
  }
  func.func @transform_1(%arg0: i32) -> (i32, i32) {
    %c0_i32 = arith.constant 0 : i32
    %c0_i32_0 = arith.constant 0 : i32
    %c0_i32_1 = arith.constant 0 : i32
    return %c0_i32, %c0_i32_0 : i32, i32
  }
  func.func @transform_2(%arg0: i32) -> (i32, i32, i32, i32) {
    %c0_i32 = arith.constant 0 : i32
    %c0_i32_0 = arith.constant 0 : i32
    %c0_i32_1 = arith.constant 0 : i32
    %c0_i32_2 = arith.constant 0 : i32
    return %arg0, %c0_i32, %c0_i32_0, %c0_i32_1 : i32, i32, i32, i32
  }
  func.func @transform_3(%arg0: i32) -> (i32, i32, i32) {
    %c0_i32 = arith.constant 0 : i32
    %c0_i32_0 = arith.constant 0 : i32
    %c0_i32_1 = arith.constant 0 : i32
    return %arg0, %c0_i32, %c0_i32_0 : i32, i32, i32
  }
  func.func @transform_4(%arg0: i32) -> (i32, i32, i32) {
    %c0_i32 = arith.constant 0 : i32
    %c0_i32_0 = arith.constant 0 : i32
    %c0_i32_1 = arith.constant 0 : i32
    return %arg0, %c0_i32, %c0_i32_0 : i32, i32, i32
  }
}

</mosaic_0001>

<bundles_post_ra>
// kernel: tpu_custom_call.1
= control target key start
LH: loop header
LB: loop body
LE: loop exit
PB: predicated region body
PF: predicated region fallthrough
CT: control target
= control target key end

     0   :  { %10 = vsyncpa [#allocation5], 0  ;;  %s8828_s0 = inlined_call_operand.hbm [shape: f32[2,16,16,128], index: 0, kind: input, shape index: {}]   ;;  %s8829_s1 = inlined_call_operand.hbm [shape: bf16[1152,128], index: 1, kind: input, shape index: {}]   ;;  %s8830_s2 = inlined_call_operand.hbm [shape: bf16[2,16,16,128], index: 2, kind: output, shape index: {0}]   ;;  %s8831_s3 = inlined_call_operand.hbm [shape: f32[2,1,128], index: 3, kind: output, shape index: {1}]   ;;  %s8832_s4 = inlined_call_operand.hbm [shape: f32[2,1,128], index: 4, kind: output, shape index: {2}]  }
   0x1   :  { %12 = vsyncpa [#allocation5 + $0x1], 0 }
   0x2   :  { %13 = vsyncpa [#allocation8], 0 }
   0x3   :  { %14 = vsyncpa [#allocation6], 0 }
   0x4   :  { %16 = vsyncpa [#allocation6 + $0x1], 0 }
   0x5   :  { %17 = vsyncpa [#allocation11], 0 }
   0x6   :  { %19 = vsyncpa [#allocation11 + $0x1], 0  ;;  %s7570_s15 = smov 0   ;;  %s7572_s16 = smov 0  }
   0x7   :  { %s7574_s17 = smov 0   ;;  %s7576_s18 = smov 0  }
   0x8 LB: > { %s7591_s19 = sadd.s32 4294967295, %s7535_s18   ;;  %s6006_s20 = sadd.s32 4294967294, %s7535_s18   ;;  %s7535_s18 = sphi %s7576_s18, %s8871_s18   ;;  %s7531_s17 = sphi %s7574_s17, %s8870_s17   ;;  %s7527_s16 = sphi %s7572_s16, %s8869_s16   ;;  %s7523_s15 = sphi %s7570_s15, %s8868_s15  }
   0x9   : > { %p45_p0 = scmp.ne.s32.totalorder %s7527_s16, %s7523_s15  ;;  %p46_p1 = scmp.eq.s32.totalorder %s7591_s19, 0 }
   0xa   : > { %p90_p2 = scmp.eq.s32.totalorder %s7591_s19, 1  ;;  %p96_p3 = scmp.eq.s32.totalorder %s6006_s20, 1 }
   0xb   : > { %p7602_p4 = por %p46_p1, %p45_p0  ;;  %p6007_p5 = scmp.ge.s32.totalorder %s7535_s18, 1 }
   0xc   : > { %p7607_p6 = por %p96_p3, %p45_p0  ;;  %p155_p7 = scmp.lt.s32.totalorder %s7535_s18, 3 }
   0xd   : > { %s166_s25 = sshll.u32 %s8829_s1, 4  ;;  %s7537_s27 = smov [#allocation7]   ;;  %s167_s25 = int_to_ptr.hbm [resolvable:$true] %s166_s25 }
   0xe   : > { %p7615_p8 = pnand %p6007_p5, %p155_p7  ;;  %s168_s28 = sshll.u32 %s7537_s27, 4  ;;  %s169_s28 = int_to_ptr.vmem [resolvable:$true] %s168_s28 }
   0xf   : > { %s7625_s29 = sadd.s32 1, %s7535_s18   ;;  %s7538_s30 = smov 64  }
  0x10   : > { %p7283_p9 = pneg %p7615_p8  ;;  %s7539_s5 = smov 4  }
  0x11   : > { %s29_s6 = ssub.s32 %s7535_s18, %s7625_s29  ;;  %s32_s7 = sadd.s32 1, %s7531_s17 }
  0x12   : > { %p7284_p10 = pnand %p7283_p9, %p46_p1  ;;  %p30_p12 = scmp.eq.s32.totalorder %s29_s6, 0 }
  0x13   : > { %p39_p13 = scmp.ne.s32.totalorder %s7531_s17, %s7527_s16  ;;  %p40_p0 = scmp.eq.s32.totalorder %s7535_s18, 0 }
  0x14   : > { %7286 = dma.hbm_to_vmem [thread:$0]  (!%p7284_p10), %s167_s25, 9216, %s169_s28, [#allocation8], %s7538_s30, %s7538_s30, %s7539_s5  }
  0x15   : > { %p7302_p3 = scmp.lt.s32.totalorder %s7535_s18, 2  ;;  %p41_p5 = por %p40_p0, %p39_p13 }
  0x16   : > { %s7635_s8 = scalar_select %p30_p12, %s7531_s17, %s32_s7  }
  0x17   : > { %p7639_p7 = por %p90_p2, %p39_p13  ;;  %s182_s10 = sand.u32 1, %s7531_s17  }
  0x18   : > { %s6934_s11 = sshll.u32 %s7535_s18, 8  ;;  %s6010_s12 = sshll.u32 %s182_s10, 8 }
  0x19   : > { %s191_s23 = scalar_lea.hbm %s8828_s0, %s6934_s11  ;;  %s186_s25 = scalar_lea.vmem [#allocation4], %s6010_s12 }
  0x1a   : > { %s192_s24 = sshll.u32 %s191_s23, 4  ;;  %s194_s27 = sshll.u32 %s186_s25, 4  ;;  %s193_s24 = int_to_ptr.hbm [resolvable:$true] %s192_s24  ;;  %s195_s27 = int_to_ptr.vmem [resolvable:$true] %s194_s27 }
  0x1b   : > { %p7650_p9 = pnand %p7302_p3, %p41_p5  ;;  %s183_s30 = scalar_lea.sflag [#allocation5], %s182_s10 }
  0x1c   : > { %s7375_s5 = sshra.s32 %s193_s24, 4  ;;  %s7382_s12 = scalar_lea.hbm %s8828_s0, 512  ;;  %s7376_s5 = int_to_ptr.hbm [resolvable:$true] %s7375_s5 }
  0x1d   : > { %s7377_s6 = scalar_lea.hbm %s7376_s5, 256  ;;  %p7379_p10 = pneg %p7650_p9 }
  0x1e   : > { %p7378_p2 = scmp.ne.s32.totalorder %s7376_s5, %s7377_s6  ;;  %p7383_p0 = scmp.lt.s32.totalorder %s7376_s5, %s8828_s0 }
  0x1f   : > { %p7384_p3 = scmp.lt.s32.totalorder %s7382_s12, %s7377_s6 }
  0x20   : > { %p7380_p12 = pnand %p7379_p10, %p7378_p2 }
  0x21   : > { %p7385_p5 = por %p7384_p3, %p7383_p0 }
  0x22   : > { %p7381_p13 = pneg %p7380_p12 }
  0x24   : > { %p7386_p11 = pnand %p7385_p5, %p7381_p13 }
  0x26   : > { %7389 = shalt.err (!%p7386_p11)
}
  0x27   : > { %s7540_s10 = smov 128   ;;  %s7541_s23 = smov 8  }
  0x28   : > { %7290 = dma.hbm_to_vmem [thread:$0]  (!%p7650_p9), %s193_s24, 4096, %s195_s27, %s183_s30, %s7540_s10, %s7540_s10, %s7541_s23  }
  0x29   : > { %206 = sbr.rel (%p7615_p8) target bundleno = 863 (0x35f), region = 28 }
  0x2e   : > { %s7667_s25 = sand.u32 1, %s7527_s16  }
  0x2f   : > { %s6014_s7 = sshll.u32 %s7667_s25, 8  ;;  %s209_s5 = scalar_lea.sflag [#allocation5], %s7667_s25 }
  0x30   : > { %s7671_s6 = scalar_lea.vmem [#allocation4], %s6014_s7 }
  0x31   : > { %7506 = dma.done.wait (%p7602_p4), %s209_s5, 4096  }
  0x32   : > { %7508 = vsyncadd (%p7602_p4), %s209_s5, 4294963200 }
  0x33   : > { %7510 = dma.done.wait (%p46_p1), [#allocation8], 9216  }
  0x34   : > { %7512 = vsyncadd (%p46_p1), [#allocation8], 4294958080  ;;  %v7542_v0 = vmov 0   ;;  %vm291_vm0 = vcmask 1040384   ;;  %vm292_vm1 = vsmask.f32 256 }
  0x35   : > { %284 = vst [vmem:[#allocation2] sm:$0xf] %v7542_v0  ;;  %v7086_v1 = vld [vmem:[#allocation7 + $0x38] sm:$0xff]  ;;  %vm7682_vm2 = vmand %vm291_vm0, %vm292_vm1  ;;  %v7085_v3 = vld [vmem:[#allocation7 + $0x30] sm:$0xff]  ;;  %vm349_vm3 = vsmask.f32 7938 }
  0x36   : > { %285 = vst [vmem:[#allocation2 + $0x4] sm:$0xf] %v7542_v0  ;;  %7247 = vmatpush.bf16.msra.mxu1 %v7086_v1  ;;  %7248 = vmatpush.bf16.msra.mxu2 %v7086_v1  ;;  %v258_v4 = vld [vmem:[%s7671_s6 + $0x30] sm:$0xff]  ;;  %v259_v5 = vld [vmem:[%s7671_s6 + $0x38] sm:$0xff]  ;;  %vm437_vm4 = vsmask.f32 4368 }
  0x37   : > { %286 = vst [vmem:[#allocation2 + $0x8] sm:$0xf] %v7542_v0  ;;  %7249 = vmatpush.bf16.msra.mxu3 %v7086_v1  ;;  %4847 = vmatpush.bf16.msra.mxu0 %v7086_v1  ;;  %v306_v6 = vld [vmem:[#allocation2 + $0x30] sm:$0x1]  ;;  %v411_v7 = vpack.c.bf16 %v258_v4, %v258_v4  ;;  %v266_v8 = vld [vmem:[%s7671_s6 + $0x70] sm:$0xff]  ;;  %v7084_v9 = vld [vmem:[#allocation7 + $0x28] sm:$0xff]  ;;  %v412_v11 = vpack.c.bf16 %v259_v5, %v259_v5 }
  0x38   : > { %288 = vst [vmem:[#allocation2 + $0xcc] sm:$0xf] %v7542_v0  ;;  %v307_v10 = vsel %vm7682_vm2, 0, %v306_v6  ;;  %vm348_vm5 = vcmask 1043456   ;;  %v267_v12 = vld [vmem:[%s7671_s6 + $0x78] sm:$0xff]  ;;  %v419_v14 = vpack.c.bf16 %v266_v8, %v266_v8  ;;  %v274_v15 = vld [vmem:[%s7671_s6 + $0xb0] sm:$0xff]  ;;  %vm7702_vm6 = vmor %vm292_vm1, %vm437_vm4 }
  0x39   : > { %289 = vst [vmem:[#allocation2 + $0xd0] sm:$0xf] %v7542_v0  ;;  %v318_v13 = vld [vmem:[#allocation2 + $0x60] sm:$0x1]  ;;  %v491_v16 = vshrl.u32 %v411_v7, 16  ;;  %v494_v17 = vshll.u32 %v411_v7, 16  ;;  %v420_v19 = vpack.c.bf16 %v267_v12, %v267_v12  ;;  %v427_v29 = vpack.c.bf16 %v274_v15, %v274_v15  ;;  %vm7710_vm7 = vmand %vm348_vm5, %vm349_vm3 }
  0x3a   : > { %290 = vst [vmem:[#allocation2 + $0xd4] sm:$0xf] %v7542_v0  ;;  %v319_v18 = vsel %vm7682_vm2, 0, %v318_v13  ;;  %v275_v20 = vld [vmem:[%s7671_s6 + $0xb8] sm:$0xff]  ;;  %7250 = vmatpush.bf16.msra.mxu1 %v7085_v3  ;;  %7251 = vmatpush.bf16.msra.mxu2 %v7085_v3  ;;  %v499_v21 = vshrl.u32 %v412_v11, 16  ;;  %v502_v22 = vshll.u32 %v412_v11, 16 }
  0x3b   : > { %308 = vst [vmem:[#allocation2 + $0x30] sm:$0x1] %v307_v10  ;;  %v559_v23 = vshrl.u32 %v419_v14, 16  ;;  %v562_v24 = vshll.u32 %v419_v14, 16  ;;  %7252 = vmatpush.bf16.msra.mxu3 %v7085_v3  ;;  %4848 = vmatpush.bf16.msra.mxu0 %v7085_v3  ;;  %v493_v25 = vrot.slane %v491_v16, 7  ;;  %v567_v26 = vshrl.u32 %v420_v19, 16 }
  0x3c   : > { %320 = vst [vmem:[#allocation2 + $0x60] sm:$0x1] %v319_v18  ;;  %v570_v27 = vshll.u32 %v420_v19, 16  ;;  %v330_v28 = vld [vmem:[#allocation2 + $0x90] sm:$0x1]  ;;  %v7696_v30 = vrot.slane %v499_v21, 7  ;;  %v428_v33 = vpack.c.bf16 %v275_v20, %v275_v20 }
  0x3d   : > { %v561_v31 = vrot.slane %v559_v23, 7  ;;  %v331_v32 = vsel %vm7682_vm2, 0, %v330_v28  ;;  %v294_v34 = vld [vmem:[#allocation2] sm:$0x1]  ;;  %v496_v36 = vor.u32 %v494_v17, %v493_v25  ;;  %v497_v37 = vrot.slane %v493_v25, 4  ;;  %v7083_v40 = vld [vmem:[#allocation7 + $0x20] sm:$0xff] }
  0x3e   : > { %v7706_v38 = vrot.slane %v567_v26, 7  ;;  %332 = vst [vmem:[#allocation2 + $0x90] sm:$0x1] %v331_v32  ;;  %v627_v39 = vshrl.u32 %v427_v29, 16  ;;  %7253 = vmatpush.bf16.msra.mxu1 %v7084_v9  ;;  %7254 = vmatpush.bf16.msra.mxu2 %v7084_v9  ;;  %v504_v42 = vor.u32 %v502_v22, %v7696_v30  ;;  %v873_v45 = vld [vmem:[#allocation2 + $0x4] sm:$0xf] }
  0x3f   : > { %v564_v43 = vor.u32 %v562_v24, %v561_v31  ;;  %v565_v44 = vrot.slane %v561_v31, 4  ;;  %7255 = vmatpush.bf16.msra.mxu3 %v7084_v9  ;;  %4849 = vmatpush.bf16.msra.mxu0 %v7084_v9  ;;  %v630_v48 = vshll.u32 %v427_v29, 16  ;;  %905 = vst [vmem:[#allocation3 + $0x24] sm:$0xf] %v873_v45  ;;  %v7082_v49 = vld [vmem:[#allocation7 + $0x18] sm:$0xff]  ;;  %v635_v52 = vshrl.u32 %v428_v33, 16 }
  0x40   : > { %v572_v46 = vor.u32 %v570_v27, %v7706_v38  ;;  %v629_v47 = vrot.slane %v627_v39, 7  ;;  %v505_v50 = vsel %vm7702_vm6, %v497_v37, %v504_v42  ;;  %v638_v53 = vshll.u32 %v428_v33, 16  ;;  %v260_v60 = vld [vmem:[%s7671_s6 + $0x40] sm:$0xff]  ;;  %v261_v63 = vld [vmem:[%s7671_s6 + $0x48] sm:$0xff]  ;;  %v7081_v15 = vld [vmem:[#allocation7 + $0x10] sm:$0xff]  ;;  %s6016_s21 = sshll.u32 %s7667_s25, 7 }
  0x41   : > { %v295_v54 = vsel %vm7682_vm2, 0, %v294_v34  ;;  %784 = vst [vmem:[#allocation2 + $0x34] sm:$0xf] %v505_v50  ;;  %v7727_v62 = vrot.slane %v635_v52, 7  ;;  %v309_v0 = vld [vmem:[#allocation2 + $0x3c] sm:$0x1]  ;;  %v413_v1 = vpack.c.bf16 %v260_v60, %v260_v60  ;;  %v414_v3 = vpack.c.bf16 %v261_v63, %v261_v63 }
  0x42   : > { %v781_v51 = vld [vmem:[#allocation2 + $0x30] sm:$0xf]  ;;  %v573_v56 = vsel %vm7702_vm6, %v565_v44, %v572_v46  ;;  %v632_v58 = vor.u32 %v630_v48, %v629_v47  ;;  %v633_v59 = vrot.slane %v629_v47, 4  ;;  %7256 = vmatpush.bf16.msra.mxu1 %v7083_v40  ;;  %7257 = vmatpush.bf16.msra.mxu2 %v7083_v40  ;;  %v268_v4 = vld [vmem:[%s7671_s6 + $0x80] sm:$0xff]  ;;  %v269_v5 = vld [vmem:[%s7671_s6 + $0x88] sm:$0xff]  ;;  %v310_v12 = vsel %vm7682_vm2, 0, %v309_v0 }
  0x43   : > { %v782_v55 = vsel %vm7710_vm7, %v496_v36, %v781_v51  ;;  %v809_v57 = vld [vmem:[#allocation2 + $0x60] sm:$0xf]  ;;  %7258 = vmatpush.bf16.msra.mxu3 %v7083_v40  ;;  %4850 = vmatpush.bf16.msra.mxu0 %v7083_v40  ;;  %812 = vst [vmem:[#allocation2 + $0x64] sm:$0xf] %v573_v56  ;;  %v640_v6 = vor.u32 %v638_v53, %v7727_v62  ;;  %v508_v8 = vshrl.u32 %v413_v1, 16  ;;  %v276_v10 = vld [vmem:[%s7671_s6 + $0xc0] sm:$0xff] }
  0x44   : > { %783 = vst [vmem:[#allocation2 + $0x30] sm:$0xf] %v782_v55  ;;  %v810_v61 = vsel %vm7710_vm7, %v564_v43, %v809_v57  ;;  %v7733_v9 = vpack.c.bf16 %v268_v4, %v268_v4  ;;  %v516_v13 = vshrl.u32 %v414_v3, 16  ;;  %v519_v14 = vshll.u32 %v414_v3, 16  ;;  %v7080_v22 = vld [vmem:[#allocation7 + $0x8] sm:$0xff]  ;;  %v7079_v40 = vld [vmem:[#allocation7] sm:$0xff] }
  0x45   : > { %811 = vst [vmem:[#allocation2 + $0x60] sm:$0xf] %v810_v61  ;;  %v837_v7 = vld [vmem:[#allocation2 + $0x90] sm:$0xf]  ;;  %v641_v16 = vsel %vm7702_vm6, %v633_v59, %v640_v6  ;;  %v510_v17 = vrot.slane %v508_v8, 7  ;;  %v422_v18 = vpack.c.bf16 %v269_v5, %v269_v5  ;;  %v7745_v21 = vpack.c.bf16 %v276_v10, %v276_v10  ;;  %v277_v25 = vld [vmem:[%s7671_s6 + $0xc8] sm:$0xff] }
  0x46   : > { %v838_v11 = vsel %vm7710_vm7, %v632_v58, %v837_v7  ;;  %296 = vst [vmem:[#allocation2] sm:$0x1] %v295_v54  ;;  %7259 = vmatpush.bf16.msra.mxu1 %v7082_v49  ;;  %7260 = vmatpush.bf16.msra.mxu2 %v7082_v49  ;;  %v576_v19 = vshrl.u32 %v7733_v9, 16  ;;  %v7743_v20 = vrot.slane %v516_v13, 7  ;;  %v511_v24 = vshll.u32 %v413_v1, 16  ;;  %v7102_v50 = vld [vmem:[#allocation7 + $0xb8] sm:$0xff] }
  0x47   : > { %839 = vst [vmem:[#allocation2 + $0x90] sm:$0xf] %v838_v11  ;;  %7261 = vmatpush.bf16.msra.mxu3 %v7082_v49  ;;  %4851 = vmatpush.bf16.msra.mxu0 %v7082_v49  ;;  %v514_v27 = vrot.slane %v510_v17, 4  ;;  %v321_v29 = vld [vmem:[#allocation2 + $0x6c] sm:$0x1]  ;;  %v584_v33 = vshrl.u32 %v422_v18, 16  ;;  %v430_v37 = vpack.c.bf16 %v277_v25, %v277_v25 }
  0x48   : > { %840 = vst [vmem:[#allocation2 + $0x94] sm:$0xf] %v641_v16  ;;  %v881_v23 = vld [vmem:[#allocation2 + $0x34] sm:$0xf]  ;;  %v521_v28 = vor.u32 %v519_v14, %v7743_v20  ;;  %v7749_v31 = vrot.slane %v576_v19, 7  ;;  %v587_v34 = vshll.u32 %v422_v18, 16  ;;  %v513_v43 = vor.u32 %v511_v24, %v510_v17 }
  0x49   : > { %311 = vst [vmem:[#allocation2 + $0x3c] sm:$0x1] %v310_v12  ;;  %v644_v39 = vshrl.u32 %v7745_v21, 16  ;;  %v7753_v45 = vrot.slane %v584_v33, 7  ;;  %v333_v48 = vld [vmem:[#allocation2 + $0x9c] sm:$0x1] }
  0x4a   : > { %913 = vst [vmem:[#allocation3 + $0x144] sm:$0xf] %v881_v23  ;;  %7262 = vmatpush.bf16.msra.mxu1 %v7081_v15  ;;  %7263 = vmatpush.bf16.msra.mxu2 %v7081_v15  ;;  %v889_v36 = vld [vmem:[#allocation2 + $0x64] sm:$0xf]  ;;  %v582_v44 = vrot.slane %v7749_v31, 4  ;;  %v522_v47 = vsel %vm7702_vm6, %v514_v27, %v521_v28  ;;  %v7110_v51 = vld [vmem:[#allocation7 + $0xf8] sm:$0xff] }
  0x4b   : > { %v880_v26 = vld [vmem:[#allocation2 + $0x30] sm:$0xf]  ;;  %7264 = vmatpush.bf16.msra.mxu3 %v7081_v15  ;;  %4852 = vmatpush.bf16.msra.mxu0 %v7081_v15  ;;  %921 = vst [vmem:[#allocation3 + $0x264] sm:$0xf] %v889_v36  ;;  %v322_v52 = vsel %vm7682_vm2, 0, %v321_v29  ;;  %v579_v53 = vshll.u32 %v7733_v9, 16  ;;  %v589_v54 = vor.u32 %v587_v34, %v7753_v45 }
  0x4c   : > { %912 = vst [vmem:[#allocation3 + $0x120] sm:$0xf] %v880_v26  ;;  %v888_v32 = vld [vmem:[#allocation2 + $0x60] sm:$0xf]  ;;  %v7118_v55 = vld [vmem:[#allocation7 + $0x138] sm:$0xff]  ;;  %v7761_v57 = vrot.slane %v644_v39, 7 }
  0x4d   : > { %920 = vst [vmem:[#allocation3 + $0x240] sm:$0xf] %v888_v32  ;;  %v872_v42 = vld [vmem:[#allocation2] sm:$0xf]  ;;  %v652_v58 = vshrl.u32 %v430_v37, 16  ;;  %v7094_v61 = vld [vmem:[#allocation7 + $0x78] sm:$0xff]  ;;  %v590_v0 = vsel %vm7702_vm6, %v582_v44, %v589_v54  ;;  %v581_v32 = vor.u32 %v579_v53, %v7749_v31 }
  0x4e   : > { %v896_v46 = vld [vmem:[#allocation2 + $0x90] sm:$0xf]  ;;  %904 = vst [vmem:[#allocation3] sm:$0xf] %v872_v42  ;;  %7265 = vmatpush.bf16.msra.mxu1 %v7080_v22  ;;  %7266 = vmatpush.bf16.msra.mxu2 %v7080_v22  ;;  %v6939_v60 = vld [vmem:[#allocation3 + $0x20] sm:$0xf0] }
  0x4f   : > { %v897_v49 = vld [vmem:[#allocation2 + $0x94] sm:$0xf]  ;;  %928 = vst [vmem:[#allocation3 + $0x360] sm:$0xf] %v896_v46  ;;  %7267 = vmatpush.bf16.msra.mxu3 %v7080_v22  ;;  %4853 = vmatpush.bf16.msra.mxu0 %v7080_v22  ;;  %v334_v1 = vsel %vm7682_vm2, 0, %v333_v48  ;;  %v655_v3 = vshll.u32 %v430_v37, 16 }
  0x50   : > { %929 = vst [vmem:[#allocation3 + $0x384] sm:$0xf] %v897_v49  ;;  %v788_v56 = vld [vmem:[#allocation2 + $0x3c] sm:$0xf]  ;;  %v650_v5 = vrot.slane %v7761_v57, 4  ;;  %v7770_v6 = vrot.slane %v652_v58, 7 }
  0x51   : > { %v6975_v59 = vld [vmem:[#allocation3 + $0x140] sm:$0xf0]  ;;  %v789_v63 = vsel %vm7710_vm7, %v513_v43, %v788_v56  ;;  %791 = vst [vmem:[#allocation2 + $0x40] sm:$0xf] %v522_v47  ;;  %v7101_v9 = vld [vmem:[#allocation7 + $0xb0] sm:$0xff]  ;;  %v253_v11 = vld [vmem:[%s7671_s6 + $0x8] sm:$0xff] }
  0x52   : > { %790 = vst [vmem:[#allocation2 + $0x3c] sm:$0xf] %v789_v63  ;;  %7268 = vmatpush.bf16.msra.mxu1 %v7079_v40  ;;  %7269 = vmatpush.bf16.msra.mxu2 %v7079_v40  ;;  %v252_v10 = vld [vmem:[%s7671_s6] sm:$0xff]  ;;  %v7109_v13 = vld [vmem:[#allocation7 + $0xf0] sm:$0xff]  ;;  %v647_v14 = vshll.u32 %v7745_v21, 16  ;;  %v657_v15 = vor.u32 %v655_v3, %v7770_v6  ;;  %v406_v22 = vpack.c.bf16 %v253_v11, %v253_v11  ;;  %v7100_v33 = vld [vmem:[#allocation7 + $0xa8] sm:$0xff] }
  0x53   : > { %v6211_v4 = vld [vmem:[#allocation3 + $0x120] sm:$0xf]  ;;  %323 = vst [vmem:[#allocation2 + $0x6c] sm:$0x1] %v322_v52  ;;  %7270 = vmatpush.bf16.msra.mxu3 %v7079_v40  ;;  %4854 = vmatpush.bf16.msra.mxu0 %v7079_v40  ;;  %v7011_v12 = vld [vmem:[#allocation3 + $0x260] sm:$0xf0]  ;;  %v405_v16 = vpack.c.bf16 %v252_v10, %v252_v10 }
  0x54   : > { %v6212_v7 = vor.u32 %v6975_v59, %v6211_v4  ;;  %v6355_v8 = vld [vmem:[#allocation3 + $0x240] sm:$0xf]  ;;  %819 = vst [vmem:[#allocation2 + $0x70] sm:$0xf] %v590_v0  ;;  %v297_v19 = vld [vmem:[#allocation2 + $0xc] sm:$0x1]  ;;  %v658_v26 = vsel %vm7702_vm6, %v650_v5, %v657_v15  ;;  %v649_v44 = vor.u32 %v647_v14, %v7761_v57 }
  0x55   : > { %v6356_v17 = vor.u32 %v7011_v12, %v6355_v8  ;;  %v6067_v18 = vld [vmem:[#allocation3] sm:$0xf]  ;;  %335 = vst [vmem:[#allocation2 + $0x9c] sm:$0x1] %v334_v1  ;;  %v7093_v25 = vld [vmem:[#allocation7 + $0x70] sm:$0xff]  ;;  %v298_v21 = vsel %vm7682_vm2, 0, %v297_v19 }
  0x56   : > { %5025 = vmatpush.bf16.msrb.mxu2 %v7102_v50  ;;  %4875 = vmatmul.bf16.vlgmr.msra.gmra.mxu1 %v6212_v7  ;;  %v6499_v23 = vld [vmem:[#allocation3 + $0x360] sm:$0xf]  ;;  %v6068_v24 = vor.u32 %v6939_v60, %v6067_v18  ;;  %v440_v27 = vshrl.u32 %v405_v16, 16  ;;  %v7117_v28 = vld [vmem:[#allocation7 + $0x130] sm:$0xff]  ;;  %847 = vst [vmem:[#allocation2 + $0xa0] sm:$0xf] %v658_v26 }
  0x57   : > { %5114 = vmatpush.bf16.msrb.mxu3 %v7110_v51  ;;  %5203 = vmatpush.bf16.msrb.mxu0 %v7118_v55  ;;  %v7047_v29 = vld [vmem:[#allocation3 + $0x380] sm:$0xf0]  ;;  %v443_v34 = vshll.u32 %v405_v16, 16  ;;  %v448_v36 = vshrl.u32 %v406_v22, 16  ;;  %299 = vst [vmem:[#allocation2 + $0xc] sm:$0x1] %v298_v21 }
  0x58   : > { %4895 = vmatmul.bf16.vlgmr.msra.gmra.mxu2 %v6356_v17  ;;  %4936 = vmatpush.bf16.msrb.mxu1 %v7094_v61  ;;  %v6500_v37 = vor.u32 %v7047_v29, %v6499_v23  ;;  %v883_v39 = vld [vmem:[#allocation2 + $0x40] sm:$0xf]  ;;  %v442_v40 = vrot.slane %v440_v27, 7  ;;  %v451_v42 = vshll.u32 %v406_v22, 16  ;;  %v7099_v53 = vld [vmem:[#allocation7 + $0xa0] sm:$0xff]  ;;  %v262_v58 = vld [vmem:[%s7671_s6 + $0x50] sm:$0xff] }
  0x59   : > { %4855 = vmatmul.bf16.vlgmr.msra.gmra.mxu0 %v6068_v24  ;;  %v882_v43 = vld [vmem:[#allocation2 + $0x3c] sm:$0xf]  ;;  %915 = vst [vmem:[#allocation3 + $0x18c] sm:$0xf] %v883_v39  ;;  %v7782_v46 = vrot.slane %v448_v36, 7  ;;  %v7108_v47 = vld [vmem:[#allocation7 + $0xe8] sm:$0xff]  ;;  %v415_v1 = vpack.c.bf16 %v262_v58, %v262_v58 }
  0x5a   : > { %5026 = vmatpush.bf16.msrb.mxu2 %v7101_v9  ;;  %4915 = vmatmul.bf16.vlgmr.msra.gmra.mxu3 %v6500_v37  ;;  %914 = vst [vmem:[#allocation3 + $0x168] sm:$0xf] %v882_v43  ;;  %v816_v31 = vld [vmem:[#allocation2 + $0x6c] sm:$0xf]  ;;  %v446_v48 = vrot.slane %v442_v40, 4  ;;  %v7092_v49 = vld [vmem:[#allocation7 + $0x68] sm:$0xff]  ;;  %v445_v57 = vor.u32 %v443_v34, %v442_v40 }
  0x5b   : > { %5115 = vmatpush.bf16.msrb.mxu3 %v7109_v13  ;;  %5204 = vmatpush.bf16.msrb.mxu0 %v7117_v28  ;;  %v817_v50 = vsel %vm7710_vm7, %v581_v32, %v816_v31  ;;  %v891_v51 = vld [vmem:[#allocation2 + $0x70] sm:$0xf]  ;;  %v453_v52 = vor.u32 %v451_v42, %v7782_v46  ;;  %v7107_v54 = vld [vmem:[#allocation7 + $0xe0] sm:$0xff]  ;;  %v7116_v55 = vld [vmem:[#allocation7 + $0x128] sm:$0xff]  ;;  %v525_v12 = vshrl.u32 %v415_v1, 16  ;;  %v528_v13 = vshll.u32 %v415_v1, 16 }
  0x5c   : > { %4937 = vmatpush.bf16.msrb.mxu1 %v7093_v25  ;;  %818 = vst [vmem:[#allocation2 + $0x6c] sm:$0xf] %v817_v50  ;;  %v844_v56 = vld [vmem:[#allocation2 + $0x9c] sm:$0xf]  ;;  %v263_v59 = vld [vmem:[%s7671_s6 + $0x58] sm:$0xff]  ;;  %v270_v3 = vld [vmem:[%s7671_s6 + $0x90] sm:$0xff] }
  0x5d   : > { %923 = vst [vmem:[#allocation3 + $0x2ac] sm:$0xf] %v891_v51  ;;  %v845_v60 = vsel %vm7710_vm7, %v649_v44, %v844_v56  ;;  %v454_v61 = vsel %vm7702_vm6, %v446_v48, %v453_v52  ;;  %v7091_v63 = vld [vmem:[#allocation7 + $0x60] sm:$0xff]  ;;  %v312_v0 = vld [vmem:[#allocation2 + $0x48] sm:$0x1]  ;;  %v271_v4 = vld [vmem:[%s7671_s6 + $0x98] sm:$0xff]  ;;  %v416_v8 = vpack.c.bf16 %v263_v59, %v263_v59  ;;  %v423_v9 = vpack.c.bf16 %v270_v3, %v270_v3 }
  0x5e   : > { %5027 = vmatpush.bf16.msrb.mxu2 %v7100_v33  ;;  %846 = vst [vmem:[#allocation2 + $0x9c] sm:$0xf] %v845_v60  ;;  %v899_v5 = vld [vmem:[#allocation2 + $0xa0] sm:$0xf]  ;;  %v313_v7 = vsel %vm7682_vm2, 0, %v312_v0  ;;  %v278_v10 = vld [vmem:[%s7671_s6 + $0xd0] sm:$0xff]  ;;  %v424_v18 = vpack.c.bf16 %v271_v4, %v271_v4 }
  0x5f   : > { %5116 = vmatpush.bf16.msrb.mxu3 %v7108_v47  ;;  %5205 = vmatpush.bf16.msrb.mxu0 %v7116_v55  ;;  %931 = vst [vmem:[#allocation3 + $0x3cc] sm:$0xf] %v899_v5  ;;  %v760_v11 = vld [vmem:[#allocation2 + $0xc] sm:$0xf]  ;;  %v533_v16 = vshrl.u32 %v416_v8, 16  ;;  %v536_v17 = vshll.u32 %v416_v8, 16  ;;  %v431_v21 = vpack.c.bf16 %v278_v10, %v278_v10 }
  0x60   : > { %4938 = vmatpush.bf16.msrb.mxu1 %v7092_v49  ;;  %v6984_v14 = vld [vmem:[#allocation3 + $0x188] sm:$0xf0]  ;;  %v761_v15 = vsel %vm7710_vm7, %v445_v57, %v760_v11  ;;  %763 = vst [vmem:[#allocation2 + $0x10] sm:$0xf] %v454_v61  ;;  %v527_v22 = vrot.slane %v525_v12, 7  ;;  %v593_v23 = vshrl.u32 %v423_v9, 16 }
  0x61   : > { %v6247_v19 = vld [vmem:[#allocation3 + $0x168] sm:$0xf]  ;;  %762 = vst [vmem:[#allocation2 + $0xc] sm:$0xf] %v761_v15  ;;  %v7800_v25 = vrot.slane %v533_v16, 7  ;;  %v279_v33 = vld [vmem:[%s7671_s6 + $0xd8] sm:$0xff] }
  0x62   : > { %5028 = vmatpush.bf16.msrb.mxu2 %v7099_v53  ;;  %v6248_v24 = vor.u32 %v6984_v14, %v6247_v19  ;;  %314 = vst [vmem:[#allocation2 + $0x48] sm:$0x1] %v313_v7  ;;  %v324_v26 = vld [vmem:[#allocation2 + $0x78] sm:$0x1]  ;;  %v531_v28 = vrot.slane %v527_v22, 4  ;;  %v595_v32 = vrot.slane %v593_v23, 7  ;;  %v530_v39 = vor.u32 %v528_v13, %v527_v22 }
  0x63   : > { %5117 = vmatpush.bf16.msrb.mxu3 %v7107_v54  ;;  %v890_v27 = vld [vmem:[#allocation2 + $0x6c] sm:$0xf]  ;;  %v325_v29 = vsel %vm7682_vm2, 0, %v324_v26  ;;  %v538_v34 = vor.u32 %v536_v17, %v7800_v25  ;;  %v601_v36 = vshrl.u32 %v424_v18, 16  ;;  %v596_v40 = vshll.u32 %v423_v9, 16  ;;  %v7098_v1 = vld [vmem:[#allocation7 + $0x98] sm:$0xff] }
  0x64   : > { %4939 = vmatpush.bf16.msrb.mxu1 %v7091_v63  ;;  %922 = vst [vmem:[#allocation3 + $0x288] sm:$0xf] %v890_v27  ;;  %v604_v42 = vshll.u32 %v424_v18, 16  ;;  %v432_v43 = vpack.c.bf16 %v279_v33, %v279_v33  ;;  %v599_v47 = vrot.slane %v595_v32, 4  ;;  %v661_v48 = vshrl.u32 %v431_v21, 16  ;;  %v254_v3 = vld [vmem:[%s7671_s6 + $0x10] sm:$0xff] }
  0x65   : > { %v898_v37 = vld [vmem:[#allocation2 + $0x9c] sm:$0xf]  ;;  %326 = vst [vmem:[#allocation2 + $0x78] sm:$0x1] %v325_v29  ;;  %v539_v44 = vsel %vm7702_vm6, %v531_v28, %v538_v34  ;;  %v7808_v31 = vrot.slane %v601_v36, 7  ;;  %v598_v57 = vor.u32 %v596_v40, %v595_v32  ;;  %v664_v59 = vshll.u32 %v431_v21, 16 }
  0x66   : > { %4880 = vmatmul.bf16.gmra.mxu1 %v6248_v24  ;;  %930 = vst [vmem:[#allocation3 + $0x3a8] sm:$0xf] %v898_v37  ;;  %v7020_v49 = vld [vmem:[#allocation3 + $0x2a8] sm:$0xf0]  ;;  %v336_v51 = vld [vmem:[#allocation2 + $0xa8] sm:$0x1]  ;;  %v407_v8 = vpack.c.bf16 %v254_v3, %v254_v3  ;;  %5029 = vmatpush.bf16.msrb.mxu2 %v7098_v1 }
  0x67   : > { %v875_v50 = vld [vmem:[#allocation2 + $0x10] sm:$0xf]  ;;  %798 = vst [vmem:[#allocation2 + $0x4c] sm:$0xf] %v539_v44  ;;  %v606_v53 = vor.u32 %v604_v42, %v7808_v31  ;;  %v337_v54 = vsel %vm7682_vm2, 0, %v336_v51  ;;  %v663_v58 = vrot.slane %v661_v48, 7 }
  0x68   : > { %v874_v52 = vld [vmem:[#allocation2 + $0xc] sm:$0xf]  ;;  %907 = vst [vmem:[#allocation3 + $0x6c] sm:$0xf] %v875_v50  ;;  %v7056_v55 = vld [vmem:[#allocation3 + $0x3c8] sm:$0xf0] }
  0x69   : > { %906 = vst [vmem:[#allocation3 + $0x48] sm:$0xf] %v874_v52  ;;  %v795_v56 = vld [vmem:[#allocation2 + $0x48] sm:$0xf]  ;;  %v607_v61 = vsel %vm7702_vm6, %v599_v47, %v606_v53  ;;  %v669_v63 = vshrl.u32 %v432_v43, 16  ;;  %v672_v0 = vshll.u32 %v432_v43, 16  ;;  %v666_v16 = vor.u32 %v664_v59, %v663_v58 }
  0x6a   : > { %v796_v60 = vsel %vm7710_vm7, %v530_v39, %v795_v56  ;;  %338 = vst [vmem:[#allocation2 + $0xa8] sm:$0x1] %v337_v54  ;;  %v667_v5 = vrot.slane %v663_v58, 4  ;;  %v255_v7 = vld [vmem:[%s7671_s6 + $0x18] sm:$0xff]  ;;  %v300_v17 = vld [vmem:[#allocation2 + $0x18] sm:$0x1] }
  0x6b   : > { %v6391_v4 = vld [vmem:[#allocation3 + $0x288] sm:$0xf]  ;;  %797 = vst [vmem:[#allocation2 + $0x48] sm:$0xf] %v796_v60  ;;  %v7819_v11 = vrot.slane %v669_v63, 7  ;;  %v408_v12 = vpack.c.bf16 %v255_v7, %v255_v7  ;;  %v7106_v13 = vld [vmem:[#allocation7 + $0xd8] sm:$0xff] }
  0x6c   : > { %v6392_v9 = vor.u32 %v7020_v49, %v6391_v4  ;;  %v823_v10 = vld [vmem:[#allocation2 + $0x78] sm:$0xf]  ;;  %826 = vst [vmem:[#allocation2 + $0x7c] sm:$0xf] %v607_v61  ;;  %v457_v18 = vshrl.u32 %v407_v8, 16  ;;  %v301_v24 = vsel %vm7682_vm2, 0, %v300_v17  ;;  %5118 = vmatpush.bf16.msrb.mxu3 %v7106_v13 }
  0x6d   : > { %v6535_v14 = vld [vmem:[#allocation3 + $0x3a8] sm:$0xf]  ;;  %v824_v15 = vsel %vm7710_vm7, %v598_v57, %v823_v10  ;;  %v674_v23 = vor.u32 %v672_v0, %v7819_v11  ;;  %v460_v26 = vshll.u32 %v407_v8, 16  ;;  %v465_v28 = vshrl.u32 %v408_v12, 16  ;;  %302 = vst [vmem:[#allocation2 + $0x18] sm:$0x1] %v301_v24 }
  0x6e   : > { %4900 = vmatmul.bf16.gmra.mxu2 %v6392_v9  ;;  %v6536_v19 = vor.u32 %v7056_v55, %v6535_v14  ;;  %v885_v22 = vld [vmem:[#allocation2 + $0x4c] sm:$0xf]  ;;  %825 = vst [vmem:[#allocation2 + $0x78] sm:$0xf] %v824_v15  ;;  %v459_v27 = vrot.slane %v457_v18, 7  ;;  %v468_v33 = vshll.u32 %v408_v12, 16 }
  0x6f   : > { %v6948_v21 = vld [vmem:[#allocation3 + $0x68] sm:$0xf0]  ;;  %917 = vst [vmem:[#allocation3 + $0x1d4] sm:$0xf] %v885_v22  ;;  %v675_v32 = vsel %vm7702_vm6, %v667_v5, %v674_v23  ;;  %v7115_v34 = vld [vmem:[#allocation7 + $0x120] sm:$0xff]  ;;  %v7828_v40 = vrot.slane %v465_v28, 7 }
  0x70   : > { %4920 = vmatmul.bf16.gmra.mxu3 %v6536_v19  ;;  %v6103_v29 = vld [vmem:[#allocation3 + $0x48] sm:$0xf]  ;;  %854 = vst [vmem:[#allocation2 + $0xac] sm:$0xf] %v675_v32  ;;  %v463_v39 = vrot.slane %v459_v27, 4  ;;  %5206 = vmatpush.bf16.msrb.mxu0 %v7115_v34  ;;  %v7090_v44 = vld [vmem:[#allocation7 + $0x58] sm:$0xff]  ;;  %v462_v51 = vor.u32 %v460_v26, %v459_v27 }
  0x71   : > { %v6104_v36 = vor.u32 %v6948_v21, %v6103_v29  ;;  %v851_v37 = vld [vmem:[#allocation2 + $0xa8] sm:$0xf]  ;;  %v470_v49 = vor.u32 %v468_v33, %v7828_v40  ;;  %4940 = vmatpush.bf16.msrb.mxu1 %v7090_v44  ;;  %v7114_v52 = vld [vmem:[#allocation7 + $0x118] sm:$0xff]  ;;  %v264_v54 = vld [vmem:[%s7671_s6 + $0x60] sm:$0xff]  ;;  %vm984_vm8 = vsmask.f32 3328 }
  0x72   : > { %v884_v42 = vld [vmem:[#allocation2 + $0x48] sm:$0xf]  ;;  %v852_v43 = vsel %vm7710_vm7, %v666_v16, %v851_v37  ;;  %v265_v57 = vld [vmem:[%s7671_s6 + $0x68] sm:$0xff]  ;;  %v417_v58 = vpack.c.bf16 %v264_v54, %v264_v54  ;;  %v272_v59 = vld [vmem:[%s7671_s6 + $0xa0] sm:$0xff]  ;;  %vm985_vm9 = vsmask.f32 7440 }
  0x73   : > { %v7097_v47 = vld [vmem:[#allocation7 + $0x90] sm:$0xff]  ;;  %4860 = vmatmul.bf16.gmra.mxu0 %v6104_v36  ;;  %916 = vst [vmem:[#allocation3 + $0x1b0] sm:$0xf] %v884_v42  ;;  %v893_v48 = vld [vmem:[#allocation2 + $0x7c] sm:$0xf]  ;;  %v471_v56 = vsel %vm7702_vm6, %v463_v39, %v470_v49  ;;  %v418_v63 = vpack.c.bf16 %v265_v57, %v265_v57  ;;  %v425_v0 = vpack.c.bf16 %v272_v59, %v272_v59  ;;  %v273_v13 = vld [vmem:[%s7671_s6 + $0xa8] sm:$0xff] }
  0x74   : > { %v7105_v50 = vld [vmem:[#allocation7 + $0xd0] sm:$0xff]  ;;  %925 = vst [vmem:[#allocation3 + $0x2f4] sm:$0xf] %v893_v48  ;;  %5030 = vmatpush.bf16.msrb.mxu2 %v7097_v47  ;;  %5207 = vmatpush.bf16.msrb.mxu0 %v7114_v52  ;;  %v315_v61 = vld [vmem:[#allocation2 + $0x54] sm:$0x1]  ;;  %v542_v4 = vshrl.u32 %v417_v58, 16  ;;  %v426_v17 = vpack.c.bf16 %v273_v13, %v273_v13  ;;  %vm7889_vm13 = vmor %vm984_vm8, %vm985_vm9 }
  0x75   : > { %v7089_v53 = vld [vmem:[#allocation7 + $0x50] sm:$0xff]  ;;  %v892_v55 = vld [vmem:[#allocation2 + $0x78] sm:$0xf]  ;;  %853 = vst [vmem:[#allocation2 + $0xa8] sm:$0xf] %v852_v43  ;;  %5119 = vmatpush.bf16.msrb.mxu3 %v7105_v50  ;;  %v316_v3 = vsel %vm7682_vm2, 0, %v315_v61 }
  0x76   : > { %v6993_v60 = vld [vmem:[#allocation3 + $0x1d0] sm:$0xf0]  ;;  %924 = vst [vmem:[#allocation3 + $0x2d0] sm:$0xf] %v892_v55  ;;  %v767_v1 = vld [vmem:[#allocation2 + $0x18] sm:$0xf]  ;;  %4941 = vmatpush.bf16.msrb.mxu1 %v7089_v53 }
  0x77   : > { %770 = vst [vmem:[#allocation2 + $0x1c] sm:$0xf] %v471_v56  ;;  %v901_v5 = vld [vmem:[#allocation2 + $0xac] sm:$0xf]  ;;  %v768_v7 = vsel %vm7710_vm7, %v462_v51, %v767_v1  ;;  %v545_v8 = vshll.u32 %v417_v58, 16  ;;  %v550_v9 = vshrl.u32 %v418_v63, 16 }
  0x78   : > { %317 = vst [vmem:[#allocation2 + $0x54] sm:$0x1] %v316_v3  ;;  %v544_v10 = vrot.slane %v542_v4, 7  ;;  %v553_v12 = vshll.u32 %v418_v63, 16  ;;  %v610_v14 = vshrl.u32 %v425_v0, 16  ;;  %v613_v18 = vshll.u32 %v425_v0, 16 }
  0x79   : > { %933 = vst [vmem:[#allocation3 + $0x414] sm:$0xf] %v901_v5  ;;  %v7843_v16 = vrot.slane %v550_v9, 7  ;;  %v327_v24 = vld [vmem:[#allocation2 + $0x84] sm:$0x1]  ;;  %v618_v32 = vshrl.u32 %v426_v17, 16 }
  0x7a   : > { %v6283_v15 = vld [vmem:[#allocation3 + $0x1b0] sm:$0xf]  ;;  %769 = vst [vmem:[#allocation2 + $0x18] sm:$0xf] %v768_v7  ;;  %v548_v23 = vrot.slane %v544_v10, 4  ;;  %v612_v26 = vrot.slane %v610_v14, 7  ;;  %v547_v27 = vor.u32 %v545_v8, %v544_v10 }
  0x7b   : > { %v6284_v19 = vor.u32 %v6993_v60, %v6283_v15  ;;  %v7029_v22 = vld [vmem:[#allocation3 + $0x2f0] sm:$0xf0]  ;;  %v555_v28 = vor.u32 %v553_v12, %v7843_v16  ;;  %v328_v29 = vsel %vm7682_vm2, 0, %v327_v24  ;;  %v280_v33 = vld [vmem:[%s7671_s6 + $0xe0] sm:$0xff]  ;;  %v621_v37 = vshll.u32 %v426_v17, 16  ;;  %v281_v48 = vld [vmem:[%s7671_s6 + $0xe8] sm:$0xff] }
  0x7c   : > { %v900_v21 = vld [vmem:[#allocation2 + $0xa8] sm:$0xf]  ;;  %v616_v36 = vrot.slane %v612_v26, 4  ;;  %v433_v39 = vpack.c.bf16 %v280_v33, %v280_v33  ;;  %329 = vst [vmem:[#allocation2 + $0x84] sm:$0x1] %v328_v29  ;;  %v7851_v47 = vrot.slane %v618_v32, 7  ;;  %v434_v51 = vpack.c.bf16 %v281_v48, %v281_v48 }
  0x7d   : > { %4885 = vmatmul.bf16.gmra.mxu1 %v6284_v19  ;;  %v6427_v34 = vld [vmem:[#allocation3 + $0x2d0] sm:$0xf]  ;;  %932 = vst [vmem:[#allocation3 + $0x3f0] sm:$0xf] %v900_v21  ;;  %v556_v44 = vsel %vm7702_vm6, %v548_v23, %v555_v28  ;;  %v339_v50 = vld [vmem:[#allocation2 + $0xb4] sm:$0x1]  ;;  %v615_v59 = vor.u32 %v613_v18, %v612_v26 }
  0x7e   : > { %v6428_v42 = vor.u32 %v7029_v22, %v6427_v34  ;;  %v877_v43 = vld [vmem:[#allocation2 + $0x1c] sm:$0xf]  ;;  %805 = vst [vmem:[#allocation2 + $0x58] sm:$0xf] %v556_v44  ;;  %v623_v54 = vor.u32 %v621_v37, %v7851_v47  ;;  %v340_v55 = vsel %vm7682_vm2, 0, %v339_v50  ;;  %v678_v57 = vshrl.u32 %v433_v39, 16 }
  0x7f   : > { %909 = vst [vmem:[#allocation3 + $0xb4] sm:$0xf] %v877_v43  ;;  %v802_v49 = vld [vmem:[#allocation2 + $0x54] sm:$0xf]  ;;  %v681_v58 = vshll.u32 %v433_v39, 16  ;;  %v686_v61 = vshrl.u32 %v434_v51, 16 }
  0x80   : > { %4905 = vmatmul.bf16.gmra.mxu2 %v6428_v42  ;;  %v7065_v52 = vld [vmem:[#allocation3 + $0x410] sm:$0xf0]  ;;  %v803_v53 = vsel %vm7710_vm7, %v547_v27, %v802_v49  ;;  %v624_v60 = vsel %vm7702_vm6, %v616_v36, %v623_v54  ;;  %v689_v63 = vshll.u32 %v434_v51, 16  ;;  %v7096_v0 = vld [vmem:[#allocation7 + $0x88] sm:$0xff]  ;;  %v256_v1 = vld [vmem:[%s7671_s6 + $0x20] sm:$0xff]  ;;  %v680_v3 = vrot.slane %v678_v57, 7 }
  0x81   : > { %v876_v56 = vld [vmem:[#allocation2 + $0x18] sm:$0xf]  ;;  %804 = vst [vmem:[#allocation2 + $0x54] sm:$0xf] %v803_v53  ;;  %v257_v4 = vld [vmem:[%s7671_s6 + $0x28] sm:$0xff]  ;;  %v409_v7 = vpack.c.bf16 %v256_v1, %v256_v1  ;;  %v7863_v9 = vrot.slane %v686_v61, 7  ;;  %5031 = vmatpush.bf16.msrb.mxu2 %v7096_v0 }
  0x82   : > { %908 = vst [vmem:[#allocation3 + $0x90] sm:$0xf] %v876_v56  ;;  %v303_v5 = vld [vmem:[#allocation2 + $0x24] sm:$0x1]  ;;  %v410_v12 = vpack.c.bf16 %v257_v4, %v257_v4  ;;  %v684_v15 = vrot.slane %v680_v3, 4  ;;  %v7113_v26 = vld [vmem:[#allocation7 + $0x110] sm:$0xff]  ;;  %v683_v32 = vor.u32 %v681_v58, %v680_v3 }
  0x83   : > { %833 = vst [vmem:[#allocation2 + $0x88] sm:$0xf] %v624_v60  ;;  %v304_v10 = vsel %vm7682_vm2, 0, %v303_v5  ;;  %v830_v14 = vld [vmem:[#allocation2 + $0x84] sm:$0xf]  ;;  %v474_v17 = vshrl.u32 %v409_v7, 16  ;;  %v691_v22 = vor.u32 %v689_v63, %v7863_v9  ;;  %5208 = vmatpush.bf16.msrb.mxu0 %v7113_v26 }
  0x84   : > { %v6571_v8 = vld [vmem:[#allocation3 + $0x3f0] sm:$0xf]  ;;  %341 = vst [vmem:[#allocation2 + $0xb4] sm:$0x1] %v340_v55  ;;  %v831_v19 = vsel %vm7710_vm7, %v615_v59, %v830_v14  ;;  %v477_v23 = vshll.u32 %v409_v7, 16  ;;  %v7104_v24 = vld [vmem:[#allocation7 + $0xc8] sm:$0xff] }
  0x85   : > { %v6572_v13 = vor.u32 %v7065_v52, %v6571_v8  ;;  %305 = vst [vmem:[#allocation2 + $0x24] sm:$0x1] %v304_v10  ;;  %v887_v21 = vld [vmem:[#allocation2 + $0x58] sm:$0xf]  ;;  %v476_v27 = vrot.slane %v474_v17, 7  ;;  %v482_v28 = vshrl.u32 %v410_v12, 16  ;;  %v692_v33 = vsel %vm7702_vm6, %v684_v15, %v691_v22  ;;  %5120 = vmatpush.bf16.msrb.mxu3 %v7104_v24 }
  0x86   : > { %v6957_v18 = vld [vmem:[#allocation3 + $0xb0] sm:$0xf0]  ;;  %832 = vst [vmem:[#allocation2 + $0x84] sm:$0xf] %v831_v19  ;;  %v485_v34 = vshll.u32 %v410_v12, 16  ;;  %v7088_v36 = vld [vmem:[#allocation7 + $0x48] sm:$0xff] }
  0x87   : > { %4925 = vmatmul.bf16.gmra.mxu3 %v6572_v13  ;;  %919 = vst [vmem:[#allocation3 + $0x21c] sm:$0xf] %v887_v21  ;;  %v479_v39 = vor.u32 %v477_v23, %v476_v27  ;;  %v480_v42 = vrot.slane %v476_v27, 4  ;;  %v7872_v43 = vrot.slane %v482_v28, 7  ;;  %4942 = vmatpush.bf16.msrb.mxu1 %v7088_v36  ;;  %v7095_v49 = vld [vmem:[#allocation7 + $0x80] sm:$0xff]  ;;  %v7112_v53 = vld [vmem:[#allocation7 + $0x108] sm:$0xff] }
  0x88   : > { %v886_v29 = vld [vmem:[#allocation2 + $0x54] sm:$0xf]  ;;  %861 = vst [vmem:[#allocation2 + $0xb8] sm:$0xf] %v692_v33  ;;  %v7103_v50 = vld [vmem:[#allocation7 + $0xc0] sm:$0xff]  ;;  %5032 = vmatpush.bf16.msrb.mxu2 %v7095_v49  ;;  %5209 = vmatpush.bf16.msrb.mxu0 %v7112_v53  ;;  %vm1531_vm10 = vcmask 1042432  }
  0x89   : > { %v6139_v37 = vld [vmem:[#allocation3 + $0x90] sm:$0xf]  ;;  %918 = vst [vmem:[#allocation3 + $0x1f8] sm:$0xf] %v886_v29  ;;  %v487_v52 = vor.u32 %v485_v34, %v7872_v43  ;;  %v7087_v56 = vld [vmem:[#allocation7 + $0x40] sm:$0xff]  ;;  %5121 = vmatpush.bf16.msrb.mxu3 %v7103_v50  ;;  %vm1532_vm11 = vcmask 1046532  }
  0x8a   : > { %v6140_v44 = vor.u32 %v6957_v18, %v6139_v37  ;;  %v895_v48 = vld [vmem:[#allocation2 + $0x88] sm:$0xf]  ;;  %v7111_v57 = vld [vmem:[#allocation7 + $0x100] sm:$0xff]  ;;  %v936_v61 = vld [vmem:[#allocation2] sm:$0xf]  ;;  %s8616_s26 = scalar_lea.vmem [#allocation9], %s6016_s21 }
  0x8b   : > { %927 = vst [vmem:[#allocation3 + $0x33c] sm:$0xf] %v895_v48  ;;  %v858_v51 = vld [vmem:[#allocation2 + $0xb4] sm:$0xf]  ;;  %v488_v58 = vsel %vm7702_vm6, %v480_v42, %v487_v52  ;;  %v351_v60 = vld [vmem:[#allocation2 + $0x8] sm:$0xf]  ;;  %4943 = vmatpush.bf16.msrb.mxu1 %v7087_v56  ;;  %vm7883_vm12 = vmor %vm1531_vm10, %vm1532_vm11 }
  0x8c   : > { %4865 = vmatmul.bf16.gmra.mxu0 %v6140_v44  ;;  %v859_v54 = vsel %vm7710_vm7, %v683_v32, %v858_v51  ;;  %v774_v55 = vld [vmem:[#allocation2 + $0x24] sm:$0xf]  ;;  %v352_v0 = vsel %vm7710_vm7, 0, %v351_v60  ;;  %v988_v1 = vshrl.u32 %v936_v61, 16  ;;  %777 = vst [vmem:[#allocation2 + $0x28] sm:$0xf] %v488_v58 }
  0x8d   : > { %860 = vst [vmem:[#allocation2 + $0xb4] sm:$0xf] %v859_v54  ;;  %v775_v59 = vsel %vm7710_vm7, %v479_v39, %v774_v55  ;;  %v894_v63 = vld [vmem:[#allocation2 + $0x84] sm:$0xf]  ;;  %5210 = vmatpush.bf16.msrb.mxu0 %v7111_v57  ;;  %v991_v12 = vshll.u32 %v936_v61, 16  ;;  %v7134_v32 = vld [vmem:[#allocation7 + $0x1b8] sm:$0xff] }
  0x8e   : > { %776 = vst [vmem:[#allocation2 + $0x24] sm:$0xf] %v775_v59  ;;  %v7002_v3 = vld [vmem:[#allocation3 + $0x218] sm:$0xf0]  ;;  %v937_v4 = vld [vmem:[#allocation2 + $0x4] sm:$0xf]  ;;  %5381 = vmatpush.bf16.msra.mxu2 %v7134_v32 }
  0x8f   : > { %926 = vst [vmem:[#allocation3 + $0x318] sm:$0xf] %v894_v63  ;;  %v903_v8 = vld [vmem:[#allocation2 + $0xb8] sm:$0xf]  ;;  %v990_v10 = vrot.slane %v988_v1, 4  ;;  %v997_v14 = vshll.u32 %v937_v4, 16 }
  0x90   : > { %v6319_v5 = vld [vmem:[#allocation3 + $0x1f8] sm:$0xf]  ;;  %353 = vst [vmem:[#allocation2 + $0x8] sm:$0xf] %v352_v0  ;;  %v1001_v15 = vshrl.u32 %v937_v4, 16  ;;  %v993_v17 = vrot.slane %v991_v12, 5 }
  0x91   : > { %v6320_v7 = vor.u32 %v7002_v3, %v6319_v5  ;;  %935 = vst [vmem:[#allocation3 + $0x45c] sm:$0xf] %v903_v8  ;;  %v1435_v18 = vld [vmem:[#allocation2] sm:$0xe]  ;;  %v1436_v19 = vld [vmem:[#allocation2 + $0x4] sm:$0xf] }
  0x92   : > { %v7038_v13 = vld [vmem:[#allocation3 + $0x338] sm:$0xf0]  ;;  %v999_v23 = vrot.slane %v997_v14, 5  ;;  %v1003_v24 = vrot.slane %v1001_v15, 4  ;;  %v6017_v26 = vrot.slane %v1435_v18, 9  ;;  %v994_v27 = vor.u32 %v993_v17, %v990_v10  ;;  %s7151_s24 = sshll.u32 %s7591_s19, 7 }
  0x93   : > { %4890 = vmatmul.bf16.gmra.mxu1 %v6320_v7  ;;  %v1536_v29 = vrot.slane %v1436_v19, 5  ;;  %v879_v39 = vld [vmem:[#allocation2 + $0x28] sm:$0xf]  ;;  %v1710_v44 = vld [vmem:[#allocation2 + $0xc] sm:$0xf]  ;;  %v7142_v19 = vld [vmem:[#allocation7 + $0x1f8] sm:$0xff]  ;;  %s5840_s30 = scalar_lea.hbm %s8830_s2, %s7151_s24 }
  0x94   : > { %v902_v22 = vld [vmem:[#allocation2 + $0xb4] sm:$0xf]  ;;  %v1004_v36 = vor.u32 %v1003_v24, %v999_v23  ;;  %v995_v42 = vrot.slane %v994_v27, 4  ;;  %911 = vst [vmem:[#allocation3 + $0xfc] sm:$0xf] %v879_v39  ;;  %5470 = vmatpush.bf16.msra.mxu3 %v7142_v19  ;;  %s5841_s11 = sshll.u32 %s8616_s26, 4  ;;  %s5842_s11 = int_to_ptr.vmem [resolvable:$true] %s5841_s11 }
  0x95   : > { %934 = vst [vmem:[#allocation3 + $0x438] sm:$0xf] %v902_v22  ;;  %v878_v21 = vld [vmem:[#allocation2 + $0x24] sm:$0xf]  ;;  %v1537_v49 = vsel %vm7883_vm12, %v6017_v26, %v1536_v29  ;;  %v1538_v50 = vrot.slane %v1536_v29, 4  ;;  %v7126_v22 = vld [vmem:[#allocation7 + $0x178] sm:$0xff] }
  0x96   : > { %v6463_v33 = vld [vmem:[#allocation3 + $0x318] sm:$0xf]  ;;  %910 = vst [vmem:[#allocation3 + $0xd8] sm:$0xf] %v878_v21  ;;  %v1000_v52 = vsel %vm7889_vm13, %v995_v42, %v999_v23  ;;  %v1005_v53 = vrot.slane %v1004_v36, 4  ;;  %5292 = vmatpush.bf16.msra.mxu1 %v7126_v22  ;;  %s5843_s12 = sshll.u32 %s5840_s30, 4  ;;  %s5844_s12 = int_to_ptr.hbm [resolvable:$true] %s5843_s12 }
  0x97   : > { %v6464_v37 = vor.u32 %v7038_v13, %v6463_v33  ;;  %v938_v48 = vld [vmem:[#allocation2 + $0x8] sm:$0x1]  ;;  %1403 = vst [vmem:[#allocation3 + $0x4] sm:$0xf] %v1000_v52  ;;  %v1711_v57 = vld [vmem:[#allocation2 + $0x10] sm:$0xf] }
  0x98   : > { %v7074_v51 = vld [vmem:[#allocation3 + $0x458] sm:$0xf0]  ;;  %v1007_v54 = vshll.u32 %v938_v48, 16  ;;  %v1437_v55 = vld [vmem:[#allocation2 + $0x8] sm:$0x1]  ;;  %v455_v48 = vrot.slane %v7782_v46, 4 }
  0x99   : > { %4910 = vmatmul.bf16.gmra.mxu2 %v6464_v37  ;;  %v1539_v56 = vrot.slane %v1437_v55, 5  ;;  %v354_v58 = vld [vmem:[#allocation2 + $0x14] sm:$0xf]  ;;  %1678 = vst [vmem:[#allocation3 + $0x8] sm:$0xf] %v1537_v49  ;;  %s5821_s13 = scalar_lea.sflag [#allocation6], %s7667_s25 }
  0x9a   : > { %v1009_v59 = vrot.slane %v1007_v54, 5  ;;  %v355_v60 = vsel %vm7710_vm7, 0, %v354_v58  ;;  %v1774_v61 = vld [vmem:[#allocation2 + $0xc] sm:$0xf]  ;;  %1742 = vst [vmem:[#allocation3 + $0xc] sm:$0xf] %v1710_v44 }
  0x9b   : > { %v1540_v0 = vsel %vm7883_vm12, %v1538_v50, %v1539_v56  ;;  %v1775_v1 = vld [vmem:[#allocation2 + $0x10] sm:$0xf]  ;;  %v1823_v7 = vshrl.u32 %v1774_v61, 16  ;;  %v1826_v8 = vshll.u32 %v1774_v61, 16  ;;  %v939_v12 = vld [vmem:[#allocation2 + $0xc] sm:$0xf] }
  0x9c   : > { %v6607_v63 = vld [vmem:[#allocation3 + $0x438] sm:$0xf]  ;;  %v1010_v5 = vsel %vm7889_vm13, %v1005_v53, %v1009_v59  ;;  %1679 = vst [vmem:[#allocation3 + $0x2c] sm:$0xf] %v1540_v0  ;;  %v1832_v10 = vshll.u32 %v1775_v1, 16  ;;  %v1836_v18 = vshrl.u32 %v1775_v1, 16 }
  0x9d   : > { %v6608_v3 = vor.u32 %v7074_v51, %v6607_v63  ;;  %v6175_v4 = vld [vmem:[#allocation3 + $0xd8] sm:$0xf]  ;;  %1404 = vst [vmem:[#allocation3 + $0x28] sm:$0xf] %v1010_v5  ;;  %v6966_v13 = vld [vmem:[#allocation3 + $0xf8] sm:$0xf0] }
  0x9e   : > { %1743 = vst [vmem:[#allocation3 + $0x30] sm:$0xf] %v1711_v57  ;;  %v1825_v14 = vrot.slane %v1823_v7, 4  ;;  %v1828_v15 = vrot.slane %v1826_v8, 5  ;;  %v6176_v17 = vor.u32 %v6966_v13, %v6175_v4  ;;  %v7150_v24 = vld [vmem:[#allocation7 + $0x238] sm:$0xff]  ;;  %v1012_v21 = vshrl.u32 %v939_v12, 16 }
  0x9f   : > { %4930 = vmatmul.bf16.gmra.mxu3 %v6608_v3  ;;  %356 = vst [vmem:[#allocation2 + $0x14] sm:$0xf] %v355_v60  ;;  %v940_v26 = vld [vmem:[#allocation2 + $0x10] sm:$0xf]  ;;  %v1834_v29 = vrot.slane %v1832_v10, 5  ;;  %v1015_v32 = vshll.u32 %v939_v12, 16  ;;  %5559 = vmatpush.bf16.msra.mxu0 %v7150_v24 }
  0xa0   : > { %v1829_v23 = vor.u32 %v1828_v15, %v1825_v14  ;;  %4870 = vmatmul.bf16.gmra.mxu0 %v6176_v17  ;;  %v6075_v27 = vld [vmem:[#allocation3 + $0x8] sm:$0xf]  ;;  %v1021_v33 = vshll.u32 %v940_v26, 16  ;;  %v1025_v36 = vshrl.u32 %v940_v26, 16  ;;  %v6935_v37 = vld [vmem:[#allocation3 + $0x4] sm:$0xf] }
  0xa1   : > { %v1014_v42 = vrot.slane %v1012_v21, 4  ;;  %v1438_v44 = vld [vmem:[#allocation2 + $0xc] sm:$0xe]  ;;  %v1838_v50 = vrot.slane %v1836_v18, 4  ;;  %v1017_v51 = vrot.slane %v1015_v32, 5  ;;  %s7419_s14 = sshra.s32 %s5844_s12, 4  ;;  %s7420_s14 = int_to_ptr.hbm [resolvable:$true] %s7419_s14 }
  0xa2   : > { %v1830_v39 = vrot.slane %v1829_v23, 4  ;;  %v1023_v55 = vrot.slane %v1021_v33, 5  ;;  %v1439_v56 = vld [vmem:[#allocation2 + $0x10] sm:$0xf]  ;;  %v6018_v57 = vrot.slane %v1438_v44, 9  ;;  %v1027_v63 = vrot.slane %v1025_v36, 4  ;;  %p7426_p11 = scmp.lt.s32.totalorder %s7420_s14, %s8830_s2 }
  0xa3   : > { %v6940_v49 = vld [vmem:[#allocation3 + $0x28] sm:$0xf0]  ;;  %v1018_v61 = vor.u32 %v1017_v51, %v1014_v42  ;;  %v1543_v0 = vrot.slane %v1439_v56, 5  ;;  %v1712_v46 = vld [vmem:[#allocation2 + $0x18] sm:$0xf]  ;;  %v1839_v10 = vor.u32 %v1838_v50, %v1834_v29  ;;  %s7421_s10 = scalar_lea.hbm %s7420_s14, 128 }
  0xa4   : > { %v6069_v52 = vld [vmem:[#allocation3 + $0x24] sm:$0xf0]  ;;  %v6076_v53 = vor.u32 %v6940_v49, %v6075_v27  ;;  %v1835_v54 = vsel %vm7889_vm13, %v1830_v39, %v1834_v29  ;;  %v6936_v59 = vld [vmem:[#allocation3 + $0xc] sm:$0xf]  ;;  %v1713_v3 = vld [vmem:[#allocation2 + $0x1c] sm:$0xf]  ;;  %v1028_v22 = vor.u32 %v1027_v63, %v1023_v55  ;;  %p7422_p1 = scmp.ne.s32.totalorder %s7420_s14, %s7421_s10 }
  0xa5   : > { %v6072_v58 = vor.u32 %v6935_v37, %v6069_v52  ;;  %v6077_v60 = vld [vmem:[#allocation3 + $0x2c] sm:$0xf0]  ;;  %2238 = vst [vmem:[#allocation3 + $0x10] sm:$0xf] %v1835_v54  ;;  %v1019_v5 = vrot.slane %v1018_v61, 4  ;;  %v1544_v7 = vsel %vm7883_vm12, %v6018_v57, %v1543_v0  ;;  %v472_v29 = vrot.slane %v7828_v40, 4 }
  0xa6   : > { %v764_v1 = vld [vmem:[#allocation2 + $0x14] sm:$0x1]  ;;  %1744 = vst [vmem:[#allocation3 + $0x54] sm:$0xf] %v1712_v46  ;;  %v357_v8 = vld [vmem:[#allocation2 + $0x20] sm:$0xf]  ;;  %v6080_v19 = vor.u32 %v6936_v59, %v6077_v60  ;;  %p7423_p4 = pnand %p7422_p1, %p7639_p7 }
  0xa7   : > { %4944 = vmatmul.bf16.vlgmr.msrb.gmra.mxu1 %v6072_v58  ;;  %v765_v4 = vsel %vm7682_vm2, %v455_v48, %v764_v1  ;;  %v358_v12 = vsel %vm7710_vm7, 0, %v357_v8  ;;  %v1777_v13 = vld [vmem:[#allocation2 + $0x18] sm:$0xf]  ;;  %v1024_v14 = vsel %vm7889_vm13, %v1019_v5, %v1023_v55  ;;  %1680 = vst [vmem:[#allocation3 + $0x50] sm:$0xf] %v1544_v7  ;;  %v1840_v32 = vrot.slane %v1839_v10, 4 }
  0xa8   : > { %766 = vst [vmem:[#allocation2 + $0x14] sm:$0x1] %v765_v4  ;;  %v1778_v15 = vld [vmem:[#allocation2 + $0x1c] sm:$0xf]  ;;  %v1847_v17 = vshrl.u32 %v1777_v13, 16  ;;  %v1850_v18 = vshll.u32 %v1777_v13, 16  ;;  %p7424_p8 = pneg %p7423_p4 }
  0xa9   : > { %5033 = vmatmul.bf16.vlgmr.msrb.gmra.mxu2 %v6076_v53  ;;  %1405 = vst [vmem:[#allocation3 + $0x4c] sm:$0xf] %v1024_v14  ;;  %v1856_v23 = vshll.u32 %v1778_v15, 16  ;;  %v942_v24 = vld [vmem:[#allocation2 + $0x18] sm:$0xf]  ;;  %v1860_v33 = vshrl.u32 %v1778_v15, 16 }
  0xaa   : > { %1745 = vst [vmem:[#allocation3 + $0x78] sm:$0xf] %v1713_v3  ;;  %v1849_v26 = vrot.slane %v1847_v17, 4  ;;  %v1852_v21 = vrot.slane %v1850_v18, 5  ;;  %v943_v27 = vld [vmem:[#allocation2 + $0x1c] sm:$0xf] }
  0xab   : > { %359 = vst [vmem:[#allocation2 + $0x20] sm:$0xf] %v358_v12  ;;  %v1036_v37 = vshrl.u32 %v942_v24, 16  ;;  %v1039_v39 = vshll.u32 %v942_v24, 16  ;;  %v1045_v42 = vshll.u32 %v943_v27, 16  ;;  %v1029_v44 = vrot.slane %v1028_v22, 4 }
  0xac   : > { %v1853_v36 = vor.u32 %v1852_v21, %v1849_v26  ;;  %v1545_v48 = vrot.slane %v1543_v0, 4  ;;  %v1858_v49 = vrot.slane %v1856_v23, 5  ;;  %v1049_v50 = vshrl.u32 %v943_v27, 16  ;;  %v1442_v61 = vld [vmem:[#allocation2 + $0x1c] sm:$0xf]  ;;  %v7133_v15 = vld [vmem:[#allocation7 + $0x1b0] sm:$0xff] }
  0xad   : > { %v1862_v40 = vrot.slane %v1860_v33, 4  ;;  %v1038_v58 = vrot.slane %v1036_v37, 4  ;;  %v1041_v59 = vrot.slane %v1039_v39, 5  ;;  %v1047_v60 = vrot.slane %v1045_v42, 5  ;;  %v1441_v3 = vld [vmem:[#allocation2 + $0x18] sm:$0xe]  ;;  %5382 = vmatpush.bf16.msra.mxu2 %v7133_v15 }
  0xae   : > { %v1854_v57 = vrot.slane %v1853_v36, 4  ;;  %v1051_v7 = vrot.slane %v1049_v50, 4  ;;  %v6019_v8 = vrot.slane %v1441_v3, 9  ;;  %v1550_v14 = vrot.slane %v1442_v61, 5  ;;  %v360_v17 = vld [vmem:[#allocation2 + $0x2c] sm:$0xf] }
  0xaf   : > { %5122 = vmatmul.bf16.vlgmr.msrb.gmra.mxu3 %v6080_v19  ;;  %v1776_v51 = vld [vmem:[#allocation2 + $0x14] sm:$0x1]  ;;  %v1042_v5 = vor.u32 %v1041_v59, %v1038_v58  ;;  %v6945_v18 = vld [vmem:[#allocation3 + $0x54] sm:$0xf]  ;;  %v1863_v22 = vor.u32 %v1862_v40, %v1858_v49  ;;  %v6111_v24 = vld [vmem:[#allocation3 + $0x50] sm:$0xf] }
  0xb0   : > { %v941_v52 = vld [vmem:[#allocation2 + $0x14] sm:$0x1]  ;;  %v1842_v54 = vshll.u32 %v1776_v51, 16  ;;  %v1859_v0 = vsel %vm7889_vm13, %v1854_v57, %v1858_v49  ;;  %v1551_v26 = vsel %vm7883_vm12, %v6019_v8, %v1550_v14  ;;  %v1780_v21 = vld [vmem:[#allocation2 + $0x24] sm:$0xf]  ;;  %v361_v50 = vsel %vm7710_vm7, 0, %v360_v17 }
  0xb1   : > { %v1440_v53 = vld [vmem:[#allocation2 + $0x14] sm:$0x1]  ;;  %v1031_v55 = vshll.u32 %v941_v52, 16  ;;  %2240 = vst [vmem:[#allocation3 + $0x58] sm:$0xf] %v1859_v0  ;;  %v1043_v23 = vrot.slane %v1042_v5, 4 }
  0xb2   : > { %v1546_v56 = vrot.slane %v1440_v53, 5  ;;  %v1844_v63 = vrot.slane %v1842_v54, 5  ;;  %v771_v4 = vld [vmem:[#allocation2 + $0x20] sm:$0x1]  ;;  %v6113_v19 = vld [vmem:[#allocation3 + $0x74] sm:$0xf0] }
  0xb3   : > { %v1033_v1 = vrot.slane %v1031_v55, 5  ;;  %v772_v13 = vsel %vm7682_vm2, %v472_v29, %v771_v4  ;;  %v1781_v27 = vld [vmem:[#allocation2 + $0x28] sm:$0xf]  ;;  %v1048_v29 = vsel %vm7889_vm13, %v1043_v23, %v1047_v60  ;;  %v1714_v33 = vld [vmem:[#allocation2 + $0x24] sm:$0xf]  ;;  %v1871_v36 = vshrl.u32 %v1780_v21, 16 }
  0xb4   : > { %v1547_v46 = vsel %vm7883_vm12, %v1545_v48, %v1546_v56  ;;  %v1845_v10 = vsel %vm7889_vm13, %v1840_v32, %v1844_v63  ;;  %773 = vst [vmem:[#allocation2 + $0x20] sm:$0x1] %v772_v13  ;;  %v1052_v32 = vor.u32 %v1051_v7, %v1047_v60  ;;  %v1874_v37 = vshll.u32 %v1780_v21, 16  ;;  %v6083_v39 = vld [vmem:[#allocation3 + $0x10] sm:$0xf]  ;;  %s7425_s5 = scalar_lea.hbm %s8830_s2, 256 }
  0xb5   : > { %1681 = vst [vmem:[#allocation3 + $0x74] sm:$0xf] %v1547_v46  ;;  %v1034_v12 = vsel %vm7889_vm13, %v1029_v44, %v1033_v1  ;;  %v1715_v42 = vld [vmem:[#allocation2 + $0x28] sm:$0xf]  ;;  %v1880_v44 = vshll.u32 %v1781_v27, 16  ;;  %v1884_v48 = vshrl.u32 %v1781_v27, 16  ;;  %v6116_v54 = vor.u32 %v6945_v18, %v6113_v19  ;;  %p7427_p9 = scmp.lt.s32.totalorder %s7425_s5, %s7421_s10 }
  0xb6   : > { %2239 = vst [vmem:[#allocation3 + $0x34] sm:$0xf] %v1845_v10  ;;  %v1864_v49 = vrot.slane %v1863_v22, 4  ;;  %v1873_v51 = vrot.slane %v1871_v36, 4  ;;  %v1876_v52 = vrot.slane %v1874_v37, 5  ;;  %v1053_v40 = vrot.slane %v1052_v32, 4 }
  0xb7   : > { %1406 = vst [vmem:[#allocation3 + $0x70] sm:$0xf] %v1034_v12  ;;  %v945_v55 = vld [vmem:[#allocation2 + $0x24] sm:$0xf]  ;;  %v1552_v58 = vrot.slane %v1550_v14, 4  ;;  %v1882_v61 = vrot.slane %v1880_v44, 5  ;;  %p7428_p2 = por %p7427_p9, %p7426_p11 }
  0xb8   : > { %1407 = vst [vmem:[#allocation3 + $0x94] sm:$0xf] %v1048_v29  ;;  %v6944_v56 = vld [vmem:[#allocation3 + $0x4c] sm:$0xf]  ;;  %v1877_v59 = vor.u32 %v1876_v52, %v1873_v51  ;;  %v1886_v63 = vrot.slane %v1884_v48, 4  ;;  %v1060_v3 = vshrl.u32 %v945_v55, 16 }
  0xb9   : > { %1682 = vst [vmem:[#allocation3 + $0x98] sm:$0xf] %v1551_v26  ;;  %v1063_v4 = vshll.u32 %v945_v55, 16  ;;  %v7141_v17 = vld [vmem:[#allocation7 + $0x1f0] sm:$0xff]  ;;  %v489_v19 = vrot.slane %v7872_v43, 4  ;;  %v506_v55 = vrot.slane %v7696_v30, 4  ;;  %p7429_p10 = pnand %p7428_p2, %p7424_p8 }
  0xba   : > { %1746 = vst [vmem:[#allocation3 + $0x9c] sm:$0xf] %v1714_v33  ;;  %v1878_v0 = vrot.slane %v1877_v59, 4  ;;  %v946_v18 = vld [vmem:[#allocation2 + $0x28] sm:$0xf]  ;;  %5471 = vmatpush.bf16.msra.mxu3 %v7141_v17  ;;  %v1062_v27 = vrot.slane %v1060_v3, 4  ;;  %v1887_v29 = vor.u32 %v1886_v63, %v1882_v61 }
  0xbb   : > { %1747 = vst [vmem:[#allocation3 + $0xc0] sm:$0xf] %v1715_v42  ;;  %v1779_v7 = vld [vmem:[#allocation2 + $0x20] sm:$0x1]  ;;  %v7125_v22 = vld [vmem:[#allocation7 + $0x170] sm:$0xff]  ;;  %v1065_v32 = vrot.slane %v1063_v4, 5 }
  0xbc   : > { %v6949_v53 = vld [vmem:[#allocation3 + $0x70] sm:$0xf0]  ;;  %362 = vst [vmem:[#allocation2 + $0x2c] sm:$0xf] %v361_v50  ;;  %v944_v8 = vld [vmem:[#allocation2 + $0x20] sm:$0x1]  ;;  %v1883_v15 = vsel %vm7889_vm13, %v1878_v0, %v1882_v61  ;;  %5293 = vmatpush.bf16.msra.mxu1 %v7125_v22 }
  0xbd   : > { %v6112_v57 = vor.u32 %v6949_v53, %v6111_v24  ;;  %v6941_v60 = vld [vmem:[#allocation3 + $0x30] sm:$0xf0]  ;;  %v1443_v10 = vld [vmem:[#allocation2 + $0x20] sm:$0x1]  ;;  %v1866_v12 = vshll.u32 %v1779_v7, 16  ;;  %v1055_v13 = vshll.u32 %v944_v8, 16  ;;  %v1066_v52 = vor.u32 %v1065_v32, %v1062_v27 }
  0xbe   : > { %v6084_v1 = vor.u32 %v6941_v60, %v6083_v39  ;;  %v6105_v46 = vld [vmem:[#allocation3 + $0x6c] sm:$0xf0]  ;;  %v1553_v14 = vrot.slane %v1443_v10, 5  ;;  %2242 = vst [vmem:[#allocation3 + $0xa0] sm:$0xf] %v1883_v15  ;;  %v1069_v33 = vshll.u32 %v946_v18, 16 }
  0xbf   : > { %5038 = vmatmul.bf16.gmra.mxu2 %v6112_v57  ;;  %v6108_v5 = vor.u32 %v6944_v56, %v6105_v46  ;;  %5127 = vmatmul.bf16.gmra.mxu3 %v6116_v54  ;;  %v1868_v23 = vrot.slane %v1866_v12, 5  ;;  %v1057_v24 = vrot.slane %v1055_v13, 5  ;;  %v7149_v21 = vld [vmem:[#allocation7 + $0x230] sm:$0xff]  ;;  %v1073_v36 = vshrl.u32 %v946_v18, 16  ;;  %v1444_v42 = vld [vmem:[#allocation2 + $0x24] sm:$0xe] }
  0xc0   : > { %5211 = vmatmul.bf16.vlgmr.msrb.gmra.mxu0 %v6084_v1  ;;  %v1554_v26 = vsel %vm7883_vm12, %v1552_v58, %v1553_v14  ;;  %v363_v44 = vld [vmem:[#allocation2 + $0x38] sm:$0xf]  ;;  %v1445_v53 = vld [vmem:[#allocation2 + $0x28] sm:$0xf]  ;;  %v6020_v54 = vrot.slane %v1444_v42, 9  ;;  %v1067_v58 = vrot.slane %v1066_v52, 4 }
  0xc1   : > { %4949 = vmatmul.bf16.gmra.mxu1 %v6108_v5  ;;  %1683 = vst [vmem:[#allocation3 + $0xbc] sm:$0xf] %v1554_v26  ;;  %v1869_v43 = vsel %vm7889_vm13, %v1864_v49, %v1868_v23  ;;  %v1058_v37 = vsel %vm7889_vm13, %v1053_v40, %v1057_v24  ;;  %5560 = vmatpush.bf16.msra.mxu0 %v7149_v21  ;;  %v6954_v48 = vld [vmem:[#allocation3 + $0x9c] sm:$0xf]  ;;  %v6147_v49 = vld [vmem:[#allocation3 + $0x98] sm:$0xf] }
  0xc2   : > { %2241 = vst [vmem:[#allocation3 + $0x7c] sm:$0xf] %v1869_v43  ;;  %v6149_v50 = vld [vmem:[#allocation3 + $0xbc] sm:$0xf0]  ;;  %v1557_v56 = vrot.slane %v1445_v53, 5  ;;  %v7943_v40 = vrot.slane %v1887_v29, 4 }
  0xc3   : > { %v778_v39 = vld [vmem:[#allocation2 + $0x2c] sm:$0x1]  ;;  %1408 = vst [vmem:[#allocation3 + $0xb8] sm:$0xf] %v1058_v37  ;;  %v1716_v57 = vld [vmem:[#allocation2 + $0x30] sm:$0xf]  ;;  %v6152_v10 = vor.u32 %v6954_v48, %v6149_v50 }
  0xc4   : > { %v779_v51 = vsel %vm7682_vm2, %v489_v19, %v778_v39  ;;  %v1071_v59 = vrot.slane %v1069_v33, 5  ;;  %v1075_v60 = vrot.slane %v1073_v36, 4  ;;  %v6119_v61 = vld [vmem:[#allocation3 + $0x58] sm:$0xf]  ;;  %v1558_v63 = vsel %vm7883_vm12, %v6020_v54, %v1557_v56  ;;  %v1717_v46 = vld [vmem:[#allocation2 + $0x34] sm:$0xf] }
  0xc5   : > { %780 = vst [vmem:[#allocation2 + $0x2c] sm:$0x1] %v779_v51  ;;  %v1559_v1 = vrot.slane %v1557_v56, 4  ;;  %v364_v0 = vsel %vm7710_vm7, 0, %v363_v44  ;;  %v6953_v3 = vld [vmem:[#allocation3 + $0x94] sm:$0xf] }
  0xc6   : > { %1748 = vst [vmem:[#allocation3 + $0xe4] sm:$0xf] %v1716_v57  ;;  %v1072_v4 = vsel %vm7889_vm13, %v1067_v58, %v1071_v59  ;;  %v1783_v5 = vld [vmem:[#allocation2 + $0x30] sm:$0xf]  ;;  %v1784_v7 = vld [vmem:[#allocation2 + $0x34] sm:$0xf]  ;;  %v1076_v15 = vor.u32 %v1075_v60, %v1071_v59 }
  0xc7   : > { %1684 = vst [vmem:[#allocation3 + $0xe0] sm:$0xf] %v1558_v63  ;;  %v1895_v12 = vshrl.u32 %v1783_v5, 16  ;;  %v1898_v13 = vshll.u32 %v1783_v5, 16  ;;  %v1904_v17 = vshll.u32 %v1784_v7, 16  ;;  %v1908_v18 = vshrl.u32 %v1784_v7, 16 }
  0xc8   : > { %v6958_v8 = vld [vmem:[#allocation3 + $0xb8] sm:$0xf0]  ;;  %1409 = vst [vmem:[#allocation3 + $0xdc] sm:$0xf] %v1072_v4  ;;  %v948_v19 = vld [vmem:[#allocation2 + $0x30] sm:$0xf] }
  0xc9   : > { %v6148_v14 = vor.u32 %v6958_v8, %v6147_v49  ;;  %1749 = vst [vmem:[#allocation3 + $0x108] sm:$0xf] %v1717_v46  ;;  %v6950_v22 = vld [vmem:[#allocation3 + $0x78] sm:$0xf0]  ;;  %v1897_v23 = vrot.slane %v1895_v12, 4  ;;  %v1900_v24 = vrot.slane %v1898_v13, 5 }
  0xca   : > { %365 = vst [vmem:[#allocation2 + $0x38] sm:$0xf] %v364_v0  ;;  %v6120_v26 = vor.u32 %v6950_v22, %v6119_v61  ;;  %v6141_v21 = vld [vmem:[#allocation3 + $0xb4] sm:$0xf0]  ;;  %v1906_v27 = vrot.slane %v1904_v17, 5  ;;  %v1910_v29 = vrot.slane %v1908_v18, 4 }
  0xcb   : > { %v949_v32 = vld [vmem:[#allocation2 + $0x34] sm:$0xf]  ;;  %v6144_v33 = vor.u32 %v6953_v3, %v6141_v21  ;;  %v1901_v39 = vor.u32 %v1900_v24, %v1897_v23  ;;  %v1077_v44 = vrot.slane %v1076_v15, 4  ;;  %v1084_v52 = vshrl.u32 %v948_v19, 16  ;;  %v7132_v58 = vld [vmem:[#allocation7 + $0x1a8] sm:$0xff] }
  0xcc   : > { %v1782_v36 = vld [vmem:[#allocation2 + $0x2c] sm:$0x1]  ;;  %v1087_v53 = vshll.u32 %v948_v19, 16  ;;  %v1093_v54 = vshll.u32 %v949_v32, 16  ;;  %v1911_v60 = vor.u32 %v1910_v29, %v1906_v27  ;;  %5383 = vmatpush.bf16.msra.mxu2 %v7132_v58  ;;  %v1097_v7 = vshrl.u32 %v949_v32, 16 }
  0xcd   : > { %v947_v43 = vld [vmem:[#allocation2 + $0x2c] sm:$0x1]  ;;  %v1890_v42 = vshll.u32 %v1782_v36, 16  ;;  %v1902_v51 = vrot.slane %v1901_v39, 4  ;;  %v1086_v61 = vrot.slane %v1084_v52, 4 }
  0xce   : > { %v1446_v37 = vld [vmem:[#allocation2 + $0x2c] sm:$0x1]  ;;  %v1079_v48 = vshll.u32 %v947_v43, 16  ;;  %v1089_v63 = vrot.slane %v1087_v53, 5  ;;  %v1095_v5 = vrot.slane %v1093_v54, 5  ;;  %v1099_v17 = vrot.slane %v1097_v7, 4 }
  0xcf   : > { %5043 = vmatmul.bf16.gmra.mxu2 %v6148_v14  ;;  %5132 = vmatmul.bf16.gmra.mxu3 %v6152_v10  ;;  %v1560_v50 = vrot.slane %v1446_v37, 5  ;;  %v1892_v49 = vrot.slane %v1890_v42, 5  ;;  %v1907_v59 = vsel %vm7889_vm13, %v1902_v51, %v1906_v27  ;;  %v1447_v8 = vld [vmem:[#allocation2 + $0x30] sm:$0xe]  ;;  %v6183_v10 = vld [vmem:[#allocation3 + $0xe0] sm:$0xf] }
  0xd0   : > { %5216 = vmatmul.bf16.gmra.mxu0 %v6120_v26  ;;  %v1081_v56 = vrot.slane %v1079_v48, 5  ;;  %2244 = vst [vmem:[#allocation3 + $0xe8] sm:$0xf] %v1907_v59  ;;  %v1090_v4 = vor.u32 %v1089_v63, %v1086_v61  ;;  %v1448_v12 = vld [vmem:[#allocation2 + $0x34] sm:$0xf]  ;;  %v7964_v14 = vrot.slane %v1911_v60, 4  ;;  %v1100_v21 = vor.u32 %v1099_v17, %v1095_v5 }
  0xd1   : > { %4954 = vmatmul.bf16.gmra.mxu1 %v6144_v33  ;;  %v1561_v57 = vsel %vm7883_vm12, %v1559_v1, %v1560_v50  ;;  %v1893_v46 = vsel %vm7889_vm13, %v7943_v40, %v1892_v49  ;;  %v785_v3 = vld [vmem:[#allocation2 + $0x38] sm:$0x1]  ;;  %v6021_v40 = vrot.slane %v1447_v8, 9  ;;  %v6963_v13 = vld [vmem:[#allocation3 + $0xe4] sm:$0xf]  ;;  %v1564_v18 = vrot.slane %v1448_v12, 5 }
  0xd2   : > { %1685 = vst [vmem:[#allocation3 + $0x104] sm:$0xf] %v1561_v57  ;;  %v1082_v0 = vsel %vm7889_vm13, %v1077_v44, %v1081_v56  ;;  %v786_v1 = vsel %vm7682_vm2, %v506_v55, %v785_v3  ;;  %v1091_v15 = vrot.slane %v1090_v4, 4  ;;  %v6155_v19 = vld [vmem:[#allocation3 + $0xa0] sm:$0xf]  ;;  %v1101_v39 = vrot.slane %v1100_v21, 4 }
  0xd3   : > { %2243 = vst [vmem:[#allocation3 + $0xc4] sm:$0xf] %v1893_v46  ;;  %v6185_v30 = vld [vmem:[#allocation3 + $0x104] sm:$0xf0]  ;;  %v7966_v22 = vpop.f32.mrf.mxu1  ;;  %v1718_v55 = vld [vmem:[#allocation2 + $0x3c] sm:$0xf]  ;;  %v1565_v27 = vsel %vm7883_vm12, %v6021_v40, %v1564_v18 }
  0xd4   : > { %1410 = vst [vmem:[#allocation3 + $0x100] sm:$0xf] %v1082_v0  ;;  %v366_v23 = vld [vmem:[#allocation2 + $0x44] sm:$0xf]  ;;  %v6962_v24 = vld [vmem:[#allocation3 + $0xdc] sm:$0xf]  ;;  %v1096_v26 = vsel %vm7889_vm13, %v1091_v15, %v1095_v5  ;;  %v6188_v50 = vor.u32 %v6963_v13, %v6185_v30 }
  0xd5   : > { %787 = vst [vmem:[#allocation2 + $0x38] sm:$0x1] %v786_v1  ;;  %v1719_v29 = vld [vmem:[#allocation2 + $0x40] sm:$0xf]  ;;  %v1786_v32 = vld [vmem:[#allocation2 + $0x3c] sm:$0xf] }
  0xd6   : > { %1750 = vst [vmem:[#allocation3 + $0x12c] sm:$0xf] %v1718_v55  ;;  %v367_v36 = vsel %vm7710_vm7, 0, %v366_v23  ;;  %v1919_v43 = vshrl.u32 %v1786_v32, 16  ;;  %v1566_v42 = vrot.slane %v1564_v18, 4  ;;  %v1922_v44 = vshll.u32 %v1786_v32, 16 }
  0xd7   : > { %1411 = vst [vmem:[#allocation3 + $0x124] sm:$0xf] %v1096_v26  ;;  %v1787_v51 = vld [vmem:[#allocation2 + $0x40] sm:$0xf]  ;;  %v523_v0 = vrot.slane %v7743_v20, 4 }
  0xd8   : > { %1686 = vst [vmem:[#allocation3 + $0x128] sm:$0xf] %v1565_v27  ;;  %v1921_v54 = vrot.slane %v1919_v43, 4  ;;  %v1924_v49 = vrot.slane %v1922_v44, 5  ;;  %v1928_v3 = vshll.u32 %v1787_v51, 16  ;;  %v1932_v1 = vshrl.u32 %v1787_v51, 16 }
  0xd9   : > { %v6967_v33 = vld [vmem:[#allocation3 + $0x100] sm:$0xf0]  ;;  %1751 = vst [vmem:[#allocation3 + $0x150] sm:$0xf] %v1719_v29  ;;  %v7140_v12 = vld [vmem:[#allocation7 + $0x1e8] sm:$0xff] }
  0xda   : > { %v6184_v37 = vor.u32 %v6967_v33, %v6183_v10  ;;  %v6959_v48 = vld [vmem:[#allocation3 + $0xc0] sm:$0xf0]  ;;  %368 = vst [vmem:[#allocation2 + $0x44] sm:$0xf] %v367_v36  ;;  %v1925_v46 = vor.u32 %v1924_v49, %v1921_v54  ;;  %v952_v13 = vld [vmem:[#allocation2 + $0x40] sm:$0xf]  ;;  %5472 = vmatpush.bf16.msra.mxu3 %v7140_v12 }
  0xdb   : > { %v6156_v52 = vor.u32 %v6959_v48, %v6155_v19  ;;  %v6177_v53 = vld [vmem:[#allocation3 + $0xfc] sm:$0xf0]  ;;  %v951_v4 = vld [vmem:[#allocation2 + $0x3c] sm:$0xf]  ;;  %v7977_v40 = vpop.f32.mrf.mxu2  ;;  %v1930_v15 = vrot.slane %v1928_v3, 5  ;;  %v1934_v17 = vrot.slane %v1932_v1, 4  ;;  %v7979_v20 = vpop.f32.mrf.mxu1 }
  0xdc   : > { %v6180_v56 = vor.u32 %v6962_v24, %v6177_v53  ;;  %v1785_v57 = vld [vmem:[#allocation2 + $0x38] sm:$0x1]  ;;  %v1926_v10 = vrot.slane %v1925_v46, 4  ;;  %v7124_v30 = vld [vmem:[#allocation7 + $0x168] sm:$0xff]  ;;  %v1108_v23 = vshrl.u32 %v951_v4, 16  ;;  %v1111_v24 = vshll.u32 %v951_v4, 16 }
  0xdd   : > { %v950_v58 = vld [vmem:[#allocation2 + $0x38] sm:$0x1]  ;;  %v1914_v60 = vshll.u32 %v1785_v57, 16  ;;  %v7148_v55 = vld [vmem:[#allocation7 + $0x228] sm:$0xff]  ;;  %v1117_v27 = vshll.u32 %v952_v13, 16  ;;  %5294 = vmatpush.bf16.msra.mxu1 %v7124_v30  ;;  %v1121_v33 = vshrl.u32 %v952_v13, 16  ;;  %v1935_v43 = vor.u32 %v1934_v17, %v1930_v15  ;;  %v7990_v48 = vpop.f32.mrf.mxu3 }
  0xde   : > { %v1449_v59 = vld [vmem:[#allocation2 + $0x38] sm:$0x1]  ;;  %v1103_v61 = vshll.u32 %v950_v58, 16  ;;  %v1931_v21 = vsel %vm7889_vm13, %v1926_v10, %v1930_v15  ;;  %5561 = vmatpush.bf16.msra.mxu0 %v7148_v55  ;;  %v1113_v32 = vrot.slane %v1111_v24, 5  ;;  %8848 = vst [vmem:[#allocation17_spill] sm:$0xff] %v7990_v48  ;;  %v8002_v24 = vpop.f32.mrf.mxu0 }
  0xdf   : > { %5048 = vmatmul.bf16.gmra.mxu2 %v6184_v37  ;;  %v1567_v63 = vrot.slane %v1449_v59, 5  ;;  %5137 = vmatmul.bf16.gmra.mxu3 %v6188_v50  ;;  %v1916_v5 = vrot.slane %v1914_v60, 5  ;;  %v6219_v36 = vld [vmem:[#allocation3 + $0x128] sm:$0xf]  ;;  %v1119_v37 = vrot.slane %v1117_v27, 5  ;;  %v1123_v51 = vrot.slane %v1121_v33, 4 }
  0xe0   : > { %5221 = vmatmul.bf16.gmra.mxu0 %v6156_v52  ;;  %v1105_v7 = vrot.slane %v1103_v61, 5  ;;  %v6221_v44 = vld [vmem:[#allocation3 + $0x14c] sm:$0xf0]  ;;  %2246 = vst [vmem:[#allocation3 + $0x130] sm:$0xf] %v1931_v21 }
  0xe1   : > { %v1568_v8 = vsel %vm7883_vm12, %v1566_v42, %v1567_v63  ;;  %4959 = vmatmul.bf16.gmra.mxu1 %v6180_v56  ;;  %v1917_v18 = vsel %vm7889_vm13, %v7964_v14, %v1916_v5  ;;  %v792_v26 = vld [vmem:[#allocation2 + $0x44] sm:$0x1]  ;;  %v1110_v14 = vrot.slane %v1108_v23, 4  ;;  %v1451_v52 = vld [vmem:[#allocation2 + $0x40] sm:$0xf]  ;;  %v1124_v61 = vor.u32 %v1123_v51, %v1119_v37 }
  0xe2   : > { %1687 = vst [vmem:[#allocation3 + $0x14c] sm:$0xf] %v1568_v8  ;;  %v1106_v19 = vsel %vm7889_vm13, %v1101_v39, %v1105_v7  ;;  %v793_v29 = vsel %vm7682_vm2, %v523_v0, %v792_v26  ;;  %v1450_v39 = vld [vmem:[#allocation2 + $0x3c] sm:$0xe]  ;;  %v6972_v42 = vld [vmem:[#allocation3 + $0x12c] sm:$0xf] }
  0xe3   : > { %2245 = vst [vmem:[#allocation3 + $0x10c] sm:$0xf] %v1917_v18  ;;  %v1114_v50 = vor.u32 %v1113_v32, %v1110_v14  ;;  %v6022_v53 = vrot.slane %v1450_v39, 9  ;;  %v6191_v54 = vld [vmem:[#allocation3 + $0xe8] sm:$0xf]  ;;  %v1571_v56 = vrot.slane %v1451_v52, 5  ;;  %v7994_v5 = vpop.f32.mrf.mxu2  ;;  %v6224_v13 = vor.u32 %v6972_v42, %v6221_v44  ;;  %v8000_v15 = vpop.f32.mrf.mxu1 }
  0xe4   : > { %1412 = vst [vmem:[#allocation3 + $0x148] sm:$0xf] %v1106_v19  ;;  %v6971_v49 = vld [vmem:[#allocation3 + $0x124] sm:$0xf]  ;;  %v1720_v57 = vld [vmem:[#allocation2 + $0x48] sm:$0xf] }
  0xe5   : > { %794 = vst [vmem:[#allocation2 + $0x44] sm:$0x1] %v793_v29  ;;  %v1721_v58 = vld [vmem:[#allocation2 + $0x4c] sm:$0xf]  ;;  %v1115_v60 = vrot.slane %v1114_v50, 4  ;;  %v1936_v63 = vrot.slane %v1935_v43, 4  ;;  %v1572_v46 = vsel %vm7883_vm12, %v6022_v53, %v1571_v56  ;;  %v8006_v39 = vpop.f32.mrf.mxu3 }
  0xe6   : > { %1752 = vst [vmem:[#allocation3 + $0x174] sm:$0xf] %v1720_v57  ;;  %v1573_v0 = vrot.slane %v1571_v56, 4  ;;  %v369_v3 = vld [vmem:[#allocation2 + $0x50] sm:$0xf]  ;;  %v1125_v8 = vrot.slane %v1124_v61, 4 }
  0xe7   : > { %1753 = vst [vmem:[#allocation3 + $0x198] sm:$0xf] %v1721_v58  ;;  %v1120_v7 = vsel %vm7889_vm13, %v1115_v60, %v1119_v37  ;;  %v370_v10 = vsel %vm7710_vm7, 0, %v369_v3  ;;  %v1789_v17 = vld [vmem:[#allocation2 + $0x48] sm:$0xf] }
  0xe8   : > { %1688 = vst [vmem:[#allocation3 + $0x170] sm:$0xf] %v1572_v46  ;;  %v1943_v29 = vshrl.u32 %v1789_v17, 16  ;;  %v1790_v14 = vld [vmem:[#allocation2 + $0x4c] sm:$0xf]  ;;  %v1946_v32 = vshll.u32 %v1789_v17, 16 }
  0xe9   : > { %v6976_v59 = vld [vmem:[#allocation3 + $0x148] sm:$0xf0]  ;;  %1413 = vst [vmem:[#allocation3 + $0x16c] sm:$0xf] %v1120_v7  ;;  %v1952_v44 = vshll.u32 %v1790_v14, 16  ;;  %v1956_v52 = vshrl.u32 %v1790_v14, 16  ;;  %v8021_v14 = vpop.f32.mrf.mxu0 }
  0xea   : > { %v6968_v1 = vld [vmem:[#allocation3 + $0x108] sm:$0xf0]  ;;  %v6220_v4 = vor.u32 %v6976_v59, %v6219_v36  ;;  %371 = vst [vmem:[#allocation2 + $0x50] sm:$0xf] %v370_v10  ;;  %v1945_v37 = vrot.slane %v1943_v29, 4  ;;  %v1948_v42 = vrot.slane %v1946_v32, 5 }
  0xeb   : > { %v6213_v12 = vld [vmem:[#allocation3 + $0x144] sm:$0xf0]  ;;  %v6192_v18 = vor.u32 %v6968_v1, %v6191_v54  ;;  %8849 = vst [vmem:[#allocation18_spill] sm:$0xff] %v8006_v39  ;;  %v954_v53 = vld [vmem:[#allocation2 + $0x48] sm:$0xf]  ;;  %v7131_v54 = vld [vmem:[#allocation7 + $0x1a0] sm:$0xff] }
  0xec   : > { %v6216_v19 = vor.u32 %v6971_v49, %v6213_v12  ;;  %v1788_v30 = vld [vmem:[#allocation2 + $0x44] sm:$0x1]  ;;  %v540_v49 = vrot.slane %v7800_v25, 4  ;;  %v1949_v56 = vor.u32 %v1948_v42, %v1945_v37  ;;  %v1954_v57 = vrot.slane %v1952_v44, 5  ;;  %v955_v60 = vld [vmem:[#allocation2 + $0x4c] sm:$0xf]  ;;  %5384 = vmatpush.bf16.msra.mxu2 %v7131_v54  ;;  %v8015_v25 = vpop.f32.mrf.mxu1 }
  0xed   : > { %v953_v55 = vld [vmem:[#allocation2 + $0x44] sm:$0x1]  ;;  %v1938_v26 = vshll.u32 %v1788_v30, 16  ;;  %v1132_v58 = vshrl.u32 %v954_v53, 16  ;;  %v1958_v59 = vrot.slane %v1956_v52, 4  ;;  %v1135_v61 = vshll.u32 %v954_v53, 16 }
  0xee   : > { %v1452_v23 = vld [vmem:[#allocation2 + $0x44] sm:$0x1]  ;;  %v1127_v21 = vshll.u32 %v953_v55, 16  ;;  %v1950_v46 = vrot.slane %v1949_v56, 4  ;;  %v1141_v3 = vshll.u32 %v955_v60, 16  ;;  %v1145_v1 = vshrl.u32 %v955_v60, 16 }
  0xef   : > { %v1574_v27 = vrot.slane %v1452_v23, 5  ;;  %5053 = vmatmul.bf16.gmra.mxu2 %v6220_v4  ;;  %5142 = vmatmul.bf16.gmra.mxu3 %v6224_v13  ;;  %v1940_v33 = vrot.slane %v1938_v26, 5  ;;  %v1453_v4 = vld [vmem:[#allocation2 + $0x48] sm:$0xe]  ;;  %v1959_v10 = vor.u32 %v1958_v59, %v1954_v57  ;;  %v1137_v12 = vrot.slane %v1135_v61, 5 }
  0xf0   : > { %v1129_v36 = vrot.slane %v1127_v21, 5  ;;  %5226 = vmatmul.bf16.gmra.mxu0 %v6192_v18  ;;  %v6255_v7 = vld [vmem:[#allocation3 + $0x170] sm:$0xf]  ;;  %v1454_v13 = vld [vmem:[#allocation2 + $0x4c] sm:$0xf]  ;;  %v6023_v17 = vrot.slane %v1453_v4, 9  ;;  %v1955_v55 = vsel %vm7889_vm13, %v1950_v46, %v1954_v57 }
  0xf1   : > { %v1575_v43 = vsel %vm7883_vm12, %v1573_v0, %v1574_v27  ;;  %4964 = vmatmul.bf16.gmra.mxu1 %v6216_v19  ;;  %v1941_v50 = vsel %vm7889_vm13, %v1936_v63, %v1940_v33  ;;  %v8013_v0 = vpop.f32.mrf.mxu2  ;;  %v1134_v63 = vrot.slane %v1132_v58, 4  ;;  %v6981_v18 = vld [vmem:[#allocation3 + $0x174] sm:$0xf]  ;;  %v6257_v19 = vld [vmem:[#allocation3 + $0x194] sm:$0xf0]  ;;  %v1143_v23 = vrot.slane %v1141_v3, 5 }
  0xf2   : > { %1689 = vst [vmem:[#allocation3 + $0x194] sm:$0xf] %v1575_v43  ;;  %v1130_v51 = vsel %vm7889_vm13, %v1125_v8, %v1129_v36  ;;  %v799_v8 = vld [vmem:[#allocation2 + $0x50] sm:$0x1]  ;;  %v1147_v26 = vrot.slane %v1145_v1, 4  ;;  %v1578_v36 = vrot.slane %v1454_v13, 5  ;;  %v6260_v58 = vor.u32 %v6981_v18, %v6257_v19 }
  0xf3   : > { %2247 = vst [vmem:[#allocation3 + $0x154] sm:$0xf] %v1941_v50  ;;  %v800_v30 = vsel %vm7682_vm2, %v540_v49, %v799_v8  ;;  %v1722_v21 = vld [vmem:[#allocation2 + $0x54] sm:$0xf]  ;;  %v1723_v27 = vld [vmem:[#allocation2 + $0x58] sm:$0xf]  ;;  %v1138_v33 = vor.u32 %v1137_v12, %v1134_v63  ;;  %v8025_v56 = vpop.f32.mrf.mxu3 }
  0xf4   : > { %1414 = vst [vmem:[#allocation3 + $0x190] sm:$0xf] %v1130_v51  ;;  %v6227_v29 = vld [vmem:[#allocation3 + $0x130] sm:$0xf]  ;;  %v6980_v43 = vld [vmem:[#allocation3 + $0x16c] sm:$0xf]  ;;  %v1148_v51 = vor.u32 %v1147_v26, %v1143_v23  ;;  %v1579_v52 = vsel %vm7883_vm12, %v6023_v17, %v1578_v36 }
  0xf5   : > { %801 = vst [vmem:[#allocation2 + $0x50] sm:$0x1] %v800_v30  ;;  %v372_v37 = vld [vmem:[#allocation2 + $0x5c] sm:$0xf]  ;;  %v1792_v42 = vld [vmem:[#allocation2 + $0x54] sm:$0xf] }
  0xf6   : > { %2248 = vst [vmem:[#allocation3 + $0x178] sm:$0xf] %v1955_v55  ;;  %v1139_v50 = vrot.slane %v1138_v33, 4  ;;  %v1960_v49 = vrot.slane %v1959_v10, 4  ;;  %v373_v57 = vsel %vm7710_vm7, 0, %v372_v37  ;;  %v1967_v61 = vshrl.u32 %v1792_v42, 16  ;;  %v8036_v37 = vpop.f32.mrf.mxu0 }
  0xf7   : > { %1754 = vst [vmem:[#allocation3 + $0x1bc] sm:$0xf] %v1722_v21  ;;  %v1793_v60 = vld [vmem:[#allocation2 + $0x58] sm:$0xf]  ;;  %v1970_v46 = vshll.u32 %v1792_v42, 16  ;;  %v1580_v3 = vrot.slane %v1578_v36, 4 }
  0xf8   : > { %8850 = vst [vmem:[#allocation19_spill] sm:$0xff] %v8025_v56  ;;  %v1144_v59 = vsel %vm7889_vm13, %v1139_v50, %v1143_v23  ;;  %v1976_v1 = vshll.u32 %v1793_v60, 16  ;;  %v1980_v4 = vshrl.u32 %v1793_v60, 16  ;;  %v1149_v8 = vrot.slane %v1148_v51, 4  ;;  %v7139_v36 = vld [vmem:[#allocation7 + $0x1e0] sm:$0xff] }
  0xf9   : > { %v6985_v32 = vld [vmem:[#allocation3 + $0x190] sm:$0xf0]  ;;  %1690 = vst [vmem:[#allocation3 + $0x1b8] sm:$0xf] %v1579_v52  ;;  %v1969_v10 = vrot.slane %v1967_v61, 4  ;;  %v1972_v12 = vrot.slane %v1970_v46, 5  ;;  %v8031_v17 = vpop.f32.mrf.mxu2  ;;  %5473 = vmatpush.bf16.msra.mxu3 %v7139_v36 }
  0xfa   : > { %v6977_v44 = vld [vmem:[#allocation3 + $0x150] sm:$0xf0]  ;;  %v6256_v54 = vor.u32 %v6985_v32, %v6255_v7  ;;  %1755 = vst [vmem:[#allocation3 + $0x1e0] sm:$0xf] %v1723_v27  ;;  %v8033_v55 = vpop.f32.mrf.mxu1  ;;  %v957_v27 = vld [vmem:[#allocation2 + $0x54] sm:$0xf] }
  0xfb   : > { %v6249_v53 = vld [vmem:[#allocation3 + $0x18c] sm:$0xf0]  ;;  %v6228_v63 = vor.u32 %v6977_v44, %v6227_v29  ;;  %1415 = vst [vmem:[#allocation3 + $0x1b4] sm:$0xf] %v1144_v59  ;;  %v1973_v21 = vor.u32 %v1972_v12, %v1969_v10  ;;  %v557_v29 = vrot.slane %v7843_v16, 4  ;;  %v1978_v32 = vrot.slane %v1976_v1, 5  ;;  %v8044_v61 = vpop.f32.mrf.mxu3 }
  0xfc   : > { %v6252_v7 = vor.u32 %v6980_v43, %v6249_v53  ;;  %374 = vst [vmem:[#allocation2 + $0x5c] sm:$0xf] %v373_v57  ;;  %v1791_v13 = vld [vmem:[#allocation2 + $0x50] sm:$0x1]  ;;  %v1982_v33 = vrot.slane %v1980_v4, 4  ;;  %v7123_v43 = vld [vmem:[#allocation7 + $0x160] sm:$0xff] }
  0xfd   : > { %v956_v18 = vld [vmem:[#allocation2 + $0x50] sm:$0x1]  ;;  %v1962_v30 = vshll.u32 %v1791_v13, 16  ;;  %v1974_v51 = vrot.slane %v1973_v21, 4  ;;  %v7147_v52 = vld [vmem:[#allocation7 + $0x220] sm:$0xff]  ;;  %5295 = vmatpush.bf16.msra.mxu1 %v7123_v43  ;;  %v1156_v16 = vshrl.u32 %v957_v27, 16 }
  0xfe   : > { %v1455_v19 = vld [vmem:[#allocation2 + $0x50] sm:$0x1]  ;;  %v1151_v23 = vshll.u32 %v956_v18, 16  ;;  %v958_v53 = vld [vmem:[#allocation2 + $0x58] sm:$0xf]  ;;  %5562 = vmatpush.bf16.msra.mxu0 %v7147_v52  ;;  %8851 = vst [vmem:[#allocation20_spill] sm:$0xff] %v8044_v61 }
  0xff   : > { %5058 = vmatmul.bf16.gmra.mxu2 %v6256_v54  ;;  %5147 = vmatmul.bf16.gmra.mxu3 %v6260_v58  ;;  %v1581_v26 = vrot.slane %v1455_v19, 5  ;;  %v1964_v42 = vrot.slane %v1962_v30, 5  ;;  %v1159_v54 = vshll.u32 %v957_v27, 16  ;;  %v1456_v59 = vld [vmem:[#allocation2 + $0x54] sm:$0xe]  ;;  %v1158_v1 = vrot.slane %v1156_v16, 4 }
 0x100   : > { %5231 = vmatmul.bf16.gmra.mxu0 %v6228_v63  ;;  %v1153_v44 = vrot.slane %v1151_v23, 5  ;;  %v1457_v60 = vld [vmem:[#allocation2 + $0x58] sm:$0xf]  ;;  %v1979_v63 = vsel %vm7889_vm13, %v1974_v51, %v1978_v32  ;;  %v6291_v4 = vld [vmem:[#allocation3 + $0x1b8] sm:$0xf]  ;;  %v1165_v10 = vshll.u32 %v958_v53, 16 }
 0x101   : > { %4969 = vmatmul.bf16.gmra.mxu1 %v6252_v7  ;;  %v1582_v50 = vsel %vm7883_vm12, %v1580_v3, %v1581_v26  ;;  %v1965_v57 = vsel %vm7889_vm13, %v1960_v49, %v1964_v42  ;;  %v1983_v3 = vor.u32 %v1982_v33, %v1978_v32  ;;  %v1161_v7 = vrot.slane %v1159_v54, 5  ;;  %v6990_v12 = vld [vmem:[#allocation3 + $0x1bc] sm:$0xf]  ;;  %v6293_v13 = vld [vmem:[#allocation3 + $0x1dc] sm:$0xf0] }
 0x102   : > { %1691 = vst [vmem:[#allocation3 + $0x1dc] sm:$0xf] %v1582_v50  ;;  %v1154_v58 = vsel %vm7889_vm13, %v1149_v8, %v1153_v44  ;;  %v1169_v8 = vshrl.u32 %v958_v53, 16  ;;  %v6024_v18 = vrot.slane %v1456_v59, 9  ;;  %v1585_v19 = vrot.slane %v1457_v60, 5  ;;  %v8054_v51 = vpop.f32.mrf.mxu1  ;;  %v8058_v60 = vpop.f32.mrf.mxu0 }
 0x103   : > { %2249 = vst [vmem:[#allocation3 + $0x19c] sm:$0xf] %v1965_v57  ;;  %v806_v46 = vld [vmem:[#allocation2 + $0x5c] sm:$0x1]  ;;  %v1724_v30 = vld [vmem:[#allocation2 + $0x60] sm:$0xf]  ;;  %v1162_v26 = vor.u32 %v1161_v7, %v1158_v1  ;;  %v8050_v43 = vpop.f32.mrf.mxu2 }
 0x104   : > { %1416 = vst [vmem:[#allocation3 + $0x1d8] sm:$0xf] %v1154_v58  ;;  %v807_v49 = vsel %vm7682_vm2, %v557_v29, %v806_v46  ;;  %v6263_v23 = vld [vmem:[#allocation3 + $0x178] sm:$0xf]  ;;  %v1167_v21 = vrot.slane %v1165_v10, 5  ;;  %v1171_v27 = vrot.slane %v1169_v8, 4  ;;  %v1586_v29 = vsel %vm7883_vm12, %v6024_v18, %v1585_v19 }
 0x105   : > { %808 = vst [vmem:[#allocation2 + $0x5c] sm:$0x1] %v807_v49  ;;  %v1725_v32 = vld [vmem:[#allocation2 + $0x64] sm:$0xf]  ;;  %v6989_v33 = vld [vmem:[#allocation3 + $0x1b4] sm:$0xf]  ;;  %v6296_v46 = vor.u32 %v6990_v12, %v6293_v13 }
 0x106   : > { %2250 = vst [vmem:[#allocation3 + $0x1c0] sm:$0xf] %v1979_v63  ;;  %v1984_v36 = vrot.slane %v1983_v3, 4  ;;  %v1587_v42 = vrot.slane %v1585_v19, 4  ;;  %v375_v44 = vld [vmem:[#allocation2 + $0x68] sm:$0xf]  ;;  %v1172_v53 = vor.u32 %v1171_v27, %v1167_v21 }
 0x107   : > { %1756 = vst [vmem:[#allocation3 + $0x204] sm:$0xf] %v1724_v30  ;;  %v1163_v52 = vrot.slane %v1162_v26, 4  ;;  %v376_v16 = vsel %vm7710_vm7, 0, %v375_v44  ;;  %v1795_v57 = vld [vmem:[#allocation2 + $0x60] sm:$0xf] }
 0x108   : > { %1692 = vst [vmem:[#allocation3 + $0x200] sm:$0xf] %v1586_v29  ;;  %v1796_v58 = vld [vmem:[#allocation2 + $0x64] sm:$0xf]  ;;  %v1173_v3 = vrot.slane %v1172_v53, 4  ;;  %v1991_v1 = vshrl.u32 %v1795_v57, 16 }
 0x109   : > { %v6994_v50 = vld [vmem:[#allocation3 + $0x1d8] sm:$0xf0]  ;;  %1757 = vst [vmem:[#allocation3 + $0x228] sm:$0xf] %v1725_v32  ;;  %v1168_v63 = vsel %vm7889_vm13, %v1163_v52, %v1167_v21  ;;  %v1994_v10 = vshll.u32 %v1795_v57, 16  ;;  %v2000_v8 = vshll.u32 %v1796_v58, 16 }
 0x10a   : > { %v6292_v54 = vor.u32 %v6994_v50, %v6291_v4  ;;  %v6986_v59 = vld [vmem:[#allocation3 + $0x198] sm:$0xf0]  ;;  %377 = vst [vmem:[#allocation2 + $0x68] sm:$0xf] %v376_v16  ;;  %v8062_v27 = vpop.f32.mrf.mxu3  ;;  %v1993_v32 = vrot.slane %v1991_v1, 4  ;;  %v574_v21 = vrot.slane %v7706_v38, 4 }
 0x10b   : > { %v6264_v49 = vor.u32 %v6986_v59, %v6263_v23  ;;  %v6285_v7 = vld [vmem:[#allocation3 + $0x1d4] sm:$0xf0]  ;;  %1417 = vst [vmem:[#allocation3 + $0x1fc] sm:$0xf] %v1168_v63  ;;  %v1996_v29 = vrot.slane %v1994_v10, 5  ;;  %v2004_v23 = vshrl.u32 %v1796_v58, 16  ;;  %v8069_v38 = vpop.f32.mrf.mxu2 }
 0x10c   : > { %v6288_v18 = vor.u32 %v6989_v33, %v6285_v7  ;;  %v1794_v4 = vld [vmem:[#allocation2 + $0x5c] sm:$0x1]  ;;  %8852 = vst [vmem:[#allocation21_spill] sm:$0xff] %v8062_v27  ;;  %v960_v52 = vld [vmem:[#allocation2 + $0x60] sm:$0xf]  ;;  %v2002_v16 = vrot.slane %v2000_v8, 5 }
 0x10d   : > { %v959_v19 = vld [vmem:[#allocation2 + $0x5c] sm:$0x1]  ;;  %v1986_v26 = vshll.u32 %v1794_v4, 16  ;;  %v1997_v53 = vor.u32 %v1996_v29, %v1993_v32  ;;  %v1180_v57 = vshrl.u32 %v960_v52, 16  ;;  %v961_v63 = vld [vmem:[#allocation2 + $0x64] sm:$0xf]  ;;  %v8077_v4 = vpop.f32.mrf.mxu0 }
 0x10e   : > { %v1458_v30 = vld [vmem:[#allocation2 + $0x5c] sm:$0x1]  ;;  %v1175_v12 = vshll.u32 %v959_v19, 16  ;;  %v1183_v1 = vshll.u32 %v960_v52, 16  ;;  %v1726_v52 = vld [vmem:[#allocation2 + $0x6c] sm:$0xf] }
 0x10f   : > { %5063 = vmatmul.bf16.gmra.mxu2 %v6292_v54  ;;  %v1588_v13 = vrot.slane %v1458_v30, 5  ;;  %5152 = vmatmul.bf16.gmra.mxu3 %v6296_v46  ;;  %v1988_v44 = vrot.slane %v1986_v26, 5  ;;  %v2006_v54 = vrot.slane %v2004_v23, 4  ;;  %v1998_v7 = vrot.slane %v1997_v53, 4  ;;  %v6327_v19 = vld [vmem:[#allocation3 + $0x200] sm:$0xf] }
 0x110   : > { %5236 = vmatmul.bf16.gmra.mxu0 %v6264_v49  ;;  %v1177_v50 = vrot.slane %v1175_v12, 5  ;;  %v1182_v10 = vrot.slane %v1180_v57, 4  ;;  %v1185_v8 = vrot.slane %v1183_v1, 5  ;;  %v1459_v26 = vld [vmem:[#allocation2 + $0x60] sm:$0xe] }
 0x111   : > { %v1589_v33 = vsel %vm7883_vm12, %v1587_v42, %v1588_v13  ;;  %4974 = vmatmul.bf16.gmra.mxu1 %v6288_v18  ;;  %v1989_v59 = vsel %vm7889_vm13, %v1984_v36, %v1988_v44  ;;  %v813_v46 = vld [vmem:[#allocation2 + $0x68] sm:$0x1]  ;;  %v8073_v42 = vpop.f32.mrf.mxu1  ;;  %v1189_v18 = vshll.u32 %v961_v63, 16  ;;  %v1193_v36 = vshrl.u32 %v961_v63, 16  ;;  %v6999_v12 = vld [vmem:[#allocation3 + $0x204] sm:$0xf] }
 0x112   : > { %1693 = vst [vmem:[#allocation3 + $0x224] sm:$0xf] %v1589_v33  ;;  %v1178_v58 = vsel %vm7889_vm13, %v1173_v3, %v1177_v50  ;;  %v814_v49 = vsel %vm7682_vm2, %v574_v21, %v813_v46  ;;  %v2003_v3 = vsel %vm7889_vm13, %v1998_v7, %v2002_v16  ;;  %v2007_v30 = vor.u32 %v2006_v54, %v2002_v16  ;;  %v6329_v13 = vld [vmem:[#allocation3 + $0x224] sm:$0xf0]  ;;  %v1460_v23 = vld [vmem:[#allocation2 + $0x64] sm:$0xf]  ;;  %v8081_v57 = vpop.f32.mrf.mxu3 }
 0x113   : > { %2251 = vst [vmem:[#allocation3 + $0x1e4] sm:$0xf] %v1989_v59  ;;  %v1186_v32 = vor.u32 %v1185_v8, %v1182_v10  ;;  %v1191_v21 = vrot.slane %v1189_v18, 5  ;;  %v1195_v29 = vrot.slane %v1193_v36, 4  ;;  %v6299_v44 = vld [vmem:[#allocation3 + $0x1c0] sm:$0xf] }
 0x114   : > { %1418 = vst [vmem:[#allocation3 + $0x220] sm:$0xf] %v1178_v58  ;;  %v6025_v50 = vrot.slane %v1459_v26, 9  ;;  %v1592_v33 = vrot.slane %v1460_v23, 5  ;;  %v1727_v53 = vld [vmem:[#allocation2 + $0x70] sm:$0xf]  ;;  %v6332_v26 = vor.u32 %v6999_v12, %v6329_v13 }
 0x115   : > { %815 = vst [vmem:[#allocation2 + $0x68] sm:$0x1] %v814_v49  ;;  %v6998_v59 = vld [vmem:[#allocation3 + $0x1fc] sm:$0xf]  ;;  %v1187_v46 = vrot.slane %v1186_v32, 4  ;;  %v1196_v63 = vor.u32 %v1195_v29, %v1191_v21  ;;  %v2008_v16 = vrot.slane %v2007_v30, 4  ;;  %v8093_v13 = vpop.f32.mrf.mxu0 }
 0x116   : > { %2252 = vst [vmem:[#allocation3 + $0x208] sm:$0xf] %v2003_v3  ;;  %v1593_v54 = vsel %vm7883_vm12, %v6025_v50, %v1592_v33  ;;  %v1594_v1 = vrot.slane %v1592_v33, 4  ;;  %v378_v49 = vld [vmem:[#allocation2 + $0x74] sm:$0xf] }
 0x117   : > { %8853 = vst [vmem:[#allocation22_spill] sm:$0xff] %v8081_v57  ;;  %v1192_v8 = vsel %vm7889_vm13, %v1187_v46, %v1191_v21  ;;  %v1197_v18 = vrot.slane %v1196_v63, 4  ;;  %v379_v36 = vsel %vm7710_vm7, 0, %v378_v49  ;;  %v1798_v30 = vld [vmem:[#allocation2 + $0x6c] sm:$0xf]  ;;  %v7130_v46 = vld [vmem:[#allocation7 + $0x198] sm:$0xff] }
 0x118   : > { %1758 = vst [vmem:[#allocation3 + $0x24c] sm:$0xf] %v1726_v52  ;;  %v1799_v63 = vld [vmem:[#allocation2 + $0x70] sm:$0xf]  ;;  %v2018_v12 = vshll.u32 %v1798_v30, 16  ;;  %5385 = vmatpush.bf16.msra.mxu2 %v7130_v46 }
 0x119   : > { %v7003_v58 = vld [vmem:[#allocation3 + $0x220] sm:$0xf0]  ;;  %1759 = vst [vmem:[#allocation3 + $0x270] sm:$0xf] %v1727_v53  ;;  %v8091_v53 = vpop.f32.mrf.mxu1 }
 0x11a   : > { %v6995_v7 = vld [vmem:[#allocation3 + $0x1e0] sm:$0xf0]  ;;  %v6328_v10 = vor.u32 %v7003_v58, %v6327_v19  ;;  %1694 = vst [vmem:[#allocation3 + $0x248] sm:$0xf] %v1593_v54  ;;  %v2015_v54 = vshrl.u32 %v1798_v30, 16  ;;  %v7138_v30 = vld [vmem:[#allocation7 + $0x1d8] sm:$0xff] }
 0x11b   : > { %v6321_v3 = vld [vmem:[#allocation3 + $0x21c] sm:$0xf0]  ;;  %1419 = vst [vmem:[#allocation3 + $0x244] sm:$0xf] %v1192_v8  ;;  %v6300_v32 = vor.u32 %v6995_v7, %v6299_v44  ;;  %5474 = vmatpush.bf16.msra.mxu3 %v7138_v30  ;;  %v1463_v30 = vld [vmem:[#allocation2 + $0x70] sm:$0xf] }
 0x11c   : > { %v1797_v29 = vld [vmem:[#allocation2 + $0x68] sm:$0x1]  ;;  %v8089_v23 = vpop.f32.mrf.mxu2  ;;  %v6324_v52 = vor.u32 %v6998_v59, %v6321_v3  ;;  %380 = vst [vmem:[#allocation2 + $0x74] sm:$0xf] %v379_v36  ;;  %v2024_v59 = vshll.u32 %v1799_v63, 16  ;;  %v2017_v8 = vrot.slane %v2015_v54, 4 }
 0x11d   : > { %v962_v50 = vld [vmem:[#allocation2 + $0x68] sm:$0x1]  ;;  %v2010_v19 = vshll.u32 %v1797_v29, 16  ;;  %v2020_v3 = vrot.slane %v2018_v12, 5  ;;  %v591_v29 = vrot.slane %v7753_v45, 4  ;;  %v1599_v39 = vrot.slane %v1463_v30, 5 }
 0x11e   : > { %v1461_v33 = vld [vmem:[#allocation2 + $0x68] sm:$0x1]  ;;  %v1199_v21 = vshll.u32 %v962_v50, 16  ;;  %v1462_v12 = vld [vmem:[#allocation2 + $0x6c] sm:$0xe] }
 0x11f   : > { %v1595_v58 = vrot.slane %v1461_v33, 5  ;;  %5068 = vmatmul.bf16.gmra.mxu2 %v6328_v10  ;;  %5157 = vmatmul.bf16.gmra.mxu3 %v6332_v26  ;;  %v2012_v44 = vrot.slane %v2010_v19, 5  ;;  %v7122_v26 = vld [vmem:[#allocation7 + $0x158] sm:$0xff]  ;;  %v8104_v33 = vrot.slane %v2024_v59, 5 }
 0x120   : > { %v1201_v49 = vrot.slane %v1199_v21, 5  ;;  %5241 = vmatmul.bf16.gmra.mxu0 %v6300_v32  ;;  %v2028_v32 = vshrl.u32 %v1799_v63, 16  ;;  %5296 = vmatpush.bf16.msra.mxu1 %v7122_v26  ;;  %v964_v19 = vld [vmem:[#allocation2 + $0x70] sm:$0xf]  ;;  %v8108_v21 = vld [vmem:[#allocation3 + $0x24c] sm:$0xf] }
 0x121   : > { %v1596_v7 = vsel %vm7883_vm12, %v1594_v1, %v1595_v58  ;;  %4979 = vmatmul.bf16.gmra.mxu1 %v6324_v52  ;;  %v2013_v10 = vsel %vm7889_vm13, %v2008_v16, %v2012_v44  ;;  %v2021_v1 = vor.u32 %v2020_v3, %v2017_v8  ;;  %v963_v52 = vld [vmem:[#allocation2 + $0x6c] sm:$0xf]  ;;  %v8114_v44 = vld [vmem:[#allocation3 + $0x208] sm:$0xf]  ;;  %v1213_v59 = vshll.u32 %v964_v19, 16 }
 0x122   : > { %1695 = vst [vmem:[#allocation3 + $0x26c] sm:$0xf] %v1596_v7  ;;  %v1202_v36 = vsel %vm7889_vm13, %v1197_v18, %v1201_v49  ;;  %v8102_v50 = vpop.f32.mrf.mxu3  ;;  %v8110_v18 = vld [vmem:[#allocation3 + $0x26c] sm:$0xf0]  ;;  %v8112_v45 = vrot.slane %v2028_v32, 4  ;;  %v1204_v46 = vshrl.u32 %v963_v52, 16 }
 0x123   : > { %2253 = vst [vmem:[#allocation3 + $0x22c] sm:$0xf] %v2013_v10  ;;  %v2022_v58 = vrot.slane %v2021_v1, 4  ;;  %v1207_v54 = vshll.u32 %v963_v52, 16  ;;  %v6363_v63 = vld [vmem:[#allocation3 + $0x248] sm:$0xf] }
 0x124   : > { %8854 = vst [vmem:[#allocation23_spill] sm:$0xff] %v8102_v50  ;;  %v8106_v16 = vpop.f32.mrf.mxu2  ;;  %v820_v49 = vld [vmem:[#allocation2 + $0x74] sm:$0x1]  ;;  %v1217_v8 = vshrl.u32 %v964_v19, 16  ;;  %v6026_v3 = vrot.slane %v1462_v12, 9  ;;  %v4945_v32 = vpop.f32.mrf.mxu1  ;;  %v1206_v50 = vrot.slane %v1204_v46, 4 }
 0x125   : > { %1420 = vst [vmem:[#allocation3 + $0x268] sm:$0xf] %v1202_v36  ;;  %v7146_v7 = vld [vmem:[#allocation7 + $0x218] sm:$0xff]  ;;  %v821_v10 = vsel %vm7682_vm2, %v591_v29, %v820_v49  ;;  %v2027_v36 = vsel %vm7889_vm13, %v2022_v58, %v8104_v33  ;;  %v1728_v26 = vld [vmem:[#allocation2 + $0x78] sm:$0xf]  ;;  %v1209_v57 = vrot.slane %v1207_v54, 5  ;;  %v8122_v29 = vpop.f32.mrf.mxu0  ;;  %v6368_v58 = vor.u32 %v8108_v21, %v8110_v18 }
 0x126   : > { %8855 = vst [vmem:[#allocation24_spill] sm:$0xff] %v8106_v16  ;;  %v1729_v1 = vld [vmem:[#allocation2 + $0x7c] sm:$0xf]  ;;  %5563 = vmatpush.bf16.msra.mxu0 %v7146_v7  ;;  %v1215_v19 = vrot.slane %v1213_v59, 5  ;;  %v1219_v12 = vrot.slane %v1217_v8, 4  ;;  %v4946_v46 = vadd.f32 %v4945_v32, %v8002_v24  ;;  %v2031_v8 = vor.u32 %v8112_v45, %v8104_v33 }
 0x127   : > { %822 = vst [vmem:[#allocation2 + $0x74] sm:$0x1] %v821_v10  ;;  %v7007_v27 = vld [vmem:[#allocation3 + $0x244] sm:$0xf]  ;;  %v1210_v56 = vor.u32 %v1209_v57, %v1206_v50  ;;  %v1600_v57 = vsel %vm7883_vm12, %v6026_v3, %v1599_v39  ;;  %v1801_v50 = vld [vmem:[#allocation2 + $0x78] sm:$0xf] }
 0x128   : > { %2254 = vst [vmem:[#allocation3 + $0x250] sm:$0xf] %v2027_v36  ;;  %v381_v36 = vld [vmem:[#allocation2 + $0x80] sm:$0xf]  ;;  %v1220_v16 = vor.u32 %v1219_v12, %v1215_v19  ;;  %v1802_v21 = vld [vmem:[#allocation2 + $0x7c] sm:$0xf] }
 0x129   : > { %v7012_v52 = vld [vmem:[#allocation3 + $0x268] sm:$0xf0]  ;;  %1760 = vst [vmem:[#allocation3 + $0x294] sm:$0xf] %v1728_v26  ;;  %v1211_v48 = vrot.slane %v1210_v56, 4  ;;  %v382_v24 = vsel %vm7710_vm7, 0, %v381_v36 }
 0x12a   : > { %v7004_v49 = vld [vmem:[#allocation3 + $0x228] sm:$0xf0]  ;;  %v8127_v7 = vpop.f32.mrf.mxu3  ;;  %v6364_v59 = vor.u32 %v7012_v52, %v6363_v63  ;;  %1761 = vst [vmem:[#allocation3 + $0x2b8] sm:$0xf] %v1729_v1  ;;  %v2039_v63 = vshrl.u32 %v1801_v50, 16  ;;  %v2042_v30 = vshll.u32 %v1801_v50, 16 }
 0x12b   : > { %v6336_v10 = vor.u32 %v7004_v49, %v8114_v44  ;;  %v1601_v44 = vrot.slane %v1599_v39, 4  ;;  %1696 = vst [vmem:[#allocation3 + $0x290] sm:$0xf] %v1600_v57  ;;  %v1216_v33 = vsel %vm7889_vm13, %v1211_v48, %v1215_v19  ;;  %v2048_v56 = vshll.u32 %v1802_v21, 16  ;;  %v966_v45 = vld [vmem:[#allocation2 + $0x78] sm:$0xf] }
 0x12c   : > { %v6357_v54 = vld [vmem:[#allocation3 + $0x264] sm:$0xf0]  ;;  %v5034_v18 = vpop.f32.mrf.mxu2  ;;  %383 = vst [vmem:[#allocation2 + $0x80] sm:$0xf] %v382_v24  ;;  %v2032_v39 = vrot.slane %v2031_v8, 4  ;;  %v1221_v52 = vrot.slane %v1220_v16, 4 }
 0x12d   : > { %v6360_v61 = vor.u32 %v7007_v27, %v6357_v54  ;;  %v5035_v26 = vadd.f32 %v5034_v18, %v4946_v46  ;;  %v2052_v27 = vshrl.u32 %v1802_v21, 16  ;;  %1421 = vst [vmem:[#allocation3 + $0x28c] sm:$0xf] %v1216_v33  ;;  %v2041_v46 = vrot.slane %v2039_v63, 4  ;;  %v4947_v18 = vpop.f32.mrf.mxu1  ;;  %v967_v24 = vld [vmem:[#allocation2 + $0x7c] sm:$0xf]  ;;  %v8140_v33 = vpop.f32.mrf.mxu0 }
 0x12e   : > { %v1800_v3 = vld [vmem:[#allocation2 + $0x74] sm:$0x1]  ;;  %v2044_v36 = vrot.slane %v2042_v30, 5  ;;  %v2050_v57 = vrot.slane %v2048_v56, 5  ;;  %v1228_v21 = vshrl.u32 %v966_v45, 16  ;;  %v1231_v16 = vshll.u32 %v966_v45, 16 }
 0x12f   : > { %5073 = vmatmul.bf16.gmra.mxu2 %v6364_v59  ;;  %v965_v1 = vld [vmem:[#allocation2 + $0x74] sm:$0x1]  ;;  %5162 = vmatmul.bf16.gmra.mxu3 %v6368_v58  ;;  %v2034_v32 = vshll.u32 %v1800_v3, 16  ;;  %v2054_v50 = vrot.slane %v2052_v27, 4  ;;  %v1465_v30 = vld [vmem:[#allocation2 + $0x78] sm:$0xe]  ;;  %v4948_v45 = vadd.f32 %v4947_v18, %v8021_v14 }
 0x130   : > { %v1223_v12 = vshll.u32 %v965_v1, 16  ;;  %v1464_v49 = vld [vmem:[#allocation2 + $0x74] sm:$0x1]  ;;  %5246 = vmatmul.bf16.gmra.mxu0 %v6336_v10  ;;  %v2045_v8 = vor.u32 %v2044_v36, %v2041_v46  ;;  %v1466_v56 = vld [vmem:[#allocation2 + $0x7c] sm:$0xf]  ;;  %v1230_v1 = vrot.slane %v1228_v21, 4 }
 0x131   : > { %v1602_v54 = vrot.slane %v1464_v49, 5  ;;  %4984 = vmatmul.bf16.gmra.mxu1 %v6360_v61  ;;  %v2036_v48 = vrot.slane %v2034_v32, 5  ;;  %v8856_v32 = vrot.slane %v7808_v31, 4  ;;  %v1237_v36 = vshll.u32 %v967_v24, 16  ;;  %v6371_v21 = vld [vmem:[#allocation3 + $0x250] sm:$0xf] }
 0x132   : > { %v1225_v19 = vrot.slane %v1223_v12, 5  ;;  %v5123_v59 = vpop.f32.mrf.mxu3  ;;  %v1233_v12 = vrot.slane %v1231_v16, 5  ;;  %v6399_v49 = vld [vmem:[#allocation3 + $0x290] sm:$0xf]  ;;  %v1606_v31 = vrot.slane %v1466_v56, 5 }
 0x133   : > { %v1603_v58 = vsel %vm7883_vm12, %v1601_v44, %v1602_v54  ;;  %v2037_v10 = vsel %vm7889_vm13, %v2032_v39, %v2036_v48  ;;  %v8144_v63 = vadd.f32 %v5123_v59, %v5035_v26  ;;  %v827_v3 = vld [vmem:[#allocation2 + $0x80] sm:$0x1]  ;;  %v2046_v44 = vrot.slane %v2045_v8, 4  ;;  %v6401_v54 = vld [vmem:[#allocation3 + $0x2b4] sm:$0xf0] }
 0x134   : > { %v1226_v61 = vsel %vm7889_vm13, %v1221_v52, %v1225_v19  ;;  %1697 = vst [vmem:[#allocation3 + $0x2b4] sm:$0xf] %v1603_v58  ;;  %v5036_v27 = vpop.f32.mrf.mxu2  ;;  %v828_v26 = vsel %vm7682_vm2, %v8856_v32, %v827_v3  ;;  %v2055_v39 = vor.u32 %v2054_v50, %v2050_v57  ;;  %v7017_v52 = vld [vmem:[#allocation3 + $0x294] sm:$0xf]  ;;  %v1241_v48 = vshrl.u32 %v967_v24, 16 }
 0x135   : > { %2255 = vst [vmem:[#allocation3 + $0x274] sm:$0xf] %v2037_v10  ;;  %v2051_v46 = vsel %vm7889_vm13, %v2046_v44, %v2050_v57  ;;  %v6027_v19 = vrot.slane %v1465_v30, 9  ;;  %v5037_v14 = vadd.f32 %v5036_v27, %v4948_v45  ;;  %v1234_v59 = vor.u32 %v1233_v12, %v1230_v1  ;;  %v1730_v18 = vld [vmem:[#allocation2 + $0x84] sm:$0xf] }
 0x136   : > { %1422 = vst [vmem:[#allocation3 + $0x2b0] sm:$0xf] %v1226_v61  ;;  %v7016_v58 = vld [vmem:[#allocation3 + $0x28c] sm:$0xf]  ;;  %v1239_v8 = vrot.slane %v1237_v36, 5  ;;  %v1243_v50 = vrot.slane %v1241_v48, 4 }
 0x137   : > { %829 = vst [vmem:[#allocation2 + $0x80] sm:$0x1] %v828_v26  ;;  %v1731_v16 = vld [vmem:[#allocation2 + $0x88] sm:$0xf]  ;;  %v2056_v10 = vrot.slane %v2055_v39, 4  ;;  %v1235_v61 = vrot.slane %v1234_v59, 4  ;;  %v1607_v3 = vsel %vm7883_vm12, %v6027_v19, %v1606_v31  ;;  %v6404_v26 = vor.u32 %v7017_v52, %v6401_v54 }
 0x138   : > { %2256 = vst [vmem:[#allocation3 + $0x298] sm:$0xf] %v2051_v46  ;;  %v384_v57 = vld [vmem:[#allocation2 + $0x8c] sm:$0xf]  ;;  %v1244_v44 = vor.u32 %v1243_v50, %v1239_v8  ;;  %v1608_v27 = vrot.slane %v1606_v31, 4 }
 0x139   : > { %1762 = vst [vmem:[#allocation3 + $0x2dc] sm:$0xf] %v1730_v18  ;;  %v385_v56 = vsel %vm7710_vm7, 0, %v384_v57  ;;  %v1240_v39 = vsel %vm7889_vm13, %v1235_v61, %v1239_v8  ;;  %v1804_v12 = vld [vmem:[#allocation2 + $0x84] sm:$0xf]  ;;  %v7129_v54 = vld [vmem:[#allocation7 + $0x190] sm:$0xff] }
 0x13a   : > { %1763 = vst [vmem:[#allocation3 + $0x300] sm:$0xf] %v1731_v16  ;;  %v5125_v24 = vpop.f32.mrf.mxu3  ;;  %v1245_v48 = vrot.slane %v1244_v44, 4  ;;  %v2063_v19 = vshrl.u32 %v1804_v12, 16  ;;  %v1805_v57 = vld [vmem:[#allocation2 + $0x88] sm:$0xf]  ;;  %5386 = vmatpush.bf16.msra.mxu2 %v7129_v54 }
 0x13b   : > { %v7021_v30 = vld [vmem:[#allocation3 + $0x2b0] sm:$0xf0]  ;;  %1698 = vst [vmem:[#allocation3 + $0x2d8] sm:$0xf] %v1607_v3  ;;  %v8159_v45 = vadd.f32 %v5125_v24, %v5037_v14 }
 0x13c   : > { %v7013_v1 = vld [vmem:[#allocation3 + $0x270] sm:$0xf0]  ;;  %v6400_v32 = vor.u32 %v7021_v30, %v6399_v49  ;;  %386 = vst [vmem:[#allocation2 + $0x8c] sm:$0xf] %v385_v56  ;;  %v2065_v24 = vrot.slane %v2063_v19, 4 }
 0x13d   : > { %v6372_v46 = vor.u32 %v7013_v1, %v6371_v21  ;;  %v6393_v36 = vld [vmem:[#allocation3 + $0x2ac] sm:$0xf0]  ;;  %1423 = vst [vmem:[#allocation3 + $0x2d4] sm:$0xf] %v1240_v39  ;;  %v5212_v59 = vpop.f32.mrf.mxu0  ;;  %v625_v21 = vrot.slane %v7851_v47, 4  ;;  %v2072_v1 = vshll.u32 %v1805_v57, 16 }
 0x13e   : > { %v6396_v31 = vor.u32 %v7016_v58, %v6393_v36  ;;  %v1803_v18 = vld [vmem:[#allocation2 + $0x80] sm:$0x1]  ;;  %v4950_v3 = vpop.f32.mrf.mxu1  ;;  %v8164_v8 = vadd.f32 %v5212_v59, %v8144_v63  ;;  %v2066_v58 = vshll.u32 %v1804_v12, 16  ;;  %v2076_v47 = vshrl.u32 %v1805_v57, 16  ;;  %v969_v59 = vld [vmem:[#allocation2 + $0x84] sm:$0xf] }
 0x13f   : > { %v968_v50 = vld [vmem:[#allocation2 + $0x80] sm:$0x1]  ;;  %5078 = vmatmul.bf16.gmra.mxu2 %v6400_v32  ;;  %v2058_v14 = vshll.u32 %v1803_v18, 16  ;;  %v4951_v61 = vadd.f32 %v4950_v3, %v8036_v37  ;;  %5167 = vmatmul.bf16.gmra.mxu3 %v6404_v26  ;;  %v7137_v32 = vld [vmem:[#allocation7 + $0x1d0] sm:$0xff]  ;;  %v2074_v19 = vrot.slane %v2072_v1, 5 }
 0x140   : > { %v1467_v16 = vld [vmem:[#allocation2 + $0x80] sm:$0x1]  ;;  %v1247_v49 = vshll.u32 %v968_v50, 16  ;;  %5251 = vmatmul.bf16.gmra.mxu0 %v6372_v46  ;;  %v2068_v39 = vrot.slane %v2066_v58, 5  ;;  %5475 = vmatpush.bf16.msra.mxu3 %v7137_v32  ;;  %v2078_v50 = vrot.slane %v2076_v47, 4  ;;  %v7145_v54 = vld [vmem:[#allocation7 + $0x210] sm:$0xff] }
 0x141   : > { %v1609_v52 = vrot.slane %v1467_v16, 5  ;;  %v2060_v30 = vrot.slane %v2058_v14, 5  ;;  %4989 = vmatmul.bf16.gmra.mxu1 %v6396_v31  ;;  %v1252_v16 = vshrl.u32 %v969_v59, 16  ;;  %v970_v14 = vld [vmem:[#allocation2 + $0x88] sm:$0xf]  ;;  %5564 = vmatpush.bf16.msra.mxu0 %v7145_v54 }
 0x142   : > { %v1249_v44 = vrot.slane %v1247_v49, 5  ;;  %v5039_v63 = vpop.f32.mrf.mxu2  ;;  %v5128_v36 = vpop.f32.mrf.mxu3  ;;  %v2069_v18 = vor.u32 %v2068_v39, %v2065_v24  ;;  %v1261_v57 = vshll.u32 %v970_v14, 16  ;;  %v8180_v58 = vld [vmem:[#allocation3 + $0x298] sm:$0xf]  ;;  %v7026_v24 = vld [vmem:[#allocation3 + $0x2dc] sm:$0xf]  ;;  %v2079_v47 = vor.u32 %v2078_v50, %v2074_v19 }
 0x143   : > { %v1610_v56 = vsel %vm7883_vm12, %v1608_v27, %v1609_v52  ;;  %v2061_v37 = vsel %vm7889_vm13, %v2056_v10, %v2060_v30  ;;  %v5040_v26 = vadd.f32 %v5039_v63, %v4951_v61  ;;  %v834_v46 = vld [vmem:[#allocation2 + $0x8c] sm:$0x1]  ;;  %v8178_v10 = vld [vmem:[#allocation3 + $0x2d8] sm:$0xf]  ;;  %v1254_v61 = vrot.slane %v1252_v16, 4 }
 0x144   : > { %1699 = vst [vmem:[#allocation3 + $0x2fc] sm:$0xf] %v1610_v56  ;;  %v1250_v12 = vsel %vm7889_vm13, %v1245_v48, %v1249_v44  ;;  %v7121_v27 = vld [vmem:[#allocation7 + $0x150] sm:$0xff]  ;;  %v835_v31 = vsel %vm7682_vm2, %v625_v21, %v834_v46  ;;  %v1255_v48 = vshll.u32 %v969_v59, 16  ;;  %v2070_v52 = vrot.slane %v2069_v18, 4 }
 0x145   : > { %2257 = vst [vmem:[#allocation3 + $0x2bc] sm:$0xf] %v2061_v37  ;;  %v8176_v3 = vadd.f32 %v5128_v36, %v5040_v26  ;;  %5297 = vmatpush.bf16.msra.mxu1 %v7121_v27  ;;  %v5214_v49 = vpop.f32.mrf.mxu0  ;;  %v6437_v30 = vld [vmem:[#allocation3 + $0x2fc] sm:$0xf0]  ;;  %v1265_v56 = vshrl.u32 %v970_v14, 16  ;;  %v1263_v37 = vrot.slane %v1261_v57, 5 }
 0x146   : > { %1424 = vst [vmem:[#allocation3 + $0x2f8] sm:$0xf] %v1250_v12  ;;  %v4952_v21 = vpop.f32.mrf.mxu1  ;;  %v1257_v44 = vrot.slane %v1255_v48, 5  ;;  %v1468_v1 = vld [vmem:[#allocation2 + $0x84] sm:$0xe]  ;;  %v8183_v63 = vadd.f32 %v5214_v49, %v8159_v45  ;;  %v2075_v39 = vsel %vm7889_vm13, %v2070_v52, %v2074_v19 }
 0x147   : > { %836 = vst [vmem:[#allocation2 + $0x8c] sm:$0x1] %v835_v31  ;;  %v1469_v32 = vld [vmem:[#allocation2 + $0x88] sm:$0xf]  ;;  %v1732_v26 = vld [vmem:[#allocation2 + $0x90] sm:$0xf]  ;;  %v4953_v12 = vadd.f32 %v4952_v21, %v8058_v60  ;;  %v6440_v21 = vor.u32 %v7026_v24, %v6437_v30 }
 0x148   : > { %v1733_v36 = vld [vmem:[#allocation2 + $0x94] sm:$0xf]  ;;  %v7025_v46 = vld [vmem:[#allocation3 + $0x2d4] sm:$0xf]  ;;  %2258 = vst [vmem:[#allocation3 + $0x2e0] sm:$0xf] %v2075_v39  ;;  %v1258_v59 = vor.u32 %v1257_v44, %v1254_v61 }
 0x149   : > { %v1267_v31 = vrot.slane %v1265_v56, 4  ;;  %v6028_v18 = vrot.slane %v1468_v1, 9  ;;  %v1613_v14 = vrot.slane %v1469_v32, 5  ;;  %1764 = vst [vmem:[#allocation3 + $0x324] sm:$0xf] %v1732_v26  ;;  %v2080_v44 = vrot.slane %v2079_v47, 4 }
 0x14a   : > { %v5041_v16 = vpop.f32.mrf.mxu2  ;;  %v387_v48 = vld [vmem:[#allocation2 + $0x98] sm:$0xf]  ;;  %v5130_v50 = vpop.f32.mrf.mxu3  ;;  %v1259_v52 = vrot.slane %v1258_v59, 4  ;;  %1765 = vst [vmem:[#allocation3 + $0x348] sm:$0xf] %v1733_v36 }
 0x14b   : > { %v7030_v27 = vld [vmem:[#allocation3 + $0x2f8] sm:$0xf0]  ;;  %v5042_v19 = vadd.f32 %v5041_v16, %v4953_v12  ;;  %v1268_v54 = vor.u32 %v1267_v31, %v1263_v37  ;;  %v388_v60 = vsel %vm7710_vm7, 0, %v387_v48  ;;  %v1615_v36 = vrot.slane %v1613_v14, 4  ;;  %v1807_v31 = vld [vmem:[#allocation2 + $0x90] sm:$0xf] }
 0x14c   : > { %v6436_v45 = vor.u32 %v7030_v27, %v8178_v10  ;;  %v7022_v49 = vld [vmem:[#allocation3 + $0x2b8] sm:$0xf0]  ;;  %v1614_v10 = vsel %vm7883_vm12, %v6028_v18, %v1613_v14  ;;  %389 = vst [vmem:[#allocation2 + $0x98] sm:$0xf] %v388_v60  ;;  %v1264_v39 = vsel %vm7889_vm13, %v1259_v52, %v1263_v37  ;;  %v642_v16 = vrot.slane %v7727_v62, 4 }
 0x14d   : > { %v6408_v57 = vor.u32 %v7022_v49, %v8180_v58  ;;  %v6429_v61 = vld [vmem:[#allocation3 + $0x2f4] sm:$0xf0]  ;;  %v8194_v56 = vadd.f32 %v5130_v50, %v5042_v19  ;;  %v1269_v26 = vrot.slane %v1268_v54, 4  ;;  %v5217_v12 = vpop.f32.mrf.mxu0  ;;  %1425 = vst [vmem:[#allocation3 + $0x31c] sm:$0xf] %v1264_v39  ;;  %v2087_v19 = vshrl.u32 %v1807_v31, 16 }
 0x14e   : > { %v1806_v1 = vld [vmem:[#allocation2 + $0x8c] sm:$0x1]  ;;  %v6432_v27 = vor.u32 %v7025_v46, %v6429_v61  ;;  %v4955_v30 = vpop.f32.mrf.mxu1  ;;  %1700 = vst [vmem:[#allocation3 + $0x320] sm:$0xf] %v1614_v10  ;;  %v8199_v18 = vadd.f32 %v5217_v12, %v8176_v3  ;;  %v1808_v46 = vld [vmem:[#allocation2 + $0x94] sm:$0xf] }
 0x14f   : > { %v971_v32 = vld [vmem:[#allocation2 + $0x8c] sm:$0x1]  ;;  %v2082_v59 = vshll.u32 %v1806_v1, 16  ;;  %5083 = vmatmul.bf16.gmra.mxu2 %v6436_v45  ;;  %v4956_v37 = vadd.f32 %v4955_v30, %v8077_v4  ;;  %5172 = vmatmul.bf16.gmra.mxu3 %v6440_v21  ;;  %v2090_v45 = vshll.u32 %v1807_v31, 16  ;;  %v2096_v50 = vshll.u32 %v1808_v46, 16 }
 0x150   : > { %v1271_v58 = vshll.u32 %v971_v32, 16  ;;  %v1470_v24 = vld [vmem:[#allocation2 + $0x8c] sm:$0x1]  ;;  %5256 = vmatmul.bf16.gmra.mxu0 %v6408_v57  ;;  %v2100_v4 = vshrl.u32 %v1808_v46, 16  ;;  %v2089_v61 = vrot.slane %v2087_v19, 4 }
 0x151   : > { %v1616_v47 = vrot.slane %v1470_v24, 5  ;;  %v2084_v14 = vrot.slane %v2082_v59, 5  ;;  %4994 = vmatmul.bf16.gmra.mxu1 %v6432_v27  ;;  %v2092_v21 = vrot.slane %v2090_v45, 5  ;;  %v2098_v1 = vrot.slane %v2096_v50, 5  ;;  %v972_v39 = vld [vmem:[#allocation2 + $0x90] sm:$0xf] }
 0x152   : > { %v1273_v48 = vrot.slane %v1271_v58, 5  ;;  %v5044_v52 = vpop.f32.mrf.mxu2  ;;  %v5133_v60 = vpop.f32.mrf.mxu3  ;;  %v2102_v32 = vrot.slane %v2100_v4, 4  ;;  %v8213_v27 = vld [vmem:[#allocation3 + $0x324] sm:$0xf]  ;;  %v8215_v59 = vld [vmem:[#allocation3 + $0x344] sm:$0xf0] }
 0x153   : > { %v1617_v49 = vsel %vm7883_vm12, %v1615_v36, %v1616_v47  ;;  %v2085_v3 = vsel %vm7889_vm13, %v2080_v44, %v2084_v14  ;;  %v5045_v54 = vadd.f32 %v5044_v52, %v4956_v37  ;;  %v841_v57 = vld [vmem:[#allocation2 + $0x98] sm:$0x1]  ;;  %v2093_v36 = vor.u32 %v2092_v21, %v2089_v61  ;;  %v1472_v46 = vld [vmem:[#allocation2 + $0x94] sm:$0xf]  ;;  %v1734_v52 = vld [vmem:[#allocation2 + $0x9c] sm:$0xf] }
 0x154   : > { %v1274_v62 = vsel %vm7889_vm13, %v1269_v26, %v1273_v48  ;;  %1701 = vst [vmem:[#allocation3 + $0x344] sm:$0xf] %v1617_v49  ;;  %v842_v10 = vsel %vm7682_vm2, %v642_v16, %v841_v57  ;;  %v973_v26 = vld [vmem:[#allocation2 + $0x94] sm:$0xf]  ;;  %v2103_v58 = vor.u32 %v2102_v32, %v2098_v1  ;;  %v1276_v24 = vshrl.u32 %v972_v39, 16 }
 0x155   : > { %2259 = vst [vmem:[#allocation3 + $0x304] sm:$0xf] %v2085_v3  ;;  %v8211_v44 = vadd.f32 %v5133_v60, %v5045_v54  ;;  %v5219_v12 = vpop.f32.mrf.mxu0  ;;  %v1279_v30 = vshll.u32 %v972_v39, 16  ;;  %v1285_v47 = vshll.u32 %v973_v26, 16  ;;  %v8217_v31 = vld [vmem:[#allocation3 + $0x2e0] sm:$0xf] }
 0x156   : > { %1426 = vst [vmem:[#allocation3 + $0x340] sm:$0xf] %v1274_v62  ;;  %v4957_v16 = vpop.f32.mrf.mxu1  ;;  %v2094_v37 = vrot.slane %v2093_v36, 4  ;;  %v1289_v14 = vshrl.u32 %v973_v26, 16  ;;  %v1471_v48 = vld [vmem:[#allocation2 + $0x90] sm:$0xe]  ;;  %v8220_v49 = vadd.f32 %v5219_v12, %v8194_v56 }
 0x157   : > { %843 = vst [vmem:[#allocation2 + $0x98] sm:$0x1] %v842_v10  ;;  %v4958_v19 = vadd.f32 %v4957_v16, %v8093_v13  ;;  %v6471_v45 = vld [vmem:[#allocation3 + $0x320] sm:$0xf]  ;;  %v1278_v50 = vrot.slane %v1276_v24, 4  ;;  %v1281_v3 = vrot.slane %v1279_v30, 5  ;;  %v6476_v24 = vor.u32 %v8213_v27, %v8215_v59 }
 0x158   : > { %v7034_v62 = vld [vmem:[#allocation3 + $0x31c] sm:$0xf]  ;;  %v2099_v54 = vsel %vm7889_vm13, %v2094_v37, %v2098_v1  ;;  %v1287_v60 = vrot.slane %v1285_v47, 5  ;;  %v1291_v57 = vrot.slane %v1289_v14, 4  ;;  %v6029_v61 = vrot.slane %v1471_v48, 9 }
 0x159   : > { %v2104_v32 = vrot.slane %v2103_v58, 4  ;;  %2260 = vst [vmem:[#allocation3 + $0x328] sm:$0xf] %v2099_v54  ;;  %v1282_v56 = vor.u32 %v1281_v3, %v1278_v50  ;;  %v1620_v39 = vrot.slane %v1472_v46, 5  ;;  %v1735_v16 = vld [vmem:[#allocation2 + $0xa0] sm:$0xf] }
 0x15a   : > { %v5046_v10 = vpop.f32.mrf.mxu2  ;;  %v5135_v13 = vpop.f32.mrf.mxu3  ;;  %v1292_v30 = vor.u32 %v1291_v57, %v1287_v60  ;;  %1766 = vst [vmem:[#allocation3 + $0x36c] sm:$0xf] %v1734_v52  ;;  %v390_v54 = vld [vmem:[#allocation2 + $0xa4] sm:$0xf] }
 0x15b   : > { %v7039_v4 = vld [vmem:[#allocation3 + $0x340] sm:$0xf0]  ;;  %v5047_v36 = vadd.f32 %v5046_v10, %v4958_v19  ;;  %v1283_v14 = vrot.slane %v1282_v56, 4  ;;  %v1621_v58 = vsel %vm7883_vm12, %v6029_v61, %v1620_v39  ;;  %v1622_v48 = vrot.slane %v1620_v39, 4  ;;  %1767 = vst [vmem:[#allocation3 + $0x390] sm:$0xf] %v1735_v16 }
 0x15c   : > { %v7031_v21 = vld [vmem:[#allocation3 + $0x300] sm:$0xf0]  ;;  %v6472_v12 = vor.u32 %v7039_v4, %v6471_v45  ;;  %v1293_v50 = vrot.slane %v1292_v30, 4  ;;  %1702 = vst [vmem:[#allocation3 + $0x368] sm:$0xf] %v1621_v58  ;;  %v391_v10 = vsel %vm7710_vm7, 0, %v390_v54 }
 0x15d   : > { %v6465_v26 = vld [vmem:[#allocation3 + $0x33c] sm:$0xf0]  ;;  %v6444_v1 = vor.u32 %v7031_v21, %v8217_v31  ;;  %v8230_v46 = vadd.f32 %v5135_v13, %v5047_v36  ;;  %v5222_v4 = vpop.f32.mrf.mxu0  ;;  %v1288_v59 = vsel %vm7889_vm13, %v1283_v14, %v1287_v60  ;;  %v7128_v31 = vld [vmem:[#allocation7 + $0x188] sm:$0xff]  ;;  %v1810_v39 = vld [vmem:[#allocation2 + $0x9c] sm:$0xf]  ;;  %v659_v58 = vrot.slane %v7770_v6, 4 }
 0x15e   : > { %v1809_v47 = vld [vmem:[#allocation2 + $0x98] sm:$0x1]  ;;  %v6468_v27 = vor.u32 %v7034_v62, %v6465_v26  ;;  %v4960_v57 = vpop.f32.mrf.mxu1  ;;  %1427 = vst [vmem:[#allocation3 + $0x364] sm:$0xf] %v1288_v59  ;;  %v8237_v56 = vadd.f32 %v5222_v4, %v8211_v44  ;;  %5387 = vmatpush.bf16.msra.mxu2 %v7128_v31  ;;  %v1811_v36 = vld [vmem:[#allocation2 + $0xa0] sm:$0xf] }
 0x15f   : > { %v974_v37 = vld [vmem:[#allocation2 + $0x98] sm:$0x1]  ;;  %v2106_v19 = vshll.u32 %v1809_v47, 16  ;;  %5088 = vmatmul.bf16.gmra.mxu2 %v6472_v12  ;;  %v4961_v62 = vadd.f32 %v4960_v57, %v8122_v29  ;;  %5177 = vmatmul.bf16.gmra.mxu3 %v6476_v24  ;;  %v2111_v44 = vshrl.u32 %v1810_v39, 16  ;;  %v2114_v12 = vshll.u32 %v1810_v39, 16  ;;  %v7144_v31 = vld [vmem:[#allocation7 + $0x208] sm:$0xff] }
 0x160   : > { %v1295_v45 = vshll.u32 %v974_v37, 16  ;;  %v1473_v3 = vld [vmem:[#allocation2 + $0x98] sm:$0x1]  ;;  %5261 = vmatmul.bf16.gmra.mxu0 %v6444_v1  ;;  %v2120_v24 = vshll.u32 %v1811_v36, 16  ;;  %v2124_v30 = vshrl.u32 %v1811_v36, 16 }
 0x161   : > { %v1623_v52 = vrot.slane %v1473_v3, 5  ;;  %v2108_v21 = vrot.slane %v2106_v19, 5  ;;  %4999 = vmatmul.bf16.gmra.mxu1 %v6468_v27  ;;  %v2113_v37 = vrot.slane %v2111_v44, 4  ;;  %v2116_v14 = vrot.slane %v2114_v12, 5  ;;  %v975_v1 = vld [vmem:[#allocation2 + $0x9c] sm:$0xf]  ;;  %5565 = vmatpush.bf16.msra.mxu0 %v7144_v31 }
 0x162   : > { %v1297_v61 = vrot.slane %v1295_v45, 5  ;;  %v5049_v29 = vpop.f32.mrf.mxu2  ;;  %v5138_v16 = vpop.f32.mrf.mxu3  ;;  %392 = vst [vmem:[#allocation2 + $0xa4] sm:$0xf] %v391_v10  ;;  %v976_v45 = vld [vmem:[#allocation2 + $0xa0] sm:$0xf]  ;;  %v1300_v3 = vshrl.u32 %v975_v1, 16 }
 0x163   : > { %v1624_v60 = vsel %vm7883_vm12, %v1622_v48, %v1623_v52  ;;  %v2109_v13 = vsel %vm7889_vm13, %v2104_v32, %v2108_v21  ;;  %v5050_v47 = vadd.f32 %v5049_v29, %v4961_v62  ;;  %v7136_v32 = vld [vmem:[#allocation7 + $0x1c8] sm:$0xff]  ;;  %v1303_v4 = vshll.u32 %v975_v1, 16  ;;  %v6509_v44 = vld [vmem:[#allocation3 + $0x38c] sm:$0xf0]  ;;  %v1474_v12 = vld [vmem:[#allocation2 + $0x9c] sm:$0xe] }
 0x164   : > { %v1298_v26 = vsel %vm7889_vm13, %v1293_v50, %v1297_v61  ;;  %1703 = vst [vmem:[#allocation3 + $0x38c] sm:$0xf] %v1624_v60  ;;  %v7120_v48 = vld [vmem:[#allocation7 + $0x148] sm:$0xff]  ;;  %v2117_v50 = vor.u32 %v2116_v14, %v2113_v37  ;;  %v2122_v59 = vrot.slane %v2120_v24, 5  ;;  %v2126_v52 = vrot.slane %v2124_v30, 4  ;;  %5476 = vmatpush.bf16.msra.mxu3 %v7136_v32 }
 0x165   : > { %2261 = vst [vmem:[#allocation3 + $0x34c] sm:$0xf] %v2109_v13  ;;  %v8247_v19 = vadd.f32 %v5138_v16, %v5050_v47  ;;  %v5224_v27 = vpop.f32.mrf.mxu0  ;;  %5298 = vmatpush.bf16.msra.mxu1 %v7120_v48  ;;  %v1309_v54 = vshll.u32 %v976_v45, 16  ;;  %v1313_v57 = vshrl.u32 %v976_v45, 16  ;;  %v6507_v61 = vld [vmem:[#allocation3 + $0x368] sm:$0xf] }
 0x166   : > { %1428 = vst [vmem:[#allocation3 + $0x388] sm:$0xf] %v1298_v26  ;;  %v4962_v21 = vpop.f32.mrf.mxu1  ;;  %v7044_v6 = vld [vmem:[#allocation3 + $0x36c] sm:$0xf]  ;;  %v2118_v10 = vrot.slane %v2117_v50, 4  ;;  %v1302_v62 = vrot.slane %v1300_v3, 4  ;;  %v8250_v39 = vadd.f32 %v5224_v27, %v8230_v46  ;;  %v2127_v46 = vor.u32 %v2126_v52, %v2122_v59 }
 0x167   : > { %v1305_v60 = vrot.slane %v1303_v4, 5  ;;  %v6479_v36 = vld [vmem:[#allocation3 + $0x328] sm:$0xf]  ;;  %v4963_v13 = vadd.f32 %v4962_v21, %v8140_v33  ;;  %v7043_v24 = vld [vmem:[#allocation3 + $0x364] sm:$0xf]  ;;  %v1311_v16 = vrot.slane %v1309_v54, 5 }
 0x168   : > { %8857 = vst [vmem:[#allocation25_spill] sm:$0xff] %v8250_v39  ;;  %v2123_v30 = vsel %vm7889_vm13, %v2118_v10, %v2122_v59  ;;  %v1315_v37 = vrot.slane %v1313_v57, 4  ;;  %v1475_v14 = vld [vmem:[#allocation2 + $0xa0] sm:$0xf]  ;;  %v6030_v48 = vrot.slane %v1474_v12, 9  ;;  %v676_v21 = vrot.slane %v7819_v11, 4 }
 0x169   : > { %v1306_v47 = vor.u32 %v1305_v60, %v1302_v62  ;;  %2262 = vst [vmem:[#allocation3 + $0x370] sm:$0xf] %v2123_v30  ;;  %v1627_v50 = vrot.slane %v1475_v14, 5  ;;  %v848_v4 = vld [vmem:[#allocation2 + $0xa4] sm:$0x1]  ;;  %v6512_v39 = vor.u32 %v7044_v6, %v6509_v44 }
 0x16a   : > { %v5051_v1 = vpop.f32.mrf.mxu2  ;;  %v5140_v45 = vpop.f32.mrf.mxu3  ;;  %v1736_v31 = vld [vmem:[#allocation2 + $0xa8] sm:$0xf]  ;;  %v849_v54 = vsel %vm7682_vm2, %v659_v58, %v848_v4  ;;  %v1737_v10 = vld [vmem:[#allocation2 + $0xac] sm:$0xf]  ;;  %v393_v62 = vld [vmem:[#allocation2 + $0xb0] sm:$0xf]  ;;  %v1316_v6 = vor.u32 %v1315_v37, %v1311_v16 }
 0x16b   : > { %v7048_v26 = vld [vmem:[#allocation3 + $0x388] sm:$0xf0]  ;;  %v5052_v33 = vadd.f32 %v5051_v1, %v4963_v13  ;;  %v1307_v27 = vrot.slane %v1306_v47, 4  ;;  %v1628_v57 = vsel %vm7883_vm12, %v6030_v48, %v1627_v50  ;;  %1768 = vst [vmem:[#allocation3 + $0x3b4] sm:$0xf] %v1736_v31  ;;  %v394_v58 = vsel %vm7710_vm7, 0, %v393_v62 }
 0x16c   : > { %v7040_v29 = vld [vmem:[#allocation3 + $0x348] sm:$0xf0]  ;;  %v6508_v3 = vor.u32 %v7048_v26, %v6507_v61  ;;  %850 = vst [vmem:[#allocation2 + $0xa4] sm:$0x1] %v849_v54  ;;  %v8264_v26 = vrot.slane %v2127_v46, 4  ;;  %v1629_v37 = vrot.slane %v1627_v50, 4 }
 0x16d   : > { %v6501_v32 = vld [vmem:[#allocation3 + $0x384] sm:$0xf0]  ;;  %v6480_v59 = vor.u32 %v7040_v29, %v6479_v36  ;;  %v8260_v52 = vadd.f32 %v5140_v45, %v5052_v33  ;;  %v1312_v61 = vsel %vm7889_vm13, %v1307_v27, %v1311_v16  ;;  %v5227_v60 = vpop.f32.mrf.mxu0  ;;  %v1813_v44 = vld [vmem:[#allocation2 + $0xa8] sm:$0xf]  ;;  %1704 = vst [vmem:[#allocation3 + $0x3b0] sm:$0xf] %v1628_v57 }
 0x16e   : > { %v6504_v13 = vor.u32 %v7043_v24, %v6501_v32  ;;  %1429 = vst [vmem:[#allocation3 + $0x3ac] sm:$0xf] %v1312_v61  ;;  %v4965_v12 = vpop.f32.mrf.mxu1  ;;  %v1814_v36 = vld [vmem:[#allocation2 + $0xac] sm:$0xf]  ;;  %v2135_v29 = vshrl.u32 %v1813_v44, 16  ;;  %v2138_v30 = vshll.u32 %v1813_v44, 16  ;;  %v8269_v47 = vadd.f32 %v5227_v60, %v8247_v19 }
 0x16f   : > { %5093 = vmatmul.bf16.gmra.mxu2 %v6508_v3  ;;  %5182 = vmatmul.bf16.gmra.mxu3 %v6512_v39  ;;  %1769 = vst [vmem:[#allocation3 + $0x3d8] sm:$0xf] %v1737_v10  ;;  %v2144_v24 = vshll.u32 %v1814_v36, 16  ;;  %v2148_v14 = vshrl.u32 %v1814_v36, 16  ;;  %v978_v1 = vld [vmem:[#allocation2 + $0xa8] sm:$0xf]  ;;  %v4966_v16 = vadd.f32 %v4965_v12, %v7966_v22 }
 0x170   : > { %5266 = vmatmul.bf16.gmra.mxu0 %v6480_v59  ;;  %395 = vst [vmem:[#allocation2 + $0xb0] sm:$0xf] %v394_v58  ;;  %v2137_v32 = vrot.slane %v2135_v29, 4  ;;  %v2140_v46 = vrot.slane %v2138_v30, 5  ;;  %v1317_v33 = vrot.slane %v1316_v6, 4  ;;  %v1324_v19 = vshrl.u32 %v978_v1, 16 }
 0x171   : > { %5004 = vmatmul.bf16.gmra.mxu1 %v6504_v13  ;;  %v8272_v45 = vrot.slane %v2144_v24, 5  ;;  %v979_v3 = vld [vmem:[#allocation2 + $0xac] sm:$0xf]  ;;  %v1327_v4 = vshll.u32 %v978_v1, 16  ;;  %v8274_v54 = vrot.slane %v2148_v14, 4 }
 0x172   : > { %v5054_v48 = vpop.f32.mrf.mxu2  ;;  %v5143_v27 = vpop.f32.mrf.mxu3  ;;  %v2141_v31 = vor.u32 %v2140_v46, %v2137_v32  ;;  %v1333_v57 = vshll.u32 %v979_v3, 16  ;;  %v1326_v58 = vrot.slane %v1324_v19, 4  ;;  %v1337_v12 = vshrl.u32 %v979_v3, 16  ;;  %v7053_v14 = vld [vmem:[#allocation3 + $0x3b4] sm:$0xf] }
 0x173   : > { %v5055_v39 = vadd.f32 %v5054_v48, %v4966_v16  ;;  %v1812_v59 = vld [vmem:[#allocation2 + $0xa4] sm:$0x1]  ;;  %v1329_v44 = vrot.slane %v1327_v4, 5  ;;  %v8282_v16 = vld [vmem:[#allocation2 + $0xac] sm:$0xf] }
 0x174   : > { %v977_v22 = vld [vmem:[#allocation2 + $0xa4] sm:$0x1]  ;;  %v2130_v61 = vshll.u32 %v1812_v59, 16  ;;  %v2142_v6 = vrot.slane %v2141_v31, 4  ;;  %v8280_v1 = vrot.slane %v1333_v57, 5  ;;  %v282_v31 = vld [vmem:[%s7671_s6 + $0xf0] sm:$0xff] }
 0x175   : > { %v1476_v50 = vld [vmem:[#allocation2 + $0xa4] sm:$0x1]  ;;  %v8276_v10 = vadd.f32 %v5143_v27, %v5055_v39  ;;  %v1319_v62 = vshll.u32 %v977_v22, 16  ;;  %v5229_v13 = vpop.f32.mrf.mxu0  ;;  %v1330_v48 = vor.u32 %v1329_v44, %v1326_v58  ;;  %v1477_v3 = vld [vmem:[#allocation2 + $0xa8] sm:$0xe]  ;;  %v1339_v22 = vrot.slane %v1337_v12, 4 }
 0x176   : > { %v1630_v60 = vrot.slane %v1476_v50, 5  ;;  %v2132_v36 = vrot.slane %v2130_v61, 5  ;;  %v4967_v29 = vpop.f32.mrf.mxu1  ;;  %v2147_v46 = vsel %vm7889_vm13, %v2142_v6, %v8272_v45  ;;  %v6545_v39 = vld [vmem:[#allocation3 + $0x3d4] sm:$0xf0]  ;;  %v6031_v50 = vrot.slane %v1477_v3, 9 }
 0x177   : > { %v1321_v30 = vrot.slane %v1319_v62, 5  ;;  %v855_v32 = vld [vmem:[#allocation2 + $0xb0] sm:$0x1]  ;;  %v4968_v4 = vadd.f32 %v4967_v29, %v7979_v20  ;;  %2264 = vst [vmem:[#allocation3 + $0x3b8] sm:$0xf] %v2147_v46  ;;  %v1331_v59 = vrot.slane %v1330_v48, 4  ;;  %v6548_v6 = vor.u32 %v7053_v14, %v6545_v39 }
 0x178   : > { %v1631_v24 = vsel %vm7883_vm12, %v1629_v37, %v1630_v60  ;;  %v2133_v19 = vsel %vm7889_vm13, %v8264_v26, %v2132_v36  ;;  %v856_v27 = vsel %vm7682_vm2, %v676_v21, %v855_v32  ;;  %v1634_v26 = vrot.slane %v8282_v16, 5  ;;  %v6543_v62 = vld [vmem:[#allocation3 + $0x3b0] sm:$0xf]  ;;  %v1738_v11 = vld [vmem:[#allocation2 + $0xb4] sm:$0xf]  ;;  %v7127_v32 = vld [vmem:[#allocation7 + $0x180] sm:$0xff] }
 0x179   : > { %1705 = vst [vmem:[#allocation3 + $0x3d4] sm:$0xf] %v1631_v24  ;;  %v1322_v37 = vsel %vm7889_vm13, %v1317_v33, %v1321_v30  ;;  %v2151_v33 = vor.u32 %v8274_v54, %v8272_v45  ;;  %v396_v60 = vld [vmem:[#allocation2 + $0xbc] sm:$0xf]  ;;  %v8302_v21 = vadd.f32 %v5229_v13, %v8260_v52  ;;  %v1336_v58 = vsel %vm7889_vm13, %v1331_v59, %v8280_v1  ;;  %v1739_v12 = vld [vmem:[#allocation2 + $0xb8] sm:$0xf] }
 0x17a   : > { %2263 = vst [vmem:[#allocation3 + $0x394] sm:$0xf] %v2133_v19  ;;  %v5056_v57 = vpop.f32.mrf.mxu2  ;;  %v5145_v20 = vpop.f32.mrf.mxu3  ;;  %v1635_v44 = vsel %vm7883_vm12, %v6031_v50, %v1634_v26  ;;  %v1816_v36 = vld [vmem:[#allocation2 + $0xb4] sm:$0xf]  ;;  %v8309_v29 = vpack.c.bf16 %v282_v31, %v282_v31  ;;  %v6515_v30 = vld [vmem:[#allocation3 + $0x370] sm:$0xf]  ;;  %v1340_v16 = vor.u32 %v1339_v22, %v8280_v1  ;;  %5388 = vmatpush.bf16.msra.mxu2 %v7127_v32 }
 0x17b   : > { %v5057_v61 = vadd.f32 %v5056_v57, %v4968_v4  ;;  %1430 = vst [vmem:[#allocation3 + $0x3d0] sm:$0xf] %v1322_v37  ;;  %v397_v52 = vsel %vm7710_vm7, 0, %v396_v60  ;;  %v1817_v54 = vld [vmem:[#allocation2 + $0xb8] sm:$0xf]  ;;  %v2159_v13 = vshrl.u32 %v1816_v36, 16 }
 0x17c   : > { %857 = vst [vmem:[#allocation2 + $0xb0] sm:$0x1] %v856_v27  ;;  %v7052_v14 = vld [vmem:[#allocation3 + $0x3ac] sm:$0xf]  ;;  %v2162_v46 = vshll.u32 %v1816_v36, 16  ;;  %v2168_v48 = vshll.u32 %v1817_v54, 16 }
 0x17d   : > { %v8311_v45 = vadd.f32 %v5145_v20, %v5057_v61  ;;  %1431 = vst [vmem:[#allocation3 + $0x3f4] sm:$0xf] %v1336_v58  ;;  %v5232_v24 = vpop.f32.mrf.mxu0  ;;  %v2172_v3 = vshrl.u32 %v1817_v54, 16  ;;  %v693_v19 = vrot.slane %v7863_v9, 4  ;;  %v2161_v39 = vrot.slane %v2159_v13, 4 }
 0x17e   : > { %1706 = vst [vmem:[#allocation3 + $0x3f8] sm:$0xf] %v1635_v44  ;;  %v4970_v4 = vpop.f32.mrf.mxu1  ;;  %v8318_v27 = vadd.f32 %v5232_v24, %v8276_v10  ;;  %v2152_v57 = vrot.slane %v2151_v33, 4  ;;  %v2164_v1 = vrot.slane %v2162_v46, 5  ;;  %v695_v59 = vshrl.u32 %v8309_v29, 16 }
 0x17f   : > { %1770 = vst [vmem:[#allocation3 + $0x3fc] sm:$0xf] %v1738_v11  ;;  %5187 = vmatmul.bf16.gmra.mxu3 %v6548_v6  ;;  %v4971_v50 = vadd.f32 %v4970_v4, %v8000_v15  ;;  %v2170_v61 = vrot.slane %v2168_v48, 5  ;;  %v2174_v20 = vrot.slane %v2172_v3, 4  ;;  %v1341_v10 = vrot.slane %v1340_v16, 4  ;;  %v7135_v16 = vld [vmem:[#allocation7 + $0x1c0] sm:$0xff] }
 0x180   : > { %v7057_v37 = vld [vmem:[#allocation3 + $0x3d0] sm:$0xf0]  ;;  %1771 = vst [vmem:[#allocation3 + $0x420] sm:$0xf] %v1739_v12  ;;  %v2165_v6 = vor.u32 %v2164_v1, %v2161_v39  ;;  %v981_v33 = vld [vmem:[#allocation2 + $0xb4] sm:$0xf]  ;;  %5477 = vmatpush.bf16.msra.mxu3 %v7135_v16 }
 0x181   : > { %v6544_v31 = vor.u32 %v7057_v37, %v6543_v62  ;;  %v7049_v22 = vld [vmem:[#allocation3 + $0x390] sm:$0xf0]  ;;  %398 = vst [vmem:[#allocation2 + $0xbc] sm:$0xf] %v397_v52  ;;  %v1636_v62 = vrot.slane %v1634_v26, 4  ;;  %v2175_v3 = vor.u32 %v2174_v20, %v2170_v61  ;;  %v7119_v26 = vld [vmem:[#allocation7 + $0x140] sm:$0xff] }
 0x182   : > { %v6516_v60 = vor.u32 %v7049_v22, %v6515_v30  ;;  %v6537_v11 = vld [vmem:[#allocation3 + $0x3cc] sm:$0xf0]  ;;  %v5059_v58 = vpop.f32.mrf.mxu2  ;;  %v5148_v54 = vpop.f32.mrf.mxu3  ;;  %v2166_v46 = vrot.slane %v2165_v6, 4  ;;  %v283_v30 = vld [vmem:[%s7671_s6 + $0xf8] sm:$0xff]  ;;  %v982_v4 = vld [vmem:[#allocation2 + $0xb8] sm:$0xf]  ;;  %5299 = vmatpush.bf16.msra.mxu1 %v7119_v26 }
 0x183   : > { %5098 = vmatmul.bf16.gmra.mxu2 %v6544_v31  ;;  %v6540_v44 = vor.u32 %v7052_v14, %v6537_v11  ;;  %v1815_v12 = vld [vmem:[#allocation2 + $0xb0] sm:$0x1]  ;;  %v5060_v36 = vadd.f32 %v5059_v58, %v4971_v50  ;;  %v1348_v37 = vshrl.u32 %v981_v33, 16  ;;  %v8325_v14 = vrot.slane %v695_v59, 7  ;;  %v7143_v11 = vld [vmem:[#allocation7 + $0x200] sm:$0xff] }
 0x184   : > { %v980_v13 = vld [vmem:[#allocation2 + $0xb0] sm:$0x1]  ;;  %5271 = vmatmul.bf16.gmra.mxu0 %v6516_v60  ;;  %v2154_v15 = vshll.u32 %v1815_v12, 16  ;;  %v2171_v60 = vsel %vm7889_vm13, %v2166_v46, %v2170_v61  ;;  %v1351_v59 = vshll.u32 %v981_v33, 16 }
 0x185   : > { %v1479_v24 = vld [vmem:[#allocation2 + $0xb0] sm:$0x1]  ;;  %v1343_v52 = vshll.u32 %v980_v13, 16  ;;  %5009 = vmatmul.bf16.gmra.mxu1 %v6540_v44  ;;  %v8323_v48 = vadd.f32 %v5148_v54, %v5060_v36  ;;  %v5234_v39 = vpop.f32.mrf.mxu0  ;;  %v1350_v6 = vrot.slane %v1348_v37, 4  ;;  %2266 = vst [vmem:[#allocation3 + $0x400] sm:$0xf] %v2171_v60  ;;  %v436_v13 = vpack.c.bf16 %v283_v30, %v283_v30  ;;  %5566 = vmatpush.bf16.msra.mxu0 %v7143_v11 }
 0x186   : > { %v1637_v32 = vrot.slane %v1479_v24, 5  ;;  %v2156_v31 = vrot.slane %v2154_v15, 5  ;;  %v8329_v50 = vld [vmem:[#allocation3 + $0x3fc] sm:$0xf]  ;;  %v4972_v58 = vpop.f32.mrf.mxu1  ;;  %v8334_v44 = vadd.f32 %v5234_v39, %v8311_v45  ;;  %v1353_v45 = vrot.slane %v1351_v59, 5 }
 0x187   : > { %v1345_v1 = vrot.slane %v1343_v52, 5  ;;  %v6581_v20 = vld [vmem:[#allocation3 + $0x41c] sm:$0xf0]  ;;  %v1480_v54 = vld [vmem:[#allocation2 + $0xb4] sm:$0xe]  ;;  %v1357_v24 = vshll.u32 %v982_v4, 16 }
 0x188   : > { %v1638_v22 = vsel %vm7883_vm12, %v1636_v62, %v1637_v32  ;;  %v2157_v12 = vsel %vm7889_vm13, %v2152_v57, %v2156_v31  ;;  %v4973_v62 = vadd.f32 %v4972_v58, %v8015_v25  ;;  %v862_v61 = vld [vmem:[#allocation2 + $0xbc] sm:$0x1]  ;;  %v1361_v15 = vshrl.u32 %v982_v4, 16  ;;  %v6579_v25 = vld [vmem:[#allocation3 + $0x3f8] sm:$0xf] }
 0x189   : > { %1707 = vst [vmem:[#allocation3 + $0x41c] sm:$0xf] %v1638_v22  ;;  %v1346_v36 = vsel %vm7889_vm13, %v1341_v10, %v1345_v1  ;;  %v863_v33 = vsel %vm7682_vm2, %v693_v19, %v862_v61  ;;  %v6584_v52 = vor.u32 %v8329_v50, %v6581_v20  ;;  %v8346_v10 = vrot.slane %v2175_v3, 4  ;;  %v1481_v32 = vld [vmem:[#allocation2 + $0xb8] sm:$0xf] }
 0x18a   : > { %2265 = vst [vmem:[#allocation3 + $0x3dc] sm:$0xf] %v2157_v12  ;;  %v5061_v57 = vpop.f32.mrf.mxu2  ;;  %v6032_v46 = vrot.slane %v1480_v54, 9  ;;  %v5150_v16 = vpop.f32.mrf.mxu3  ;;  %v1354_v9 = vor.u32 %v1353_v45, %v1350_v6  ;;  %v1359_v26 = vrot.slane %v1357_v24, 5  ;;  %v1363_v37 = vrot.slane %v1361_v15, 4 }
 0x18b   : > { %1432 = vst [vmem:[#allocation3 + $0x418] sm:$0xf] %v1346_v36  ;;  %v5062_v30 = vadd.f32 %v5061_v57, %v4973_v62  ;;  %v342_v19 = vld [vmem:[#allocation2 + $0xc0] sm:$0x1]  ;;  %v1641_v39 = vrot.slane %v1481_v32, 5  ;;  %v698_v31 = vshll.u32 %v8309_v29, 16 }
 0x18c   : > { %864 = vst [vmem:[#allocation2 + $0xbc] sm:$0x1] %v863_v33  ;;  %v343_v4 = vsel %vm7682_vm2, 0, %v342_v19  ;;  %v701_v1 = vrot.slane %v8325_v14, 4  ;;  %v399_v22 = vld [vmem:[#allocation2 + $0xc8] sm:$0xf]  ;;  %v1364_v11 = vor.u32 %v1363_v37, %v1359_v26 }
 0x18d   : > { %v6551_v3 = vld [vmem:[#allocation3 + $0x3b8] sm:$0xf]  ;;  %v8352_v50 = vadd.f32 %v5150_v16, %v5062_v30  ;;  %v1355_v60 = vrot.slane %v1354_v9, 4  ;;  %344 = vst [vmem:[#allocation2 + $0xc0] sm:$0x1] %v343_v4  ;;  %v703_v58 = vshrl.u32 %v436_v13, 16  ;;  %v5237_v20 = vpop.f32.mrf.mxu0  ;;  %v1642_v59 = vsel %vm7883_vm12, %v6032_v46, %v1641_v39 }
 0x18e   : > { %v1643_v12 = vrot.slane %v1641_v39, 4  ;;  %v706_v62 = vshll.u32 %v436_v13, 16  ;;  %v400_v29 = vsel %vm7710_vm7, 0, %v399_v22  ;;  %v4975_v36 = vpop.f32.mrf.mxu1  ;;  %v7061_v61 = vld [vmem:[#allocation3 + $0x3f4] sm:$0xf]  ;;  %v1365_v45 = vrot.slane %v1364_v11, 4 }
 0x18f   : > { %v1360_v33 = vsel %vm7889_vm13, %v1355_v60, %v1359_v26  ;;  %1708 = vst [vmem:[#allocation3 + $0x440] sm:$0xf] %v1642_v59  ;;  %v705_v24 = vrot.slane %v703_v58, 7  ;;  %v4976_v57 = vadd.f32 %v4975_v36, %v8033_v55  ;;  %5192 = vmatmul.bf16.gmra.mxu3 %v6584_v52  ;;  %v2607_v32 = vld [vmem:[#allocation2 + $0x18] sm:$0xf]  ;;  %v8362_v13 = vadd.f32 %v5237_v20, %v8323_v48 }
 0x190   : > { %v7066_v6 = vld [vmem:[#allocation3 + $0x418] sm:$0xf0]  ;;  %1433 = vst [vmem:[#allocation3 + $0x43c] sm:$0xf] %v1360_v33  ;;  %v700_v55 = vor.u32 %v698_v31, %v8325_v14  ;;  %v2271_v58 = vld [vmem:[#allocation2 + $0x10] sm:$0xf] }
 0x191   : > { %v6580_v54 = vor.u32 %v7066_v6, %v6579_v25  ;;  %v7058_v15 = vld [vmem:[#allocation3 + $0x3d8] sm:$0xf0]  ;;  %v708_v16 = vor.u32 %v706_v62, %v705_v24  ;;  %v710_v9 = vrot.slane %v705_v24, 4  ;;  %401 = vst [vmem:[#allocation2 + $0xc8] sm:$0xf] %v400_v29  ;;  %v2656_v25 = vshrl.u32 %v2607_v32, 16 }
 0x192   : > { %v6552_v46 = vor.u32 %v7058_v15, %v6551_v3  ;;  %v6573_v30 = vld [vmem:[#allocation3 + $0x414] sm:$0xf0]  ;;  %v5064_v19 = vpop.f32.mrf.mxu2  ;;  %v5153_v60 = vpop.f32.mrf.mxu3  ;;  %v2270_v6 = vld [vmem:[#allocation2 + $0xc] sm:$0xe]  ;;  %v2272_v59 = vld [vmem:[#allocation2 + $0x14] sm:$0x1] }
 0x193   : > { %v6576_v37 = vor.u32 %v7061_v61, %v6573_v30  ;;  %5103 = vmatmul.bf16.gmra.mxu2 %v6580_v54  ;;  %v1818_v26 = vld [vmem:[#allocation2 + $0xbc] sm:$0x1]  ;;  %v5065_v22 = vadd.f32 %v5064_v19, %v4976_v57  ;;  %v709_v3 = vsel %vm7702_vm6, %v701_v1, %v708_v16  ;;  %v6033_v54 = vrot.slane %v2270_v6, 9  ;;  %v2543_v19 = vld [vmem:[#allocation2 + $0x18] sm:$0xf] }
 0x194   : > { %v983_v39 = vld [vmem:[#allocation2 + $0xbc] sm:$0x1]  ;;  %v2178_v52 = vshll.u32 %v1818_v26, 16  ;;  %5276 = vmatmul.bf16.gmra.mxu0 %v6552_v46  ;;  %v865_v20 = vld [vmem:[#allocation2 + $0xc0] sm:$0xf]  ;;  %v2368_v33 = vrot.slane %v2271_v58, 5 }
 0x195   : > { %v1482_v4 = vld [vmem:[#allocation2 + $0xbc] sm:$0x1]  ;;  %v1367_v11 = vshll.u32 %v983_v39, 16  ;;  %5014 = vmatmul.bf16.gmra.mxu1 %v6576_v37  ;;  %v5154_v29 = vadd.f32 %v5153_v60, %v5065_v22  ;;  %868 = vst [vmem:[#allocation2 + $0xc4] sm:$0xf] %v709_v3  ;;  %v5239_v31 = vpop.f32.mrf.mxu0  ;;  %v866_v61 = vsel %vm7710_vm7, %v700_v55, %v865_v20  ;;  %v2371_v15 = vrot.slane %v2272_v59, 5 }
 0x196   : > { %v1644_v48 = vrot.slane %v1482_v4, 5  ;;  %v2180_v62 = vrot.slane %v2178_v52, 5  ;;  %v4977_v1 = vpop.f32.mrf.mxu1  ;;  %867 = vst [vmem:[#allocation2 + $0xc0] sm:$0xf] %v866_v61  ;;  %v8376_v57 = vld [vmem:[#allocation2 + $0x1c] sm:$0xf]  ;;  %v2369_v46 = vsel %vm7883_vm12, %v6033_v54, %v2368_v33  ;;  %v8384_v39 = vadd.f32 %v5239_v31, %v8352_v50 }
 0x197   : > { %v1369_v36 = vrot.slane %v1367_v11, 5  ;;  %v2370_v30 = vrot.slane %v2368_v33, 4  ;;  %v2659_v16 = vshll.u32 %v2607_v32, 16  ;;  %v4978_v37 = vadd.f32 %v4977_v1, %v8054_v51  ;;  %v6615_v26 = vld [vmem:[#allocation3 + $0x440] sm:$0xf] }
 0x198   : > { %v1645_v14 = vsel %vm7883_vm12, %v1643_v12, %v1644_v48  ;;  %v2181_v35 = vsel %vm7889_vm13, %v8346_v10, %v2180_v62  ;;  %v869_v12 = vld [vmem:[#allocation2 + $0xc8] sm:$0x1]  ;;  %v2609_v52 = vld [vmem:[#allocation2 + $0x20] sm:$0x1]  ;;  %v6587_v32 = vld [vmem:[#allocation3 + $0x400] sm:$0xf] }
 0x199   : > { %1709 = vst [vmem:[#allocation3 + $0x464] sm:$0xf] %v1645_v14  ;;  %v1370_v24 = vsel %vm7889_vm13, %v1365_v45, %v1369_v36  ;;  %v870_v10 = vsel %vm7682_vm2, %v710_v9, %v869_v12  ;;  %v2658_v45 = vrot.slane %v2656_v25, 4  ;;  %v2372_v55 = vsel %vm7883_vm12, %v2370_v30, %v2371_v15  ;;  %v2544_v11 = vld [vmem:[#allocation2 + $0x1c] sm:$0xf] }
 0x19a   : > { %2267 = vst [vmem:[#allocation3 + $0x424] sm:$0xf] %v2181_v35  ;;  %v5066_v4 = vpop.f32.mrf.mxu2  ;;  %v2661_v22 = vrot.slane %v2659_v16, 5  ;;  %v5155_v51 = vpop.f32.mrf.mxu3  ;;  %v2665_v48 = vshll.u32 %v8376_v57, 16  ;;  %v2669_v9 = vshrl.u32 %v8376_v57, 16  ;;  %v2675_v25 = vshll.u32 %v2609_v52, 16 }
 0x19b   : > { %1434 = vst [vmem:[#allocation3 + $0x460] sm:$0xf] %v1370_v24  ;;  %v5067_v60 = vadd.f32 %v5066_v4, %v4978_v37  ;;  %v7070_v58 = vld [vmem:[#allocation3 + $0x43c] sm:$0xf]  ;;  %v3103_v33 = vld [vmem:[#allocation2 + $0x18] sm:$0xe] }
 0x19c   : > { %871 = vst [vmem:[#allocation2 + $0xc8] sm:$0x1] %v870_v10  ;;  %v1741_v50 = vld [vmem:[#allocation2 + $0xc4] sm:$0xf]  ;;  %v2662_v36 = vor.u32 %v2661_v22, %v2658_v45 }
 0x19d   : > { %2510 = vst [vmem:[#allocation3 + $0x14] sm:$0xf] %v2369_v46  ;;  %v1820_v3 = vld [vmem:[#allocation2 + $0xc4] sm:$0xf]  ;;  %v8390_v20 = vadd.f32 %v5155_v51, %v5067_v60  ;;  %v5242_v14 = vpop.f32.mrf.mxu0  ;;  %v1740_v61 = vld [vmem:[#allocation2 + $0xc0] sm:$0xf] }
 0x19e   : > { %2511 = vst [vmem:[#allocation3 + $0x38] sm:$0xf] %v2372_v55  ;;  %v2192_v59 = vshll.u32 %v1820_v3, 16  ;;  %v2196_v62 = vshrl.u32 %v1820_v3, 16  ;;  %v1819_v54 = vld [vmem:[#allocation2 + $0xc0] sm:$0xf]  ;;  %v4980_v1 = vpop.f32.mrf.mxu1  ;;  %v8392_v57 = vadd.f32 %v5242_v14, %v5154_v29 }
 0x19f   : > { %1773 = vst [vmem:[#allocation3 + $0x468] sm:$0xf] %v1741_v50  ;;  %v2183_v24 = vshrl.u32 %v1819_v54, 16  ;;  %v2186_v15 = vshll.u32 %v1819_v54, 16  ;;  %v4981_v46 = vadd.f32 %v4980_v1, %v8073_v42  ;;  %v2667_v60 = vrot.slane %v2665_v48, 5 }
 0x1a0   : > { %v7075_v6 = vld [vmem:[#allocation3 + $0x460] sm:$0xf0]  ;;  %2575 = vst [vmem:[#allocation3 + $0x18] sm:$0xf] %v2543_v19  ;;  %v2194_v16 = vrot.slane %v2192_v59, 5  ;;  %v2198_v37 = vrot.slane %v2196_v62, 4 }
 0x1a1   : > { %v6616_v31 = vor.u32 %v7075_v6, %v6615_v26  ;;  %v7067_v35 = vld [vmem:[#allocation3 + $0x420] sm:$0xf0]  ;;  %1772 = vst [vmem:[#allocation3 + $0x444] sm:$0xf] %v1740_v61  ;;  %v2185_v45 = vrot.slane %v2183_v24, 4  ;;  %v2188_v4 = vrot.slane %v2186_v15, 5 }
 0x1a2   : > { %v6588_v12 = vor.u32 %v7067_v35, %v6587_v32  ;;  %v6609_v30 = vld [vmem:[#allocation3 + $0x45c] sm:$0xf0]  ;;  %2576 = vst [vmem:[#allocation3 + $0x3c] sm:$0xf] %v2544_v11  ;;  %v2663_v19 = vrot.slane %v2662_v36, 4  ;;  %v2199_v55 = vor.u32 %v2198_v37, %v2194_v16  ;;  %v5069_v22 = vpop.f32.mrf.mxu2  ;;  %v2671_v51 = vrot.slane %v2669_v9, 4  ;;  %v5158_v32 = vpop.f32.mrf.mxu3 }
 0x1a3   : > { %v6612_v10 = vor.u32 %v7070_v58, %v6609_v30  ;;  %v1821_v26 = vld [vmem:[#allocation2 + $0xc8] sm:$0x1]  ;;  %5108 = vmatmul.bf16.gmra.mxu2 %v6616_v31  ;;  %v2189_v29 = vor.u32 %v2188_v4, %v2185_v45  ;;  %v5070_v50 = vadd.f32 %v5069_v22, %v4981_v46  ;;  %v2677_v3 = vrot.slane %v2675_v25, 5  ;;  %v3104_v42 = vld [vmem:[#allocation2 + $0x1c] sm:$0xf] }
 0x1a4   : > { %v2202_v52 = vshll.u32 %v1821_v26, 16  ;;  %v6049_v6 = vrot.slane %v3103_v33, 9  ;;  %5281 = vmatmul.bf16.gmra.mxu0 %v6588_v12  ;;  %v2200_v11 = vrot.slane %v2199_v55, 4  ;;  %v2668_v62 = vsel %vm7889_vm13, %v2663_v19, %v2667_v60  ;;  %v3105_v36 = vld [vmem:[#allocation2 + $0x20] sm:$0x1] }
 0x1a5   : > { %5019 = vmatmul.bf16.gmra.mxu1 %v6612_v10  ;;  %v2190_v14 = vrot.slane %v2189_v29, 4  ;;  %v5159_v31 = vadd.f32 %v5158_v32, %v5070_v50  ;;  %v2672_v61 = vor.u32 %v2671_v51, %v2667_v60  ;;  %3071 = vst [vmem:[#allocation3 + $0x1c] sm:$0xf] %v2668_v62  ;;  %v3201_v48 = vrot.slane %v3104_v42, 5  ;;  %v5244_v9 = vpop.f32.mrf.mxu0  ;;  %v2273_v35 = vld [vmem:[#allocation2 + $0x18] sm:$0xe] }
 0x1a6   : > { %v6617_v59 = vld [vmem:[#allocation3 + $0x464] sm:$0xf0]  ;;  %v2204_v58 = vrot.slane %v2202_v52, 5  ;;  %v3204_v33 = vrot.slane %v3105_v36, 5  ;;  %v4982_v15 = vpop.f32.mrf.mxu1  ;;  %v2274_v37 = vld [vmem:[#allocation2 + $0x1c] sm:$0xf]  ;;  %v8407_v55 = vadd.f32 %v5244_v9, %v8390_v20 }
 0x1a7   : > { %v2195_v24 = vsel %vm7889_vm13, %v2190_v14, %v2194_v16  ;;  %v2673_v12 = vrot.slane %v2672_v61, 4  ;;  %v3202_v46 = vsel %vm7883_vm12, %v6049_v6, %v3201_v48  ;;  %v3203_v30 = vrot.slane %v3201_v48, 4  ;;  %v6091_v45 = vld [vmem:[#allocation3 + $0x18] sm:$0xf]  ;;  %v2275_v19 = vld [vmem:[#allocation2 + $0x20] sm:$0x1] }
 0x1a8   : > { %v7071_v54 = vld [vmem:[#allocation3 + $0x444] sm:$0xf]  ;;  %v2205_v25 = vsel %vm7889_vm13, %v2200_v11, %v2204_v58  ;;  %2268 = vst [vmem:[#allocation3 + $0x448] sm:$0xf] %v2195_v24  ;;  %v6034_v10 = vrot.slane %v2273_v35, 9  ;;  %v4983_v26 = vadd.f32 %v4982_v15, %v8091_v53  ;;  %v2375_v16 = vrot.slane %v2274_v37, 5 }
 0x1a9   : > { %v6620_v1 = vor.u32 %v7071_v54, %v6617_v59  ;;  %2269 = vst [vmem:[#allocation3 + $0x46c] sm:$0xf] %v2205_v25  ;;  %v2678_v4 = vsel %vm7889_vm13, %v2673_v12, %v2677_v3  ;;  %v3205_v22 = vsel %vm7883_vm12, %v3203_v30, %v3204_v33  ;;  %v2378_v60 = vrot.slane %v2275_v19, 5  ;;  %v2545_v51 = vld [vmem:[#allocation2 + $0x24] sm:$0xf] }
 0x1aa   : > { %3343 = vst [vmem:[#allocation3 + $0x20] sm:$0xf] %v3202_v46  ;;  %v5071_v52 = vpop.f32.mrf.mxu2  ;;  %v5160_v50 = vpop.f32.mrf.mxu3  ;;  %v6937_v53 = vld [vmem:[#allocation3 + $0x14] sm:$0xf]  ;;  %v6085_v32 = vld [vmem:[#allocation3 + $0x34] sm:$0xf0]  ;;  %v2376_v3 = vsel %vm7883_vm12, %v6034_v10, %v2375_v16 }
 0x1ab   : > { %5197 = vmatmul.bf16.gmra.mxu3 %v6620_v1  ;;  %3072 = vst [vmem:[#allocation3 + $0x40] sm:$0xf] %v2678_v4  ;;  %v5072_v29 = vadd.f32 %v5071_v52, %v4983_v26  ;;  %v6942_v42 = vld [vmem:[#allocation3 + $0x38] sm:$0xf0]  ;;  %v2377_v6 = vrot.slane %v2375_v16, 4  ;;  %v6088_v12 = vor.u32 %v6937_v53, %v6085_v32 }
 0x1ac   : > { %3344 = vst [vmem:[#allocation3 + $0x44] sm:$0xf] %v3205_v22  ;;  %v2546_v20 = vld [vmem:[#allocation2 + $0x28] sm:$0xf]  ;;  %v2610_v59 = vld [vmem:[#allocation2 + $0x24] sm:$0xf]  ;;  %v6092_v48 = vor.u32 %v6942_v42, %v6091_v45 }
 0x1ad   : > { %2512 = vst [vmem:[#allocation3 + $0x5c] sm:$0xf] %v2376_v3  ;;  %v8413_v11 = vadd.f32 %v5160_v50, %v5072_v29  ;;  %v2379_v58 = vsel %vm7883_vm12, %v2377_v6, %v2378_v60  ;;  %v2611_v62 = vld [vmem:[#allocation2 + $0x28] sm:$0xf]  ;;  %v2612_v36 = vld [vmem:[#allocation2 + $0x2c] sm:$0x1]  ;;  %v5247_v14 = vpop.f32.mrf.mxu0 }
 0x1ae   : > { %2577 = vst [vmem:[#allocation3 + $0x60] sm:$0xf] %v2545_v51  ;;  %v2680_v9 = vshrl.u32 %v2610_v59, 16  ;;  %v2683_v54 = vshll.u32 %v2610_v59, 16  ;;  %v4985_v33 = vpop.f32.mrf.mxu1  ;;  %v2689_v35 = vshll.u32 %v2611_v62, 16  ;;  %v2693_v1 = vshrl.u32 %v2611_v62, 16 }
 0x1af   : > { %2513 = vst [vmem:[#allocation3 + $0x80] sm:$0xf] %v2379_v58  ;;  %v6623_v25 = vld [vmem:[#allocation3 + $0x448] sm:$0xf]  ;;  %v8417_v24 = vadd.f32 %v5247_v14, %v5159_v31  ;;  %v6938_v46 = vld [vmem:[#allocation3 + $0x1c] sm:$0xf]  ;;  %v4986_v26 = vadd.f32 %v4985_v33, %v7977_v40 }
 0x1b0   : > { %v7076_v61 = vld [vmem:[#allocation3 + $0x468] sm:$0xf0]  ;;  %2578 = vst [vmem:[#allocation3 + $0x84] sm:$0xf] %v2546_v20  ;;  %v2682_v30 = vrot.slane %v2680_v9, 4  ;;  %v2685_v37 = vrot.slane %v2683_v54, 5 }
 0x1b1   : > { %v6624_v15 = vor.u32 %v7076_v61, %v6623_v25  ;;  %v3106_v10 = vld [vmem:[#allocation2 + $0x24] sm:$0xe]  ;;  %v2691_v45 = vrot.slane %v2689_v35, 5  ;;  %v2695_v19 = vrot.slane %v2693_v1, 4  ;;  %v2699_v16 = vshll.u32 %v2612_v36, 16 }
 0x1b2   : > { %v6093_v4 = vld [vmem:[#allocation3 + $0x3c] sm:$0xf0]  ;;  %v5074_v52 = vpop.f32.mrf.mxu2  ;;  %v2686_v22 = vor.u32 %v2685_v37, %v2682_v30  ;;  %v3107_v60 = vld [vmem:[#allocation2 + $0x28] sm:$0xf]  ;;  %v3108_v51 = vld [vmem:[#allocation2 + $0x2c] sm:$0x1]  ;;  %v5163_v50 = vpop.f32.mrf.mxu3 }
 0x1b3   : > { %5389 = vmatmul.bf16.vlgmr.msra.gmra.mxu2 %v6092_v48  ;;  %v6050_v29 = vrot.slane %v3106_v10, 9  ;;  %v5075_v31 = vadd.f32 %v5074_v52, %v4986_v26  ;;  %v2696_v42 = vor.u32 %v2695_v19, %v2691_v45  ;;  %v2701_v53 = vrot.slane %v2699_v16, 5  ;;  %v2277_v32 = vld [vmem:[#allocation2 + $0x28] sm:$0xf]  ;;  %v2276_v36 = vld [vmem:[#allocation2 + $0x24] sm:$0xe] }
 0x1b4   : > { %5286 = vmatmul.bf16.gmra.mxu0 %v6624_v15  ;;  %v2687_v3 = vrot.slane %v2686_v22, 4  ;;  %v3208_v6 = vrot.slane %v3107_v60, 5  ;;  %v3211_v20 = vrot.slane %v3108_v51, 5  ;;  %v2382_v40 = vrot.slane %v2277_v32, 5  ;;  %v2278_v54 = vld [vmem:[#allocation2 + $0x2c] sm:$0x1] }
 0x1b5   : > { %5300 = vmatmul.bf16.vlgmr.msra.gmra.mxu1 %v6088_v12  ;;  %v6096_v59 = vor.u32 %v6938_v46, %v6093_v4  ;;  %v5164_v58 = vadd.f32 %v5163_v50, %v5075_v31  ;;  %v2697_v62 = vrot.slane %v2696_v42, 4  ;;  %v5249_v14 = vpop.f32.mrf.mxu0  ;;  %v6035_v35 = vrot.slane %v2276_v36, 9  ;;  %v2547_v46 = vld [vmem:[#allocation2 + $0x30] sm:$0xf]  ;;  %v6127_v10 = vld [vmem:[#allocation3 + $0x60] sm:$0xf] }
 0x1b6   : > { %v2692_v61 = vsel %vm7889_vm13, %v2687_v3, %v2691_v45  ;;  %v3209_v48 = vsel %vm7883_vm12, %v6050_v29, %v3208_v6  ;;  %v3210_v9 = vrot.slane %v3208_v6, 4  ;;  %v4987_v25 = vpop.f32.mrf.mxu1  ;;  %v2384_v1 = vrot.slane %v2382_v40, 4  ;;  %v2548_v45 = vld [vmem:[#allocation2 + $0x34] sm:$0xf]  ;;  %v2613_v19 = vld [vmem:[#allocation2 + $0x30] sm:$0xf] }
 0x1b7   : > { %v2702_v33 = vsel %vm7889_vm13, %v2697_v62, %v2701_v53  ;;  %3073 = vst [vmem:[#allocation3 + $0x64] sm:$0xf] %v2692_v61  ;;  %v2385_v12 = vrot.slane %v2278_v54, 5  ;;  %v8429_v30 = vadd.f32 %v5249_v14, %v8413_v11  ;;  %v4988_v37 = vadd.f32 %v4987_v25, %v7994_v5  ;;  %v6951_v26 = vld [vmem:[#allocation3 + $0x80] sm:$0xf0] }
 0x1b8   : > { %3074 = vst [vmem:[#allocation3 + $0x88] sm:$0xf] %v2702_v33  ;;  %v3212_v15 = vsel %vm7883_vm12, %v3210_v9, %v3211_v20  ;;  %v2383_v4 = vsel %vm7883_vm12, %v6035_v35, %v2382_v40  ;;  %v2614_v16 = vld [vmem:[#allocation2 + $0x34] sm:$0xf]  ;;  %v2615_v60 = vld [vmem:[#allocation2 + $0x38] sm:$0x1] }
 0x1b9   : > { %3345 = vst [vmem:[#allocation3 + $0x68] sm:$0xf] %v3209_v48  ;;  %v2386_v22 = vsel %vm7883_vm12, %v2384_v1, %v2385_v12  ;;  %v2704_v11 = vshrl.u32 %v2613_v19, 16  ;;  %v2707_v51 = vshll.u32 %v2613_v19, 16  ;;  %v6099_v29 = vld [vmem:[#allocation3 + $0x20] sm:$0xf]  ;;  %v6128_v48 = vor.u32 %v6951_v26, %v6127_v10 }
 0x1ba   : > { %v5076_v52 = vpop.f32.mrf.mxu2  ;;  %3346 = vst [vmem:[#allocation3 + $0x8c] sm:$0xf] %v3212_v15  ;;  %v6943_v31 = vld [vmem:[#allocation3 + $0x40] sm:$0xf0]  ;;  %v5165_v50 = vpop.f32.mrf.mxu3  ;;  %v6946_v42 = vld [vmem:[#allocation3 + $0x5c] sm:$0xf] }
 0x1bb   : > { %5478 = vmatmul.bf16.vlgmr.msra.gmra.mxu3 %v6096_v59  ;;  %v5077_v5 = vadd.f32 %v5076_v52, %v4988_v37  ;;  %2514 = vst [vmem:[#allocation3 + $0xa4] sm:$0xf] %v2383_v4  ;;  %v2713_v53 = vshll.u32 %v2614_v16, 16  ;;  %v2717_v32 = vshrl.u32 %v2614_v16, 16  ;;  %v2723_v3 = vshll.u32 %v2615_v60, 16 }
 0x1bc   : > { %2515 = vst [vmem:[#allocation3 + $0xc8] sm:$0xf] %v2386_v22  ;;  %v2706_v6 = vrot.slane %v2704_v11, 4  ;;  %v2709_v20 = vrot.slane %v2707_v51, 5  ;;  %v3109_v40 = vld [vmem:[#allocation2 + $0x30] sm:$0xe]  ;;  %v6100_v4 = vor.u32 %v6943_v31, %v6099_v29 }
 0x1bd   : > { %v5166_v59 = vadd.f32 %v5165_v50, %v5077_v5  ;;  %v6121_v62 = vld [vmem:[#allocation3 + $0x7c] sm:$0xf0]  ;;  %2579 = vst [vmem:[#allocation3 + $0xa8] sm:$0xf] %v2547_v46  ;;  %v2715_v36 = vrot.slane %v2713_v53, 5  ;;  %v2719_v14 = vrot.slane %v2717_v32, 4  ;;  %v5252_v61 = vpop.f32.mrf.mxu0 }
 0x1be   : > { %2580 = vst [vmem:[#allocation3 + $0xcc] sm:$0xf] %v2548_v45  ;;  %v2710_v9 = vor.u32 %v2709_v20, %v2706_v6  ;;  %v2725_v54 = vrot.slane %v2723_v3, 5  ;;  %v3110_v25 = vld [vmem:[#allocation2 + $0x34] sm:$0xf]  ;;  %v4990_v33 = vpop.f32.mrf.mxu1  ;;  %v6051_v15 = vrot.slane %v3109_v40, 9  ;;  %v8436_v37 = vadd.f32 %v5252_v61, %v5164_v58 }
 0x1bf   : > { %v2720_v35 = vor.u32 %v2719_v14, %v2715_v36  ;;  %v3111_v1 = vld [vmem:[#allocation2 + $0x38] sm:$0x1]  ;;  %v3215_v12 = vrot.slane %v3110_v25, 5  ;;  %v6124_v19 = vor.u32 %v6946_v42, %v6121_v62  ;;  %v4991_v46 = vadd.f32 %v4990_v33, %v8013_v0  ;;  %v6947_v22 = vld [vmem:[#allocation3 + $0x64] sm:$0xf] }
 0x1c0   : > { %v2711_v16 = vrot.slane %v2710_v9, 4  ;;  %v3218_v52 = vrot.slane %v3111_v1, 5  ;;  %v6129_v45 = vld [vmem:[#allocation3 + $0x84] sm:$0xf0]  ;;  %v2280_v58 = vld [vmem:[#allocation2 + $0x34] sm:$0xf] }
 0x1c1   : > { %v2721_v60 = vrot.slane %v2720_v35, 4  ;;  %v3216_v10 = vsel %vm7883_vm12, %v6051_v15, %v3215_v12  ;;  %v3217_v26 = vrot.slane %v3215_v12, 4  ;;  %v2389_v50 = vrot.slane %v2280_v58, 5  ;;  %v2279_v42 = vld [vmem:[#allocation2 + $0x30] sm:$0xe] }
 0x1c2   : > { %v5079_v11 = vpop.f32.mrf.mxu2  ;;  %v2716_v51 = vsel %vm7889_vm13, %v2711_v16, %v2715_v36  ;;  %3347 = vst [vmem:[#allocation3 + $0xb0] sm:$0xf] %v3216_v10  ;;  %v5168_v31 = vpop.f32.mrf.mxu3  ;;  %v2616_v53 = vld [vmem:[#allocation2 + $0x3c] sm:$0xf]  ;;  %v6132_v32 = vor.u32 %v6947_v22, %v6129_v45  ;;  %v2281_v6 = vld [vmem:[#allocation2 + $0x38] sm:$0x1] }
 0x1c3   : > { %5394 = vmatmul.bf16.gmra.mxu2 %v6128_v48  ;;  %v5080_v29 = vadd.f32 %v5079_v11, %v4991_v46  ;;  %v2726_v5 = vsel %vm7889_vm13, %v2721_v60, %v2725_v54  ;;  %3075 = vst [vmem:[#allocation3 + $0xac] sm:$0xf] %v2716_v51  ;;  %v3219_v0 = vsel %vm7883_vm12, %v3217_v26, %v3218_v52  ;;  %v2617_v20 = vld [vmem:[#allocation2 + $0x40] sm:$0xf]  ;;  %v6036_v62 = vrot.slane %v2279_v42, 9 }
 0x1c4   : > { %5567 = vmatmul.bf16.vlgmr.msra.gmra.mxu0 %v6100_v4  ;;  %3076 = vst [vmem:[#allocation3 + $0xd0] sm:$0xf] %v2726_v5  ;;  %v2391_v36 = vrot.slane %v2389_v50, 4  ;;  %v2392_v14 = vrot.slane %v2281_v6, 5  ;;  %v2549_v48 = vld [vmem:[#allocation2 + $0x3c] sm:$0xf] }
 0x1c5   : > { %5305 = vmatmul.bf16.gmra.mxu1 %v6124_v19  ;;  %v8447_v3 = vadd.f32 %v5168_v31, %v5080_v29  ;;  %3348 = vst [vmem:[#allocation3 + $0xd4] sm:$0xf] %v3219_v0  ;;  %v5254_v40 = vpop.f32.mrf.mxu0  ;;  %v2618_v9 = vld [vmem:[#allocation2 + $0x44] sm:$0x1]  ;;  %v2728_v54 = vshrl.u32 %v2616_v53, 16  ;;  %v2731_v25 = vshll.u32 %v2616_v53, 16  ;;  %v2390_v1 = vsel %vm7883_vm12, %v6036_v62, %v2389_v50 }
 0x1c6   : > { %v4992_v61 = vpop.f32.mrf.mxu1  ;;  %v8449_v33 = vadd.f32 %v5254_v40, %v5166_v59  ;;  %v6163_v35 = vld [vmem:[#allocation3 + $0xa8] sm:$0xf]  ;;  %v2393_v15 = vsel %vm7883_vm12, %v2391_v36, %v2392_v14  ;;  %2581 = vst [vmem:[#allocation3 + $0xf0] sm:$0xf] %v2549_v48  ;;  %v2737_v4 = vshll.u32 %v2617_v20, 16  ;;  %v2741_v26 = vshrl.u32 %v2617_v20, 16 }
 0x1c7   : > { %v2550_v12 = vld [vmem:[#allocation2 + $0x40] sm:$0xf]  ;;  %v4993_v19 = vadd.f32 %v4992_v61, %v8031_v17  ;;  %2516 = vst [vmem:[#allocation3 + $0xec] sm:$0xf] %v2390_v1  ;;  %v2730_v16 = vrot.slane %v2728_v54, 4  ;;  %v2733_v52 = vrot.slane %v2731_v25, 5 }
 0x1c8   : > { %v3112_v46 = vld [vmem:[#allocation2 + $0x3c] sm:$0xe]  ;;  %v6135_v22 = vld [vmem:[#allocation3 + $0x68] sm:$0xf]  ;;  %v6960_v60 = vld [vmem:[#allocation3 + $0xc8] sm:$0xf0] }
 0x1c9   : > { %2517 = vst [vmem:[#allocation3 + $0x110] sm:$0xf] %v2393_v15  ;;  %v2739_v10 = vrot.slane %v2737_v4, 5  ;;  %v6952_v45 = vld [vmem:[#allocation3 + $0x88] sm:$0xf0]  ;;  %v2734_v58 = vor.u32 %v2733_v52, %v2730_v16  ;;  %v2747_v29 = vshll.u32 %v2618_v9, 16  ;;  %v6164_v53 = vor.u32 %v6960_v60, %v6163_v35 }
 0x1ca   : > { %v5081_v59 = vpop.f32.mrf.mxu2  ;;  %v5170_v51 = vpop.f32.mrf.mxu3  ;;  %2582 = vst [vmem:[#allocation3 + $0x114] sm:$0xf] %v2550_v12  ;;  %v6955_v31 = vld [vmem:[#allocation3 + $0xa4] sm:$0xf]  ;;  %v2743_v5 = vrot.slane %v2741_v26, 4  ;;  %v6052_v17 = vrot.slane %v3112_v46, 9  ;;  %v6136_v48 = vor.u32 %v6952_v45, %v6135_v22 }
 0x1cb   : > { %5483 = vmatmul.bf16.gmra.mxu3 %v6132_v32  ;;  %v5082_v11 = vadd.f32 %v5081_v59, %v4993_v19  ;;  %v3113_v0 = vld [vmem:[#allocation2 + $0x40] sm:$0xf]  ;;  %v2735_v32 = vrot.slane %v2734_v58, 4  ;;  %v3114_v6 = vld [vmem:[#allocation2 + $0x44] sm:$0x1]  ;;  %v2749_v36 = vrot.slane %v2747_v29, 5 }
 0x1cc   : > { %v6157_v42 = vld [vmem:[#allocation3 + $0xc4] sm:$0xf0]  ;;  %v2744_v62 = vor.u32 %v2743_v5, %v2739_v10  ;;  %v3222_v14 = vrot.slane %v3113_v0, 5  ;;  %v3225_v20 = vrot.slane %v3114_v6, 5  ;;  %v2619_v61 = vld [vmem:[#allocation2 + $0x48] sm:$0xf] }
 0x1cd   : > { %v5171_v50 = vadd.f32 %v5170_v51, %v5082_v11  ;;  %v5257_v40 = vpop.f32.mrf.mxu0  ;;  %v2740_v9 = vsel %vm7889_vm13, %v2735_v32, %v2739_v10  ;;  %v2620_v25 = vld [vmem:[#allocation2 + $0x4c] sm:$0xf]  ;;  %v2752_v1 = vshrl.u32 %v2619_v61, 16  ;;  %v2755_v15 = vshll.u32 %v2619_v61, 16  ;;  %v6956_v4 = vld [vmem:[#allocation3 + $0xac] sm:$0xf] }
 0x1ce   : > { %v4995_v54 = vpop.f32.mrf.mxu1  ;;  %v6160_v12 = vor.u32 %v6955_v31, %v6157_v42  ;;  %v2745_v19 = vrot.slane %v2744_v62, 4  ;;  %3077 = vst [vmem:[#allocation3 + $0xf4] sm:$0xf] %v2740_v9  ;;  %v3223_v35 = vsel %vm7883_vm12, %v6052_v17, %v3222_v14  ;;  %v3224_v16 = vrot.slane %v3222_v14, 4  ;;  %v6165_v46 = vld [vmem:[#allocation3 + $0xcc] sm:$0xf0] }
 0x1cf   : > { %v4996_v52 = vadd.f32 %v4995_v54, %v8050_v43  ;;  %3349 = vst [vmem:[#allocation3 + $0xf8] sm:$0xf] %v3223_v35  ;;  %v2754_v22 = vrot.slane %v2752_v1, 4  ;;  %v2757_v59 = vrot.slane %v2755_v15, 5  ;;  %v8462_v60 = vadd.f32 %v5257_v40, %v8447_v3  ;;  %v2283_v11 = vld [vmem:[#allocation2 + $0x40] sm:$0xf] }
 0x1d0   : > { %v2750_v26 = vsel %vm7889_vm13, %v2745_v19, %v2749_v36  ;;  %v3226_v45 = vsel %vm7883_vm12, %v3224_v16, %v3225_v20  ;;  %v2761_v51 = vshll.u32 %v2620_v25, 16  ;;  %v2396_v43 = vrot.slane %v2283_v11, 5  ;;  %v2621_v31 = vld [vmem:[#allocation2 + $0x50] sm:$0x1]  ;;  %v2282_v3 = vld [vmem:[#allocation2 + $0x3c] sm:$0xe] }
 0x1d1   : > { %3078 = vst [vmem:[#allocation3 + $0x118] sm:$0xf] %v2750_v26  ;;  %v2758_v5 = vor.u32 %v2757_v59, %v2754_v22  ;;  %v6168_v0 = vor.u32 %v6956_v4, %v6165_v46  ;;  %v2284_v17 = vld [vmem:[#allocation2 + $0x44] sm:$0x1]  ;;  %v3116_v40 = vld [vmem:[#allocation2 + $0x4c] sm:$0xf] }
 0x1d2   : > { %v5084_v10 = vpop.f32.mrf.mxu2  ;;  %v5173_v29 = vpop.f32.mrf.mxu3  ;;  %3350 = vst [vmem:[#allocation3 + $0x11c] sm:$0xf] %v3226_v45  ;;  %v2398_v32 = vrot.slane %v2396_v43, 4  ;;  %v2399_v6 = vrot.slane %v2284_v17, 5  ;;  %v2763_v14 = vrot.slane %v2761_v51, 5  ;;  %v2765_v20 = vshrl.u32 %v2620_v25, 16 }
 0x1d3   : > { %5399 = vmatmul.bf16.gmra.mxu2 %v6164_v53  ;;  %v5085_v58 = vadd.f32 %v5084_v10, %v4996_v52  ;;  %v6037_v53 = vrot.slane %v2282_v3, 9  ;;  %v2759_v36 = vrot.slane %v2758_v5, 4  ;;  %v2771_v61 = vshll.u32 %v2621_v31, 16  ;;  %v3115_v54 = vld [vmem:[#allocation2 + $0x48] sm:$0xe] }
 0x1d4   : > { %5572 = vmatmul.bf16.gmra.mxu0 %v6136_v48  ;;  %v2400_v1 = vsel %vm7883_vm12, %v2398_v32, %v2399_v6  ;;  %v2551_v15 = vld [vmem:[#allocation2 + $0x48] sm:$0xf]  ;;  %v2552_v4 = vld [vmem:[#allocation2 + $0x4c] sm:$0xf]  ;;  %v2767_v19 = vrot.slane %v2765_v20, 4  ;;  %v6053_v52 = vrot.slane %v3115_v54, 9 }
 0x1d5   : > { %5310 = vmatmul.bf16.gmra.mxu1 %v6160_v12  ;;  %v5174_v42 = vadd.f32 %v5173_v29, %v5085_v58  ;;  %v5259_v62 = vpop.f32.mrf.mxu0  ;;  %v2397_v48 = vsel %vm7883_vm12, %v6037_v53, %v2396_v43  ;;  %2519 = vst [vmem:[#allocation3 + $0x158] sm:$0xf] %v2400_v1  ;;  %v2764_v25 = vsel %vm7889_vm13, %v2759_v36, %v2763_v14  ;;  %v3117_v16 = vld [vmem:[#allocation2 + $0x50] sm:$0x1]  ;;  %v3229_v46 = vrot.slane %v3116_v40, 5 }
 0x1d6   : > { %v4997_v9 = vpop.f32.mrf.mxu1  ;;  %v8472_v12 = vadd.f32 %v5259_v62, %v5171_v50  ;;  %2518 = vst [vmem:[#allocation3 + $0x134] sm:$0xf] %v2397_v48  ;;  %v6199_v59 = vld [vmem:[#allocation3 + $0xf0] sm:$0xf]  ;;  %v2768_v10 = vor.u32 %v2767_v19, %v2763_v14  ;;  %v2773_v26 = vrot.slane %v2771_v61, 5  ;;  %v3232_v50 = vrot.slane %v3117_v16, 5 }
 0x1d7   : > { %v4998_v35 = vadd.f32 %v4997_v9, %v8069_v38  ;;  %2583 = vst [vmem:[#allocation3 + $0x138] sm:$0xf] %v2551_v15  ;;  %v6969_v51 = vld [vmem:[#allocation3 + $0x110] sm:$0xf0]  ;;  %v3230_v38 = vsel %vm7883_vm12, %v6053_v52, %v3229_v46  ;;  %v3231_v58 = vrot.slane %v3229_v46, 4 }
 0x1d8   : > { %2584 = vst [vmem:[#allocation3 + $0x15c] sm:$0xf] %v2552_v4  ;;  %v6171_v29 = vld [vmem:[#allocation3 + $0xb0] sm:$0xf]  ;;  %v2769_v43 = vrot.slane %v2768_v10, 4  ;;  %v6200_v32 = vor.u32 %v6969_v51, %v6199_v59 }
 0x1d9   : > { %3079 = vst [vmem:[#allocation3 + $0x13c] sm:$0xf] %v2764_v25  ;;  %v6961_v31 = vld [vmem:[#allocation3 + $0xd0] sm:$0xf0]  ;;  %v3233_v3 = vsel %vm7883_vm12, %v3231_v58, %v3232_v50  ;;  %v6193_v53 = vld [vmem:[#allocation3 + $0x10c] sm:$0xf0] }
 0x1da   : > { %v5086_v22 = vpop.f32.mrf.mxu2  ;;  %v5175_v11 = vpop.f32.mrf.mxu3  ;;  %3351 = vst [vmem:[#allocation3 + $0x140] sm:$0xf] %v3230_v38  ;;  %v2774_v6 = vsel %vm7889_vm13, %v2769_v43, %v2773_v26  ;;  %v2622_v40 = vld [vmem:[#allocation2 + $0x54] sm:$0xf]  ;;  %v2623_v36 = vld [vmem:[#allocation2 + $0x58] sm:$0xf]  ;;  %v6172_v54 = vor.u32 %v6961_v31, %v6171_v29 }
 0x1db   : > { %5488 = vmatmul.bf16.gmra.mxu3 %v6168_v0  ;;  %v5087_v45 = vadd.f32 %v5086_v22, %v4998_v35  ;;  %v6964_v0 = vld [vmem:[#allocation3 + $0xec] sm:$0xf]  ;;  %3352 = vst [vmem:[#allocation3 + $0x164] sm:$0xf] %v3233_v3  ;;  %v2776_v14 = vshrl.u32 %v2622_v40, 16  ;;  %v2779_v20 = vshll.u32 %v2622_v40, 16 }
 0x1dc   : > { %3080 = vst [vmem:[#allocation3 + $0x160] sm:$0xf] %v2774_v6  ;;  %v6196_v48 = vor.u32 %v6964_v0, %v6193_v53  ;;  %v6965_v1 = vld [vmem:[#allocation3 + $0xf4] sm:$0xf]  ;;  %v6201_v15 = vld [vmem:[#allocation3 + $0x114] sm:$0xf0] }
 0x1dd   : > { %v5176_v5 = vadd.f32 %v5175_v11, %v5087_v45  ;;  %v5262_v17 = vpop.f32.mrf.mxu0  ;;  %v2778_v4 = vrot.slane %v2776_v14, 4  ;;  %v2781_v19 = vrot.slane %v2779_v20, 5  ;;  %v2286_v25 = vld [vmem:[#allocation2 + $0x4c] sm:$0xf]  ;;  %v2785_v16 = vshll.u32 %v2623_v36, 16  ;;  %v8858_v20 = vld [vmem:[#allocation24_spill] sm:$0xff] }
 0x1de   : > { %v5000_v62 = vpop.f32.mrf.mxu1  ;;  %v8483_v61 = vadd.f32 %v5262_v17, %v5174_v42  ;;  %v2789_v52 = vshrl.u32 %v2623_v36, 16  ;;  %v2403_v59 = vrot.slane %v2286_v25, 5  ;;  %v6204_v42 = vor.u32 %v6965_v1, %v6201_v15  ;;  %v2285_v26 = vld [vmem:[#allocation2 + $0x48] sm:$0xe]  ;;  %v2287_v50 = vld [vmem:[#allocation2 + $0x50] sm:$0x1] }
 0x1df   : > { %v5001_v9 = vadd.f32 %v5000_v62, %v8089_v23  ;;  %v2782_v10 = vor.u32 %v2781_v19, %v2778_v4  ;;  %v2624_v45 = vld [vmem:[#allocation2 + $0x5c] sm:$0x1]  ;;  %v6038_v11 = vrot.slane %v2285_v26, 9  ;;  %v2406_v38 = vrot.slane %v2287_v50, 5  ;;  %v2553_v53 = vld [vmem:[#allocation2 + $0x54] sm:$0xf] }
 0x1e0   : > { %v2405_v51 = vrot.slane %v2403_v59, 4  ;;  %v2787_v43 = vrot.slane %v2785_v16, 5  ;;  %v2791_v31 = vrot.slane %v2789_v52, 4  ;;  %v2795_v6 = vshll.u32 %v2624_v45, 16  ;;  %v3118_v62 = vld [vmem:[#allocation2 + $0x54] sm:$0xe] }
 0x1e1   : > { %v2783_v29 = vrot.slane %v2782_v10, 4  ;;  %v2404_v3 = vsel %vm7883_vm12, %v6038_v11, %v2403_v59  ;;  %v3119_v36 = vld [vmem:[#allocation2 + $0x58] sm:$0xf]  ;;  %v3120_v1 = vld [vmem:[#allocation2 + $0x5c] sm:$0x1]  ;;  %v6054_v15 = vrot.slane %v3118_v62, 9 }
 0x1e2   : > { %v5089_v35 = vpop.f32.mrf.mxu2  ;;  %v5178_v22 = vpop.f32.mrf.mxu3  ;;  %v2407_v17 = vsel %vm7883_vm12, %v2405_v51, %v2406_v38  ;;  %2520 = vst [vmem:[#allocation3 + $0x17c] sm:$0xf] %v2404_v3  ;;  %v2792_v40 = vor.u32 %v2791_v31, %v2787_v43  ;;  %v3239_v25 = vrot.slane %v3120_v1, 5  ;;  %v6970_v26 = vld [vmem:[#allocation3 + $0x118] sm:$0xf0] }
 0x1e3   : > { %5404 = vmatmul.bf16.gmra.mxu2 %v6200_v32  ;;  %v5090_v46 = vadd.f32 %v5089_v35, %v5001_v9  ;;  %v2554_v32 = vld [vmem:[#allocation2 + $0x58] sm:$0xf]  ;;  %2521 = vst [vmem:[#allocation3 + $0x1a0] sm:$0xf] %v2407_v17  ;;  %v2788_v9 = vsel %vm7889_vm13, %v2783_v29, %v2787_v43  ;;  %v3236_v35 = vrot.slane %v3119_v36, 5 }
 0x1e4   : > { %5577 = vmatmul.bf16.gmra.mxu0 %v6172_v54  ;;  %2585 = vst [vmem:[#allocation3 + $0x180] sm:$0xf] %v2553_v53  ;;  %v2793_v19 = vrot.slane %v2792_v40, 4  ;;  %v6973_v45 = vld [vmem:[#allocation3 + $0x134] sm:$0xf] }
 0x1e5   : > { %5315 = vmatmul.bf16.gmra.mxu1 %v6196_v48  ;;  %v5179_v23 = vadd.f32 %v5178_v22, %v5090_v46  ;;  %v5264_v58 = vpop.f32.mrf.mxu0  ;;  %v2797_v48 = vrot.slane %v2795_v6, 5  ;;  %v6235_v46 = vld [vmem:[#allocation3 + $0x138] sm:$0xf]  ;;  %2586 = vst [vmem:[#allocation3 + $0x1a4] sm:$0xf] %v2554_v32  ;;  %v3237_v10 = vsel %vm7883_vm12, %v6054_v15, %v3236_v35  ;;  %v8859_v32 = vld [vmem:[#allocation17_spill] sm:$0xff] }
 0x1e6   : > { %v5002_v0 = vpop.f32.mrf.mxu1  ;;  %v8490_v14 = vadd.f32 %v5264_v58, %v5176_v5  ;;  %v6978_v5 = vld [vmem:[#allocation3 + $0x158] sm:$0xf0]  ;;  %v6207_v22 = vld [vmem:[#allocation3 + $0xf8] sm:$0xf]  ;;  %3081 = vst [vmem:[#allocation3 + $0x184] sm:$0xf] %v2788_v9 }
 0x1e7   : > { %v5003_v54 = vadd.f32 %v5002_v0, %v8858_v20  ;;  %v2798_v59 = vsel %vm7889_vm13, %v2793_v19, %v2797_v48  ;;  %v6229_v51 = vld [vmem:[#allocation3 + $0x154] sm:$0xf0]  ;;  %v6236_v38 = vor.u32 %v6978_v5, %v6235_v46  ;;  %3353 = vst [vmem:[#allocation3 + $0x188] sm:$0xf] %v3237_v10  ;;  %v2625_v29 = vld [vmem:[#allocation2 + $0x60] sm:$0xf]  ;;  %v6208_v53 = vor.u32 %v6970_v26, %v6207_v22 }
 0x1e8   : > { %3082 = vst [vmem:[#allocation3 + $0x1a8] sm:$0xf] %v2798_v59  ;;  %v2626_v31 = vld [vmem:[#allocation2 + $0x64] sm:$0xf]  ;;  %v2800_v0 = vshrl.u32 %v2625_v29, 16  ;;  %v2803_v3 = vshll.u32 %v2625_v29, 16  ;;  %v6232_v40 = vor.u32 %v6973_v45, %v6229_v51 }
 0x1e9   : > { %v6974_v62 = vld [vmem:[#allocation3 + $0x13c] sm:$0xf]  ;;  %v2289_v48 = vld [vmem:[#allocation2 + $0x58] sm:$0xf]  ;;  %v2809_v1 = vshll.u32 %v2626_v31, 16  ;;  %v2813_v15 = vshrl.u32 %v2626_v31, 16 }
 0x1ea   : > { %v5091_v4 = vpop.f32.mrf.mxu2  ;;  %v5180_v52 = vpop.f32.mrf.mxu3  ;;  %v2802_v36 = vrot.slane %v2800_v0, 4  ;;  %v2805_v20 = vrot.slane %v2803_v3, 5  ;;  %v3122_v10 = vld [vmem:[#allocation2 + $0x64] sm:$0xf]  ;;  %v2555_v29 = vld [vmem:[#allocation2 + $0x60] sm:$0xf] }
 0x1eb   : > { %5493 = vmatmul.bf16.gmra.mxu3 %v6204_v42  ;;  %v5092_v16 = vadd.f32 %v5091_v4, %v5003_v54  ;;  %v3238_v42 = vrot.slane %v3236_v35, 4  ;;  %v6237_v54 = vld [vmem:[#allocation3 + $0x15c] sm:$0xf0]  ;;  %v2410_v35 = vrot.slane %v2289_v48, 5  ;;  %v2811_v45 = vrot.slane %v2809_v1, 5  ;;  %v8860_v3 = vld [vmem:[#allocation18_spill] sm:$0xff] }
 0x1ec   : > { %v6240_v46 = vor.u32 %v6974_v62, %v6237_v54  ;;  %v3243_v0 = vrot.slane %v3122_v10, 5  ;;  %v3121_v62 = vld [vmem:[#allocation2 + $0x60] sm:$0xe]  ;;  %2587 = vst [vmem:[#allocation3 + $0x1c8] sm:$0xf] %v2555_v29 }
 0x1ed   : > { %v8499_v50 = vadd.f32 %v5180_v52, %v5092_v16  ;;  %v5267_v11 = vpop.f32.mrf.mxu0  ;;  %v3240_v58 = vsel %vm7883_vm12, %v3238_v42, %v3239_v25  ;;  %v2806_v25 = vor.u32 %v2805_v20, %v2802_v36  ;;  %v2290_v16 = vld [vmem:[#allocation2 + $0x5c] sm:$0x1]  ;;  %v2627_v52 = vld [vmem:[#allocation2 + $0x68] sm:$0x1]  ;;  %v2412_v59 = vrot.slane %v2410_v35, 4 }
 0x1ee   : > { %v5005_v43 = vpop.f32.mrf.mxu1  ;;  %3354 = vst [vmem:[#allocation3 + $0x1ac] sm:$0xf] %v3240_v58  ;;  %v8503_v17 = vadd.f32 %v5267_v11, %v5179_v23  ;;  %v2288_v23 = vld [vmem:[#allocation2 + $0x54] sm:$0xe]  ;;  %v2413_v42 = vrot.slane %v2290_v16, 5  ;;  %v2815_v11 = vrot.slane %v2813_v15, 4 }
 0x1ef   : > { %v5006_v6 = vadd.f32 %v5005_v43, %v8859_v32  ;;  %v6039_v22 = vrot.slane %v2288_v23, 9  ;;  %v2807_v26 = vrot.slane %v2806_v25, 4  ;;  %v2556_v43 = vld [vmem:[#allocation2 + $0x64] sm:$0xf]  ;;  %v2819_v31 = vshll.u32 %v2627_v52, 16 }
 0x1f0   : > { %v2414_v32 = vsel %vm7883_vm12, %v2412_v59, %v2413_v42  ;;  %v3123_v36 = vld [vmem:[#allocation2 + $0x68] sm:$0x1]  ;;  %v6055_v54 = vrot.slane %v3121_v62, 9  ;;  %v6271_v25 = vld [vmem:[#allocation3 + $0x180] sm:$0xf] }
 0x1f1   : > { %v2411_v58 = vsel %vm7883_vm12, %v6039_v22, %v2410_v35  ;;  %2523 = vst [vmem:[#allocation3 + $0x1e8] sm:$0xf] %v2414_v32  ;;  %v2821_v20 = vrot.slane %v2819_v31, 5  ;;  %v3246_v48 = vrot.slane %v3123_v36, 5  ;;  %v6987_v23 = vld [vmem:[#allocation3 + $0x1a0] sm:$0xf0] }
 0x1f2   : > { %v5094_v9 = vpop.f32.mrf.mxu2  ;;  %v5183_v19 = vpop.f32.mrf.mxu3  ;;  %2522 = vst [vmem:[#allocation3 + $0x1c4] sm:$0xf] %v2411_v58  ;;  %v3244_v16 = vsel %vm7883_vm12, %v6055_v54, %v3243_v0  ;;  %v6243_v52 = vld [vmem:[#allocation3 + $0x140] sm:$0xf]  ;;  %v6979_v59 = vld [vmem:[#allocation3 + $0x160] sm:$0xf0] }
 0x1f3   : > { %5409 = vmatmul.bf16.gmra.mxu2 %v6236_v38  ;;  %v5095_v4 = vadd.f32 %v5094_v9, %v5006_v6  ;;  %v2812_v6 = vsel %vm7889_vm13, %v2807_v26, %v2811_v45  ;;  %v3245_v9 = vrot.slane %v3243_v0, 4  ;;  %2588 = vst [vmem:[#allocation3 + $0x1ec] sm:$0xf] %v2556_v43  ;;  %v6265_v42 = vld [vmem:[#allocation3 + $0x19c] sm:$0xf0]  ;;  %v6272_v26 = vor.u32 %v6987_v23, %v6271_v25 }
 0x1f4   : > { %5582 = vmatmul.bf16.gmra.mxu0 %v6208_v53  ;;  %3083 = vst [vmem:[#allocation3 + $0x1cc] sm:$0xf] %v2812_v6  ;;  %v6244_v58 = vor.u32 %v6979_v59, %v6243_v52  ;;  %v6983_v31 = vld [vmem:[#allocation3 + $0x184] sm:$0xf]  ;;  %v6273_v32 = vld [vmem:[#allocation3 + $0x1a4] sm:$0xf0] }
 0x1f5   : > { %5320 = vmatmul.bf16.gmra.mxu1 %v6232_v40  ;;  %v8506_v5 = vadd.f32 %v5183_v19, %v5095_v4  ;;  %v5269_v51 = vpop.f32.mrf.mxu0  ;;  %v2816_v40 = vor.u32 %v2815_v11, %v2811_v45  ;;  %v3247_v22 = vsel %vm7883_vm12, %v3245_v9, %v3246_v48  ;;  %3355 = vst [vmem:[#allocation3 + $0x1d0] sm:$0xf] %v3244_v16  ;;  %v2628_v45 = vld [vmem:[#allocation2 + $0x6c] sm:$0xf]  ;;  %v2629_v11 = vld [vmem:[#allocation2 + $0x70] sm:$0xf] }
 0x1f6   : > { %v5007_v38 = vpop.f32.mrf.mxu1  ;;  %v8516_v4 = vadd.f32 %v5269_v51, %v8499_v50  ;;  %v6982_v50 = vld [vmem:[#allocation3 + $0x17c] sm:$0xf]  ;;  %3356 = vst [vmem:[#allocation3 + $0x1f4] sm:$0xf] %v3247_v22  ;;  %v2824_v51 = vshrl.u32 %v2628_v45, 16  ;;  %v2837_v62 = vshrl.u32 %v2629_v11, 16  ;;  %v6276_v25 = vor.u32 %v6983_v31, %v6273_v32 }
 0x1f7   : > { %v5008_v53 = vadd.f32 %v5007_v38, %v8860_v3  ;;  %v2817_v15 = vrot.slane %v2816_v40, 4  ;;  %v2827_v38 = vshll.u32 %v2628_v45, 16  ;;  %v6268_v43 = vor.u32 %v6982_v50, %v6265_v42  ;;  %v2292_v6 = vld [vmem:[#allocation2 + $0x64] sm:$0xf]  ;;  %v8861_v48 = vld [vmem:[#allocation19_spill] sm:$0xff] }
 0x1f8   : > { %v2826_v0 = vrot.slane %v2824_v51, 4  ;;  %v2833_v40 = vshll.u32 %v2629_v11, 16  ;;  %v2417_v54 = vrot.slane %v2292_v6, 5  ;;  %v2557_v45 = vld [vmem:[#allocation2 + $0x6c] sm:$0xf] }
 0x1f9   : > { %v2829_v3 = vrot.slane %v2827_v38, 5  ;;  %v2558_v11 = vld [vmem:[#allocation2 + $0x70] sm:$0xf]  ;;  %2589 = vst [vmem:[#allocation3 + $0x210] sm:$0xf] %v2557_v45 }
 0x1fa   : > { %v5096_v1 = vpop.f32.mrf.mxu2  ;;  %v5185_v35 = vpop.f32.mrf.mxu3  ;;  %v2419_v52 = vrot.slane %v2417_v54, 4  ;;  %v2835_v50 = vrot.slane %v2833_v40, 5  ;;  %2590 = vst [vmem:[#allocation3 + $0x234] sm:$0xf] %v2558_v11 }
 0x1fb   : > { %5498 = vmatmul.bf16.gmra.mxu3 %v6240_v46  ;;  %v5097_v19 = vadd.f32 %v5096_v1, %v5008_v53  ;;  %v2822_v46 = vsel %vm7889_vm13, %v2817_v15, %v2821_v20  ;;  %v2830_v9 = vor.u32 %v2829_v3, %v2826_v0  ;;  %v2291_v15 = vld [vmem:[#allocation2 + $0x60] sm:$0xe] }
 0x1fc   : > { %3084 = vst [vmem:[#allocation3 + $0x1f0] sm:$0xf] %v2822_v46  ;;  %v6040_v16 = vrot.slane %v2291_v15, 9  ;;  %v6279_v15 = vld [vmem:[#allocation3 + $0x188] sm:$0xf] }
 0x1fd   : > { %v8524_v10 = vadd.f32 %v5185_v35, %v5097_v19  ;;  %v2293_v19 = vld [vmem:[#allocation2 + $0x68] sm:$0x1]  ;;  %v2630_v35 = vld [vmem:[#allocation2 + $0x74] sm:$0x1]  ;;  %v2831_v59 = vrot.slane %v2830_v9, 4 }
 0x1fe   : > { %v2420_v46 = vrot.slane %v2293_v19, 5  ;;  %v2418_v42 = vsel %vm7883_vm12, %v6040_v16, %v2417_v54  ;;  %v2843_v51 = vshll.u32 %v2630_v35, 16  ;;  %v8862_v19 = vld [vmem:[#allocation20_spill] sm:$0xff] }
 0x1ff   : > { %2524 = vst [vmem:[#allocation3 + $0x20c] sm:$0xf] %v2418_v42  ;;  %v2836_v0 = vsel %vm7889_vm13, %v2831_v59, %v2835_v50  ;;  %v6301_v59 = vld [vmem:[#allocation3 + $0x1e4] sm:$0xf0]  ;;  %v2631_v42 = vld [vmem:[#allocation2 + $0x78] sm:$0xf] }
 0x200   : > { %v2845_v3 = vrot.slane %v2843_v51, 5  ;;  %3085 = vst [vmem:[#allocation3 + $0x214] sm:$0xf] %v2836_v0  ;;  %v2848_v45 = vshrl.u32 %v2631_v42, 16  ;;  %v2851_v11 = vshll.u32 %v2631_v42, 16 }
 0x201   : > { %v5272_v29 = vpop.f32.mrf.mxu0 }
 0x202   : > { %v5010_v53 = vpop.f32.mrf.mxu1  ;;  %v8527_v36 = vadd.f32 %v5272_v29, %v8506_v5  ;;  %v5188_v20 = vpop.f32.mrf.mxu3  ;;  %v2839_v5 = vrot.slane %v2837_v62, 4  ;;  %v3124_v29 = vld [vmem:[#allocation2 + $0x6c] sm:$0xe]  ;;  %v2850_v0 = vrot.slane %v2848_v45, 4  ;;  %v2559_v45 = vld [vmem:[#allocation2 + $0x78] sm:$0xf] }
 0x203   : > { %5414 = vmatmul.bf16.gmra.mxu2 %v6272_v26  ;;  %v5011_v1 = vadd.f32 %v5010_v53, %v8861_v48  ;;  %v2421_v26 = vsel %vm7883_vm12, %v2419_v52, %v2420_v46  ;;  %v3126_v53 = vld [vmem:[#allocation2 + $0x74] sm:$0x1]  ;;  %v6056_v32 = vrot.slane %v3124_v29, 9  ;;  %v6307_v48 = vld [vmem:[#allocation3 + $0x1c8] sm:$0xf] }
 0x204   : > { %5587 = vmatmul.bf16.gmra.mxu0 %v6244_v58  ;;  %v2840_v58 = vor.u32 %v2839_v5, %v2835_v50  ;;  %2525 = vst [vmem:[#allocation3 + $0x230] sm:$0xf] %v2421_v26  ;;  %v3253_v54 = vrot.slane %v3126_v53, 5  ;;  %v6988_v52 = vld [vmem:[#allocation3 + $0x1a8] sm:$0xf0] }
 0x205   : > { %5325 = vmatmul.bf16.gmra.mxu1 %v6268_v43  ;;  %v3125_v43 = vld [vmem:[#allocation2 + $0x70] sm:$0xf]  ;;  %v2632_v26 = vld [vmem:[#allocation2 + $0x7c] sm:$0xf]  ;;  %v6280_v51 = vor.u32 %v6988_v52, %v6279_v15  ;;  %v2294_v15 = vld [vmem:[#allocation2 + $0x6c] sm:$0xe] }
 0x206   : > { %v5099_v23 = vpop.f32.mrf.mxu2  ;;  %v2841_v40 = vrot.slane %v2840_v58, 4  ;;  %v3250_v62 = vrot.slane %v3125_v43, 5  ;;  %2591 = vst [vmem:[#allocation3 + $0x258] sm:$0xf] %v2559_v45 }
 0x207   : > { %v5100_v22 = vadd.f32 %v5099_v23, %v5011_v1  ;;  %v6996_v1 = vld [vmem:[#allocation3 + $0x1e8] sm:$0xf0] }
 0x208   : > { %v3251_v23 = vsel %vm7883_vm12, %v6056_v32, %v3250_v62  ;;  %v3252_v16 = vrot.slane %v3250_v62, 4  ;;  %v6308_v50 = vor.u32 %v6996_v1, %v6307_v48  ;;  %v6309_v32 = vld [vmem:[#allocation3 + $0x1ec] sm:$0xf0]  ;;  %v2861_v62 = vshrl.u32 %v2632_v26, 16 }
 0x209   : > { %v5189_v38 = vadd.f32 %v5188_v20, %v5100_v22  ;;  %v5274_v31 = vpop.f32.mrf.mxu0  ;;  %v6991_v22 = vld [vmem:[#allocation3 + $0x1c4] sm:$0xf]  ;;  %3357 = vst [vmem:[#allocation3 + $0x218] sm:$0xf] %v3251_v23 }
 0x20a   : > { %v5012_v6 = vpop.f32.mrf.mxu1  ;;  %v8537_v20 = vadd.f32 %v5274_v31, %v8524_v10  ;;  %v5190_v9 = vpop.f32.mrf.mxu3  ;;  %v3254_v5 = vsel %vm7883_vm12, %v3252_v16, %v3253_v54  ;;  %v6304_v43 = vor.u32 %v6991_v22, %v6301_v59  ;;  %v6992_v31 = vld [vmem:[#allocation3 + $0x1cc] sm:$0xf] }
 0x20b   : > { %5503 = vmatmul.bf16.gmra.mxu3 %v6276_v25  ;;  %v5013_v35 = vadd.f32 %v5012_v6, %v8862_v19  ;;  %v2846_v25 = vsel %vm7889_vm13, %v2841_v40, %v2845_v3  ;;  %3358 = vst [vmem:[#allocation3 + $0x23c] sm:$0xf] %v3254_v5  ;;  %v2853_v3 = vrot.slane %v2851_v11, 5  ;;  %v2295_v6 = vld [vmem:[#allocation2 + $0x70] sm:$0xf]  ;;  %v2857_v40 = vshll.u32 %v2632_v26, 16 }
 0x20c   : > { %3086 = vst [vmem:[#allocation3 + $0x238] sm:$0xf] %v2846_v25  ;;  %v2424_v48 = vrot.slane %v2295_v6, 5  ;;  %v8863_v19 = vld [vmem:[#allocation21_spill] sm:$0xff]  ;;  %v6312_v23 = vor.u32 %v6992_v31, %v6309_v32  ;;  %v3127_v31 = vld [vmem:[#allocation2 + $0x78] sm:$0xe] }
 0x20d   : > { %v2854_v1 = vor.u32 %v2853_v3, %v2850_v0  ;;  %v2633_v25 = vld [vmem:[#allocation2 + $0x80] sm:$0x1]  ;;  %v2859_v5 = vrot.slane %v2857_v40, 5  ;;  %v2560_v11 = vld [vmem:[#allocation2 + $0x7c] sm:$0xf]  ;;  %v6057_v40 = vrot.slane %v3127_v31, 9 }
 0x20e   : > { %v5101_v46 = vpop.f32.mrf.mxu2  ;;  %v2426_v22 = vrot.slane %v2424_v48, 4  ;;  %v3128_v0 = vld [vmem:[#allocation2 + $0x7c] sm:$0xf]  ;;  %v3129_v6 = vld [vmem:[#allocation2 + $0x80] sm:$0x1] }
 0x20f   : > { %v5102_v10 = vadd.f32 %v5101_v46, %v5013_v35  ;;  %v6041_v46 = vrot.slane %v2294_v15, 9  ;;  %v6343_v15 = vld [vmem:[#allocation3 + $0x210] sm:$0xf]  ;;  %2592 = vst [vmem:[#allocation3 + $0x27c] sm:$0xf] %v2560_v11 }
 0x210   : > { %v2635_v11 = vld [vmem:[#allocation2 + $0x88] sm:$0xf] }
 0x211   : > { %v5191_v58 = vadd.f32 %v5190_v9, %v5102_v10  ;;  %v5277_v29 = vpop.f32.mrf.mxu0  ;;  %v2296_v9 = vld [vmem:[#allocation2 + $0x74] sm:$0x1]  ;;  %v2425_v42 = vsel %vm7883_vm12, %v6041_v46, %v2424_v48 }
 0x212   : > { %v5015_v53 = vpop.f32.mrf.mxu1  ;;  %v8546_v54 = vadd.f32 %v5277_v29, %v5189_v38  ;;  %v5193_v52 = vpop.f32.mrf.mxu3  ;;  %v2427_v10 = vrot.slane %v2296_v9, 5  ;;  %v2863_v38 = vrot.slane %v2861_v62, 4  ;;  %2526 = vst [vmem:[#allocation3 + $0x254] sm:$0xf] %v2425_v42  ;;  %v7005_v9 = vld [vmem:[#allocation3 + $0x230] sm:$0xf0] }
 0x213   : > { %5419 = vmatmul.bf16.gmra.mxu2 %v6308_v50  ;;  %v5016_v35 = vadd.f32 %v5015_v53, %v8863_v19  ;;  %v2855_v50 = vrot.slane %v2854_v1, 4  ;;  %v3257_v1 = vrot.slane %v3128_v0, 5  ;;  %v3260_v19 = vrot.slane %v3129_v6, 5 }
 0x214   : > { %5592 = vmatmul.bf16.gmra.mxu0 %v6280_v51  ;;  %v2428_v26 = vsel %vm7883_vm12, %v2426_v22, %v2427_v10  ;;  %v2867_v51 = vshll.u32 %v2633_v25, 16  ;;  %v6315_v25 = vld [vmem:[#allocation3 + $0x1d0] sm:$0xf]  ;;  %v6997_v10 = vld [vmem:[#allocation3 + $0x1f0] sm:$0xf0] }
 0x215   : > { %5330 = vmatmul.bf16.gmra.mxu1 %v6304_v43  ;;  %v2864_v43 = vor.u32 %v2863_v38, %v2859_v5  ;;  %2527 = vst [vmem:[#allocation3 + $0x278] sm:$0xf] %v2428_v26  ;;  %v2860_v53 = vsel %vm7889_vm13, %v2855_v50, %v2859_v5  ;;  %v3258_v46 = vsel %vm7883_vm12, %v6057_v40, %v3257_v1  ;;  %v3259_v22 = vrot.slane %v3257_v1, 4  ;;  %v7000_v50 = vld [vmem:[#allocation3 + $0x20c] sm:$0xf] }
 0x216   : > { %v5104_v16 = vpop.f32.mrf.mxu2  ;;  %v2869_v32 = vrot.slane %v2867_v51, 5  ;;  %3087 = vst [vmem:[#allocation3 + $0x25c] sm:$0xf] %v2860_v53  ;;  %v6337_v5 = vld [vmem:[#allocation3 + $0x22c] sm:$0xf0]  ;;  %v6344_v38 = vor.u32 %v7005_v9, %v6343_v15  ;;  %v6316_v31 = vor.u32 %v6997_v10, %v6315_v25  ;;  %v2881_v15 = vshll.u32 %v2635_v11, 16 }
 0x217   : > { %v5105_v59 = vadd.f32 %v5104_v16, %v5016_v35  ;;  %v2865_v48 = vrot.slane %v2864_v43, 4  ;;  %v8864_v16 = vld [vmem:[#allocation22_spill] sm:$0xff]  ;;  %v3261_v42 = vsel %vm7883_vm12, %v3259_v22, %v3260_v19  ;;  %3359 = vst [vmem:[#allocation3 + $0x260] sm:$0xf] %v3258_v46  ;;  %v6340_v53 = vor.u32 %v7000_v50, %v6337_v5  ;;  %v2298_v1 = vld [vmem:[#allocation2 + $0x7c] sm:$0xf] }
 0x218   : > { %v2634_v26 = vld [vmem:[#allocation2 + $0x84] sm:$0xf]  ;;  %3360 = vst [vmem:[#allocation3 + $0x284] sm:$0xf] %v3261_v42  ;;  %v2885_v19 = vshrl.u32 %v2635_v11, 16 }
 0x219   : > { %v5194_v29 = vadd.f32 %v5193_v52, %v5105_v59  ;;  %v5279_v3 = vpop.f32.mrf.mxu0  ;;  %v2870_v52 = vsel %vm7889_vm13, %v2865_v48, %v2869_v32  ;;  %v2872_v51 = vshrl.u32 %v2634_v26, 16  ;;  %v2875_v43 = vshll.u32 %v2634_v26, 16  ;;  %v7001_v32 = vld [vmem:[#allocation3 + $0x214] sm:$0xf]  ;;  %v6345_v48 = vld [vmem:[#allocation3 + $0x234] sm:$0xf0] }
 0x21a   : > { %v5017_v62 = vpop.f32.mrf.mxu1  ;;  %v8555_v35 = vadd.f32 %v5279_v3, %v5191_v58  ;;  %3088 = vst [vmem:[#allocation3 + $0x280] sm:$0xf] %v2870_v52  ;;  %v5195_v45 = vpop.f32.mrf.mxu3  ;;  %v8865_v52 = vld [vmem:[#allocation23_spill] sm:$0xff]  ;;  %v2297_v25 = vld [vmem:[#allocation2 + $0x78] sm:$0xe]  ;;  %v2887_v11 = vrot.slane %v2885_v19, 4 }
 0x21b   : > { %5508 = vmatmul.bf16.gmra.mxu3 %v6312_v23  ;;  %v5018_v23 = vadd.f32 %v5017_v62, %v8864_v16  ;;  %v2874_v6 = vrot.slane %v2872_v51, 4  ;;  %v2877_v40 = vrot.slane %v2875_v43, 5  ;;  %v2431_v16 = vrot.slane %v2298_v1, 5  ;;  %v2299_v22 = vld [vmem:[#allocation2 + $0x80] sm:$0x1] }
 0x21c   : > { %v2636_v10 = vld [vmem:[#allocation2 + $0x8c] sm:$0x1]  ;;  %v2561_v43 = vld [vmem:[#allocation2 + $0x84] sm:$0xf] }
 0x21d   : > { %v2433_v5 = vrot.slane %v2431_v16, 4  ;;  %v3132_v1 = vld [vmem:[#allocation2 + $0x8c] sm:$0x1]  ;;  %2593 = vst [vmem:[#allocation3 + $0x2a0] sm:$0xf] %v2561_v43 }
 0x21e   : > { %v5106_v59 = vpop.f32.mrf.mxu2 }
 0x21f   : > { %v5107_v58 = vadd.f32 %v5106_v59, %v5018_v23  ;;  %v2878_v23 = vor.u32 %v2877_v40, %v2874_v6  ;;  %v6348_v59 = vor.u32 %v7001_v32, %v6345_v48  ;;  %v3130_v32 = vld [vmem:[#allocation2 + $0x84] sm:$0xe]  ;;  %v3131_v6 = vld [vmem:[#allocation2 + $0x88] sm:$0xf] }
 0x221   : > { %v5196_v0 = vadd.f32 %v5195_v45, %v5107_v58  ;;  %v5282_v3 = vpop.f32.mrf.mxu0  ;;  %v6042_v58 = vrot.slane %v2297_v25, 9  ;;  %v2879_v26 = vrot.slane %v2878_v23, 4  ;;  %v2883_v45 = vrot.slane %v2881_v15, 5  ;;  %v6379_v25 = vld [vmem:[#allocation3 + $0x258] sm:$0xf] }
 0x222   : > { %v5020_v62 = vpop.f32.mrf.mxu1  ;;  %v8564_v9 = vadd.f32 %v5282_v3, %v5194_v29  ;;  %v2891_v3 = vshll.u32 %v2636_v10, 16  ;;  %v6058_v15 = vrot.slane %v3130_v32, 9  ;;  %v3264_v23 = vrot.slane %v3131_v6, 5  ;;  %v6351_v10 = vld [vmem:[#allocation3 + $0x218] sm:$0xf] }
 0x223   : > { %5424 = vmatmul.bf16.gmra.mxu2 %v6344_v38  ;;  %v5021_v46 = vadd.f32 %v5020_v62, %v8865_v52  ;;  %v2434_v38 = vrot.slane %v2299_v22, 5  ;;  %v2432_v29 = vsel %vm7883_vm12, %v6042_v58, %v2431_v16  ;;  %v2884_v62 = vsel %vm7889_vm13, %v2879_v26, %v2883_v45  ;;  %v7014_v22 = vld [vmem:[#allocation3 + $0x278] sm:$0xf0] }
 0x224   : > { %5597 = vmatmul.bf16.gmra.mxu0 %v6316_v31  ;;  %v2562_v31 = vld [vmem:[#allocation2 + $0x88] sm:$0xf]  ;;  %2528 = vst [vmem:[#allocation3 + $0x29c] sm:$0xf] %v2432_v29  ;;  %v2893_v48 = vrot.slane %v2891_v3, 5  ;;  %v3267_v52 = vrot.slane %v3132_v1, 5  ;;  %v6380_v43 = vor.u32 %v7014_v22, %v6379_v25 }
 0x225   : > { %5335 = vmatmul.bf16.gmra.mxu1 %v6340_v53  ;;  %v2435_v51 = vsel %vm7883_vm12, %v2433_v5, %v2434_v38  ;;  %v2888_v53 = vor.u32 %v2887_v11, %v2883_v45  ;;  %2594 = vst [vmem:[#allocation3 + $0x2c4] sm:$0xf] %v2562_v31  ;;  %v3265_v5 = vsel %vm7883_vm12, %v6058_v15, %v3264_v23  ;;  %v3266_v38 = vrot.slane %v3264_v23, 4  ;;  %v7006_v26 = vld [vmem:[#allocation3 + $0x238] sm:$0xf0] }
 0x226   : > { %v5109_v50 = vpop.f32.mrf.mxu2  ;;  %2529 = vst [vmem:[#allocation3 + $0x2c0] sm:$0xf] %v2435_v51  ;;  %v6373_v51 = vld [vmem:[#allocation3 + $0x274] sm:$0xf0]  ;;  %v2638_v3 = vld [vmem:[#allocation2 + $0x94] sm:$0xf]  ;;  %v6352_v6 = vor.u32 %v7006_v26, %v6351_v10 }
 0x227   : > { %v5110_v42 = vadd.f32 %v5109_v50, %v5021_v46  ;;  %v2889_v16 = vrot.slane %v2888_v53, 4  ;;  %3089 = vst [vmem:[#allocation3 + $0x2a4] sm:$0xf] %v2884_v62  ;;  %v3268_v31 = vsel %vm7883_vm12, %v3266_v38, %v3267_v52  ;;  %v2905_v23 = vshll.u32 %v2638_v3, 16  ;;  %v2639_v10 = vld [vmem:[#allocation2 + $0x98] sm:$0x1] }
 0x228   : > { %3361 = vst [vmem:[#allocation3 + $0x2a8] sm:$0xf] %v3265_v5  ;;  %v2302_v5 = vld [vmem:[#allocation2 + $0x8c] sm:$0x1] }
 0x229   : > { %v5284_v40 = vpop.f32.mrf.mxu0  ;;  %v2894_v58 = vsel %vm7889_vm13, %v2889_v16, %v2893_v48  ;;  %3362 = vst [vmem:[#allocation3 + $0x2cc] sm:$0xf] %v3268_v31  ;;  %v7010_v48 = vld [vmem:[#allocation3 + $0x25c] sm:$0xf]  ;;  %v2301_v16 = vld [vmem:[#allocation2 + $0x88] sm:$0xf] }
 0x22a   : > { %v5022_v19 = vpop.f32.mrf.mxu1  ;;  %v8573_v46 = vadd.f32 %v5284_v40, %v5196_v0  ;;  %v7009_v0 = vld [vmem:[#allocation3 + $0x254] sm:$0xf]  ;;  %3090 = vst [vmem:[#allocation3 + $0x2c8] sm:$0xf] %v2894_v58  ;;  %v2438_v52 = vrot.slane %v2301_v16, 5 }
 0x22b   : > { %5513 = vmatmul.bf16.gmra.mxu3 %v6348_v59  ;;  %v5023_v59 = vadd.f32 %v5022_v19, %v8127_v7  ;;  %v2637_v7 = vld [vmem:[#allocation2 + $0x90] sm:$0xf]  ;;  %v6376_v62 = vor.u32 %v7009_v0, %v6373_v51  ;;  %v6381_v19 = vld [vmem:[#allocation3 + $0x27c] sm:$0xf0]  ;;  %v2300_v58 = vld [vmem:[#allocation2 + $0x84] sm:$0xe] }
 0x22c   : > { %v2896_v53 = vshrl.u32 %v2637_v7, 16  ;;  %v2899_v32 = vshll.u32 %v2637_v7, 16  ;;  %v6384_v26 = vor.u32 %v7010_v48, %v6381_v19  ;;  %v6043_v0 = vrot.slane %v2300_v58, 9  ;;  %v3135_v48 = vld [vmem:[#allocation2 + $0x98] sm:$0x1] }
 0x22d   : > { %v2440_v51 = vrot.slane %v2438_v52, 4  ;;  %v2907_v7 = vrot.slane %v2905_v23, 5 }
 0x22e   : > { %v5198_v50 = vpop.f32.mrf.mxu3  ;;  %v5111_v11 = vpop.f32.mrf.mxu2  ;;  %v2901_v1 = vrot.slane %v2899_v32, 5  ;;  %v2563_v32 = vld [vmem:[#allocation2 + $0x90] sm:$0xf] }
 0x22f   : > { %v5199_v45 = vadd.f32 %v5198_v50, %v5110_v42  ;;  %v5112_v29 = vadd.f32 %v5111_v11, %v5023_v59  ;;  %v2898_v42 = vrot.slane %v2896_v53, 4  ;;  %v2909_v50 = vshrl.u32 %v2638_v3, 16  ;;  %v3134_v53 = vld [vmem:[#allocation2 + $0x94] sm:$0xf]  ;;  %2595 = vst [vmem:[#allocation3 + $0x2e8] sm:$0xf] %v2563_v32 }
 0x230   : > { %v2564_v3 = vld [vmem:[#allocation2 + $0x94] sm:$0xf] }
 0x231   : > { %v5287_v40 = vpop.f32.mrf.mxu0  ;;  %v2902_v22 = vor.u32 %v2901_v1, %v2898_v42  ;;  %2596 = vst [vmem:[#allocation3 + $0x30c] sm:$0xf] %v2564_v3  ;;  %v6409_v3 = vld [vmem:[#allocation3 + $0x2bc] sm:$0xf0] }
 0x232   : > { %v5301_v15 = vpop.f32.mrf.mxu1  ;;  %v8582_v25 = vadd.f32 %v5287_v40, %v5199_v45  ;;  %v2439_v45 = vsel %vm7883_vm12, %v6043_v0, %v2438_v52  ;;  %v2915_v40 = vshll.u32 %v2639_v10, 16  ;;  %v3271_v52 = vrot.slane %v3134_v53, 5 }
 0x233   : > { %5429 = vmatmul.bf16.gmra.mxu2 %v6380_v43  ;;  %v2441_v43 = vrot.slane %v2302_v5, 5  ;;  %v2903_v31 = vrot.slane %v2902_v22, 4  ;;  %2530 = vst [vmem:[#allocation3 + $0x2e4] sm:$0xf] %v2439_v45  ;;  %v7023_v5 = vld [vmem:[#allocation3 + $0x2c0] sm:$0xf0]  ;;  %v5302_v32 = vadd.f32 %v5301_v15, %v8164_v8 }
 0x234   : > { %5602 = vmatmul.bf16.gmra.mxu0 %v6352_v6  ;;  %v2911_v6 = vrot.slane %v2909_v50, 4  ;;  %v2917_v16 = vrot.slane %v2915_v40, 5  ;;  %v3274_v50 = vrot.slane %v3135_v48, 5  ;;  %v7018_v45 = vld [vmem:[#allocation3 + $0x29c] sm:$0xf] }
 0x235   : > { %5340 = vmatmul.bf16.gmra.mxu1 %v6376_v62  ;;  %v2442_v42 = vsel %vm7883_vm12, %v2440_v51, %v2441_v43  ;;  %v3133_v62 = vld [vmem:[#allocation2 + $0x90] sm:$0xe]  ;;  %v3273_v51 = vrot.slane %v3271_v52, 4  ;;  %v6387_v43 = vld [vmem:[#allocation3 + $0x260] sm:$0xf] }
 0x236   : > { %v5200_v59 = vpop.f32.mrf.mxu3  ;;  %v5390_v11 = vpop.f32.mrf.mxu2  ;;  %2531 = vst [vmem:[#allocation3 + $0x308] sm:$0xf] %v2442_v42  ;;  %v2912_v19 = vor.u32 %v2911_v6, %v2907_v7  ;;  %v6059_v23 = vrot.slane %v3133_v62, 9  ;;  %v2640_v40 = vld [vmem:[#allocation2 + $0x9c] sm:$0xf] }
 0x237   : > { %v5201_v38 = vadd.f32 %v5200_v59, %v5112_v29  ;;  %v2908_v29 = vsel %vm7889_vm13, %v2903_v31, %v2907_v7  ;;  %v6415_v59 = vld [vmem:[#allocation3 + $0x2a0] sm:$0xf]  ;;  %v7015_v31 = vld [vmem:[#allocation3 + $0x280] sm:$0xf0]  ;;  %v2641_v42 = vld [vmem:[#allocation2 + $0xa0] sm:$0xf] }
 0x238   : > { %v2913_v10 = vrot.slane %v2912_v19, 4  ;;  %v3272_v0 = vsel %vm7883_vm12, %v6059_v23, %v3271_v52  ;;  %3091 = vst [vmem:[#allocation3 + $0x2ec] sm:$0xf] %v2908_v29  ;;  %v6416_v6 = vor.u32 %v7023_v5, %v6415_v59  ;;  %v2920_v62 = vshrl.u32 %v2640_v40, 16  ;;  %v7019_v52 = vld [vmem:[#allocation3 + $0x2a4] sm:$0xf] }
 0x239   : > { %v5289_v1 = vpop.f32.mrf.mxu0  ;;  %3363 = vst [vmem:[#allocation3 + $0x2f0] sm:$0xf] %v3272_v0  ;;  %v2923_v29 = vshll.u32 %v2640_v40, 16  ;;  %v6388_v48 = vor.u32 %v7015_v31, %v6387_v43  ;;  %v6417_v8 = vld [vmem:[#allocation3 + $0x2c4] sm:$0xf0]  ;;  %v2929_v59 = vshll.u32 %v2641_v42, 16 }
 0x23a   : > { %v5303_v22 = vpop.f32.mrf.mxu1  ;;  %v8590_v58 = vadd.f32 %v5289_v1, %v5201_v38  ;;  %v2918_v53 = vsel %vm7889_vm13, %v2913_v10, %v2917_v16  ;;  %v3275_v38 = vsel %vm7883_vm12, %v3273_v51, %v3274_v50  ;;  %v5391_v1 = vadd.f32 %v5390_v11, %v5302_v32  ;;  %v2304_v15 = vld [vmem:[#allocation2 + $0x94] sm:$0xf]  ;;  %v2303_v31 = vld [vmem:[#allocation2 + $0x90] sm:$0xe]  ;;  %v2642_v40 = vld [vmem:[#allocation2 + $0xa4] sm:$0x1] }
 0x23b   : > { %5518 = vmatmul.bf16.gmra.mxu3 %v6384_v26  ;;  %3092 = vst [vmem:[#allocation3 + $0x310] sm:$0xf] %v2918_v53  ;;  %v5304_v19 = vadd.f32 %v5303_v22, %v8183_v63  ;;  %v6412_v16 = vor.u32 %v7018_v45, %v6409_v3  ;;  %v2922_v10 = vrot.slane %v2920_v62, 4  ;;  %v2925_v50 = vrot.slane %v2923_v29, 5  ;;  %v2305_v63 = vld [vmem:[#allocation2 + $0x98] sm:$0x1] }
 0x23c   : > { %3364 = vst [vmem:[#allocation3 + $0x314] sm:$0xf] %v3275_v38  ;;  %v2445_v5 = vrot.slane %v2304_v15, 5  ;;  %v2933_v38 = vshrl.u32 %v2641_v42, 16  ;;  %v6420_v22 = vor.u32 %v7019_v52, %v6417_v8  ;;  %v6044_v32 = vrot.slane %v2303_v31, 9 }
 0x23d   : > { %v2926_v53 = vor.u32 %v2925_v50, %v2922_v10  ;;  %v2931_v29 = vrot.slane %v2929_v59, 5  ;;  %v2939_v50 = vshll.u32 %v2642_v40, 16  ;;  %v3137_v8 = vld [vmem:[#allocation2 + $0xa0] sm:$0xf] }
 0x23e   : > { %v5479_v26 = vpop.f32.mrf.mxu3  ;;  %v5392_v7 = vpop.f32.mrf.mxu2  ;;  %v2447_v3 = vrot.slane %v2445_v5, 4  ;;  %v2446_v42 = vsel %vm7883_vm12, %v6044_v32, %v2445_v5 }
 0x23f   : > { %v5393_v0 = vadd.f32 %v5392_v7, %v5304_v19  ;;  %v5480_v43 = vadd.f32 %v5479_v26, %v5391_v1  ;;  %v2448_v7 = vrot.slane %v2305_v63, 5  ;;  %v2927_v62 = vrot.slane %v2926_v53, 4  ;;  %v3136_v19 = vld [vmem:[#allocation2 + $0x9c] sm:$0xe]  ;;  %v2566_v1 = vld [vmem:[#allocation2 + $0xa0] sm:$0xf] }
 0x240   : > { %2532 = vst [vmem:[#allocation3 + $0x32c] sm:$0xf] %v2446_v42  ;;  %v6060_v15 = vrot.slane %v3136_v19, 9  ;;  %v3138_v53 = vld [vmem:[#allocation2 + $0xa4] sm:$0x1] }
 0x241   : > { %v5568_v23 = vpop.f32.mrf.mxu0  ;;  %v2449_v26 = vsel %vm7883_vm12, %v2447_v3, %v2448_v7  ;;  %v2932_v59 = vsel %vm7889_vm13, %v2927_v62, %v2931_v29  ;;  %2598 = vst [vmem:[#allocation3 + $0x354] sm:$0xf] %v2566_v1 }
 0x242   : > { %v5306_v51 = vpop.f32.mrf.mxu1  ;;  %v5569_v52 = vadd.f32 %v5568_v23, %v5480_v43  ;;  %2533 = vst [vmem:[#allocation3 + $0x350] sm:$0xf] %v2449_v26  ;;  %v2941_v23 = vrot.slane %v2939_v50, 5 }
 0x243   : > { %5434 = vmatmul.bf16.gmra.mxu2 %v6416_v6  ;;  %v5307_v10 = vadd.f32 %v5306_v51, %v8199_v18  ;;  %v3281_v18 = vrot.slane %v3138_v53, 5  ;;  %v7032_v51 = vld [vmem:[#allocation3 + $0x308] sm:$0xf0]  ;;  %3093 = vst [vmem:[#allocation3 + $0x334] sm:$0xf] %v2932_v59 }
 0x244   : > { %5607 = vmatmul.bf16.gmra.mxu0 %v6388_v48  ;;  %v2565_v48 = vld [vmem:[#allocation2 + $0x9c] sm:$0xf]  ;;  %v5686_v7 = vmul.f32 %v5569_v52, %v5569_v52 }
 0x245   : > { %5345 = vmatmul.bf16.gmra.mxu1 %v6412_v16  ;;  %v2935_v16 = vrot.slane %v2933_v38, 4  ;;  %v6451_v38 = vld [vmem:[#allocation3 + $0x2e8] sm:$0xf]  ;;  %2597 = vst [vmem:[#allocation3 + $0x330] sm:$0xf] %v2565_v48 }
 0x246   : > { %v5481_v11 = vpop.f32.mrf.mxu3  ;;  %v5395_v45 = vpop.f32.mrf.mxu2  ;;  %v6452_v50 = vor.u32 %v7032_v51, %v6451_v38  ;;  %v6453_v38 = vld [vmem:[#allocation3 + $0x30c] sm:$0xf0]  ;;  %v2307_v51 = vld [vmem:[#allocation2 + $0xa0] sm:$0xf] }
 0x247   : > { %v5482_v6 = vadd.f32 %v5481_v11, %v5393_v0  ;;  %v2936_v5 = vor.u32 %v2935_v16, %v2931_v29  ;;  %v3278_v11 = vrot.slane %v3137_v8, 5  ;;  %v5396_v63 = vadd.f32 %v5395_v45, %v5307_v10  ;;  %v6423_v45 = vld [vmem:[#allocation3 + $0x2a8] sm:$0xf]  ;;  %v2643_v8 = vld [vmem:[#allocation2 + $0xa8] sm:$0xf] }
 0x248   : > { %v6445_v10 = vld [vmem:[#allocation3 + $0x304] sm:$0xf0]  ;;  %v2947_v59 = vshll.u32 %v2643_v8, 16 }
 0x249   : > { %v5570_v0 = vpop.f32.mrf.mxu0  ;;  %v2937_v43 = vrot.slane %v2936_v5, 4  ;;  %v3280_v3 = vrot.slane %v3278_v11, 4 }
 0x24a   : > { %v5571_v31 = vadd.f32 %v5570_v0, %v5482_v6  ;;  %v5308_v32 = vpop.f32.mrf.mxu1  ;;  %v7024_v6 = vld [vmem:[#allocation3 + $0x2c8] sm:$0xf0]  ;;  %v2944_v0 = vshrl.u32 %v2643_v8, 16 }
 0x24b   : > { %5523 = vmatmul.bf16.gmra.mxu3 %v6420_v22  ;;  %v3279_v22 = vsel %vm7883_vm12, %v6060_v15, %v3278_v11  ;;  %v2942_v26 = vsel %vm7889_vm13, %v2937_v43, %v2941_v23  ;;  %v3282_v48 = vsel %vm7883_vm12, %v3280_v3, %v3281_v18  ;;  %v2644_v15 = vld [vmem:[#allocation2 + $0xac] sm:$0xf]  ;;  %v6424_v5 = vor.u32 %v7024_v6, %v6423_v45  ;;  %v7028_v23 = vld [vmem:[#allocation3 + $0x2ec] sm:$0xf]  ;;  %v2306_v45 = vld [vmem:[#allocation2 + $0x9c] sm:$0xe] }
 0x24c   : > { %v5648_v40 = vadd.f32 %v5571_v31, %v5569_v52  ;;  %v5687_v62 = vmul.f32 %v5571_v31, %v5571_v31  ;;  %v7155_v29 = vpack.c.bf16 %v5571_v31, %v5569_v52  ;;  %3365 = vst [vmem:[#allocation3 + $0x338] sm:$0xf] %v3279_v22  ;;  %v7027_v52 = vld [vmem:[#allocation3 + $0x2e4] sm:$0xf]  ;;  %v5309_v53 = vadd.f32 %v5308_v32, %v8220_v49  ;;  %v2308_v6 = vld [vmem:[#allocation2 + $0xa4] sm:$0x1] }
 0x24d   : > { %3094 = vst [vmem:[#allocation3 + $0x358] sm:$0xf] %v2942_v26  ;;  %v6448_v31 = vor.u32 %v7027_v52, %v6445_v10  ;;  %v2946_v18 = vrot.slane %v2944_v0, 4  ;;  %v2949_v43 = vrot.slane %v2947_v59, 5  ;;  %v2957_v26 = vshrl.u32 %v2644_v15, 16 }
 0x24e   : > { %v5484_v19 = vpop.f32.mrf.mxu3  ;;  %v5397_v42 = vpop.f32.mrf.mxu2  ;;  %v5718_v1 = vadd.f32 %v5687_v62, %v5686_v7  ;;  %7156 = vst [vmem:[%s8616_s26] sm:$0xff] %v7155_v29   ;;  %v2953_v7 = vshll.u32 %v2644_v15, 16  ;;  %v2452_v62 = vrot.slane %v2307_v51, 5  ;;  %v2455_v10 = vrot.slane %v2308_v6, 5  ;;  %v2567_v15 = vld [vmem:[#allocation2 + $0xa8] sm:$0xf] }
 0x24f   : > { %v5485_v16 = vadd.f32 %v5484_v19, %v5396_v63  ;;  %3366 = vst [vmem:[#allocation3 + $0x35c] sm:$0xf] %v3282_v48  ;;  %v5398_v63 = vadd.f32 %v5397_v42, %v5309_v53  ;;  %v2950_v29 = vor.u32 %v2949_v43, %v2946_v18  ;;  %v6456_v48 = vor.u32 %v7028_v23, %v6453_v38  ;;  %v3139_v53 = vld [vmem:[#allocation2 + $0xa8] sm:$0xe]  ;;  %v3141_v51 = vld [vmem:[#allocation2 + $0xb0] sm:$0x1] }
 0x250   : > { %v2454_v52 = vrot.slane %v2452_v62, 4  ;;  %v2959_v43 = vrot.slane %v2957_v26, 4  ;;  %v6487_v6 = vld [vmem:[#allocation3 + $0x330] sm:$0xf]  ;;  %2599 = vst [vmem:[#allocation3 + $0x378] sm:$0xf] %v2567_v15 }
 0x251   : > { %v5573_v11 = vpop.f32.mrf.mxu0  ;;  %v2951_v59 = vrot.slane %v2950_v29, 4 }
 0x252   : > { %v8620_v22 = vadd.f32 %v5573_v11, %v5485_v16  ;;  %v5311_v3 = vpop.f32.mrf.mxu1  ;;  %v6045_v16 = vrot.slane %v2306_v45, 9  ;;  %v2456_v18 = vsel %vm7883_vm12, %v2454_v52, %v2455_v10 }
 0x253   : > { %5439 = vmatmul.bf16.gmra.mxu2 %v6452_v50  ;;  %v2645_v50 = vld [vmem:[#allocation2 + $0xb0] sm:$0x1]  ;;  %v5312_v23 = vadd.f32 %v5311_v3, %v8237_v56  ;;  %2535 = vst [vmem:[#allocation3 + $0x398] sm:$0xf] %v2456_v18  ;;  %v7041_v3 = vld [vmem:[#allocation3 + $0x350] sm:$0xf0] }
 0x254   : > { %5612 = vmatmul.bf16.gmra.mxu0 %v6424_v5  ;;  %v5649_v19 = vadd.f32 %v5648_v40, %v8620_v22  ;;  %v5688_v49 = vmul.f32 %v8620_v22, %v8620_v22  ;;  %v2955_v5 = vrot.slane %v2953_v7, 5  ;;  %v3140_v40 = vld [vmem:[#allocation2 + $0xac] sm:$0xf]  ;;  %v2453_v11 = vsel %vm7883_vm12, %v6045_v16, %v2452_v62 }
 0x255   : > { %5350 = vmatmul.bf16.gmra.mxu1 %v6448_v31  ;;  %v2568_v31 = vld [vmem:[#allocation2 + $0xac] sm:$0xf]  ;;  %2534 = vst [vmem:[#allocation3 + $0x374] sm:$0xf] %v2453_v11  ;;  %v2963_v38 = vshll.u32 %v2645_v50, 16  ;;  %v6061_v7 = vrot.slane %v3139_v53, 9 }
 0x256   : > { %v5486_v32 = vpop.f32.mrf.mxu3  ;;  %v5400_v42 = vpop.f32.mrf.mxu2  ;;  %v5719_v8 = vadd.f32 %v5718_v1, %v5688_v49  ;;  %v3285_v29 = vrot.slane %v3140_v40, 5  ;;  %v3288_v62 = vrot.slane %v3141_v51, 5  ;;  %v2960_v16 = vor.u32 %v2959_v43, %v2955_v5  ;;  %2600 = vst [vmem:[#allocation3 + $0x39c] sm:$0xf] %v2568_v31  ;;  %v7036_v11 = vld [vmem:[#allocation3 + $0x32c] sm:$0xf] }
 0x257   : > { %v5487_v0 = vadd.f32 %v5486_v32, %v5398_v63  ;;  %v2956_v63 = vsel %vm7889_vm13, %v2951_v59, %v2955_v5  ;;  %v5401_v32 = vadd.f32 %v5400_v42, %v5312_v23  ;;  %v2965_v56 = vrot.slane %v2963_v38, 5  ;;  %v6459_v59 = vld [vmem:[#allocation3 + $0x2f0] sm:$0xf]  ;;  %v7033_v42 = vld [vmem:[#allocation3 + $0x310] sm:$0xf0] }
 0x258   : > { %v3286_v26 = vsel %vm7883_vm12, %v6061_v7, %v3285_v29  ;;  %3095 = vst [vmem:[#allocation3 + $0x37c] sm:$0xf] %v2956_v63  ;;  %v6481_v31 = vld [vmem:[#allocation3 + $0x34c] sm:$0xf0]  ;;  %v6488_v23 = vor.u32 %v7041_v3, %v6487_v6  ;;  %v2647_v43 = vld [vmem:[#allocation2 + $0xb8] sm:$0xf] }
 0x259   : > { %v5575_v1 = vpop.f32.mrf.mxu0  ;;  %3367 = vst [vmem:[#allocation3 + $0x380] sm:$0xf] %v3286_v26  ;;  %v8866_v63 = vld [vmem:[#allocation25_spill] sm:$0xff]  ;;  %v2310_v26 = vld [vmem:[#allocation2 + $0xac] sm:$0xf] }
 0x25a   : > { %v5576_v49 = vadd.f32 %v5575_v1, %v5487_v0  ;;  %v5313_v45 = vpop.f32.mrf.mxu1  ;;  %v2961_v0 = vrot.slane %v2960_v16, 4  ;;  %v6460_v1 = vor.u32 %v7033_v42, %v6459_v59  ;;  %v2311_v42 = vld [vmem:[#allocation2 + $0xb0] sm:$0x1] }
 0x25b   : > { %5528 = vmatmul.bf16.gmra.mxu3 %v6456_v48  ;;  %v3287_v48 = vrot.slane %v3285_v29, 4  ;;  %v5314_v7 = vadd.f32 %v5313_v45, %v8866_v63  ;;  %v3142_v63 = vld [vmem:[#allocation2 + $0xb4] sm:$0xe] }
 0x25c   : > { %v5650_v52 = vadd.f32 %v5649_v19, %v5576_v49  ;;  %v5689_v10 = vmul.f32 %v5576_v49, %v5576_v49  ;;  %v7160_v50 = vpack.c.bf16 %v5576_v49, %v8620_v22  ;;  %v2966_v19 = vsel %vm7889_vm13, %v2961_v0, %v2965_v56  ;;  %v2646_v22 = vld [vmem:[#allocation2 + $0xb4] sm:$0xf]  ;;  %v7037_v49 = vld [vmem:[#allocation3 + $0x334] sm:$0xf]  ;;  %v6489_v56 = vld [vmem:[#allocation3 + $0x354] sm:$0xf0] }
 0x25d   : > { %v3289_v5 = vsel %vm7883_vm12, %v3287_v48, %v3288_v62  ;;  %3096 = vst [vmem:[#allocation3 + $0x3a0] sm:$0xf] %v2966_v19  ;;  %v2968_v38 = vshrl.u32 %v2646_v22, 16  ;;  %v2971_v51 = vshll.u32 %v2646_v22, 16  ;;  %v6484_v62 = vor.u32 %v7036_v11, %v6481_v31  ;;  %v2309_v0 = vld [vmem:[#allocation2 + $0xa8] sm:$0xe] }
 0x25e   : > { %v5489_v53 = vpop.f32.mrf.mxu3  ;;  %v5402_v40 = vpop.f32.mrf.mxu2  ;;  %v5720_v18 = vadd.f32 %v5719_v8, %v5689_v10  ;;  %7232 = vst [vmem:[%s8616_s26 + $0x8] sm:$0xff] %v7160_v50   ;;  %v2977_v48 = vshll.u32 %v2647_v43, 16  ;;  %v2459_v10 = vrot.slane %v2310_v26, 5  ;;  %v2981_v11 = vshrl.u32 %v2647_v43, 16  ;;  %v2648_v19 = vld [vmem:[#allocation2 + $0xbc] sm:$0x1] }
 0x25f   : > { %v5490_v15 = vadd.f32 %v5489_v53, %v5401_v32  ;;  %3368 = vst [vmem:[#allocation3 + $0x3a4] sm:$0xf] %v3289_v5  ;;  %v2970_v8 = vrot.slane %v2968_v38, 4  ;;  %v2973_v16 = vrot.slane %v2971_v51, 5  ;;  %v5403_v6 = vadd.f32 %v5402_v40, %v5314_v7  ;;  %v2569_v43 = vld [vmem:[#allocation2 + $0xb4] sm:$0xf] }
 0x260   : > { %v6492_v5 = vor.u32 %v7037_v49, %v6489_v56  ;;  %v2461_v31 = vrot.slane %v2459_v10, 4  ;;  %v3144_v56 = vld [vmem:[#allocation2 + $0xbc] sm:$0x1]  ;;  %v6062_v26 = vrot.slane %v3142_v63, 9  ;;  %2601 = vst [vmem:[#allocation3 + $0x3c0] sm:$0xf] %v2569_v43 }
 0x261   : > { %v5578_v29 = vpop.f32.mrf.mxu0  ;;  %v2974_v50 = vor.u32 %v2973_v16, %v2970_v8  ;;  %v2983_v8 = vrot.slane %v2981_v11, 4  ;;  %v2987_v16 = vshll.u32 %v2648_v19, 16  ;;  %v6495_v19 = vld [vmem:[#allocation3 + $0x338] sm:$0xf] }
 0x262   : > { %v8641_v32 = vadd.f32 %v5578_v29, %v5490_v15  ;;  %v5316_v3 = vpop.f32.mrf.mxu1  ;;  %v6046_v15 = vrot.slane %v2309_v0, 9  ;;  %v6523_v0 = vld [vmem:[#allocation3 + $0x378] sm:$0xf] }
 0x263   : > { %5444 = vmatmul.bf16.gmra.mxu2 %v6488_v23  ;;  %v2462_v23 = vrot.slane %v2311_v42, 5  ;;  %v2975_v51 = vrot.slane %v2974_v50, 4  ;;  %v5317_v49 = vadd.f32 %v5316_v3, %v8269_v47  ;;  %v2989_v47 = vrot.slane %v2987_v16, 5  ;;  %v7050_v3 = vld [vmem:[#allocation3 + $0x398] sm:$0xf0] }
 0x264   : > { %5617 = vmatmul.bf16.gmra.mxu0 %v6460_v1  ;;  %v5651_v59 = vadd.f32 %v5650_v52, %v8641_v32  ;;  %v5690_v45 = vmul.f32 %v8641_v32, %v8641_v32  ;;  %v2979_v1 = vrot.slane %v2977_v48, 5  ;;  %v3143_v52 = vld [vmem:[#allocation2 + $0xb8] sm:$0xf]  ;;  %v2460_v7 = vsel %vm7883_vm12, %v6046_v15, %v2459_v10  ;;  %v6517_v43 = vld [vmem:[#allocation3 + $0x394] sm:$0xf0] }
 0x265   : > { %5355 = vmatmul.bf16.gmra.mxu1 %v6484_v62  ;;  %v2463_v29 = vsel %vm7883_vm12, %v2461_v31, %v2462_v23  ;;  %v2570_v62 = vld [vmem:[#allocation2 + $0xb8] sm:$0xf]  ;;  %2536 = vst [vmem:[#allocation3 + $0x3bc] sm:$0xf] %v2460_v7  ;;  %v3292_v48 = vrot.slane %v3143_v52, 5  ;;  %v3295_v10 = vrot.slane %v3144_v56, 5 }
 0x266   : > { %v5491_v53 = vpop.f32.mrf.mxu3  ;;  %v5405_v40 = vpop.f32.mrf.mxu2  ;;  %v5721_v22 = vadd.f32 %v5720_v18, %v5690_v45  ;;  %2537 = vst [vmem:[#allocation3 + $0x3e0] sm:$0xf] %v2463_v29  ;;  %v2984_v42 = vor.u32 %v2983_v8, %v2979_v1  ;;  %v7045_v52 = vld [vmem:[#allocation3 + $0x374] sm:$0xf] }
 0x267   : > { %v5492_v38 = vadd.f32 %v5491_v53, %v5403_v6  ;;  %v2980_v6 = vsel %vm7889_vm13, %v2975_v51, %v2979_v1  ;;  %v5406_v45 = vadd.f32 %v5405_v40, %v5317_v49  ;;  %2602 = vst [vmem:[#allocation3 + $0x3e4] sm:$0xf] %v2570_v62  ;;  %v3293_v11 = vsel %vm7883_vm12, %v6062_v26, %v3292_v48  ;;  %v7042_v40 = vld [vmem:[#allocation3 + $0x358] sm:$0xf0]  ;;  %v2650_v49 = vld [vmem:[#allocation2 + $0xc4] sm:$0xf] }
 0x268   : > { %3097 = vst [vmem:[#allocation3 + $0x3c4] sm:$0xf] %v2980_v6  ;;  %v6524_v62 = vor.u32 %v7050_v3, %v6523_v0  ;;  %v6496_v56 = vor.u32 %v7042_v40, %v6495_v19  ;;  %v6520_v26 = vor.u32 %v7045_v52, %v6517_v43  ;;  %v3001_v3 = vshll.u32 %v2650_v49, 16  ;;  %v2314_v19 = vld [vmem:[#allocation2 + $0xbc] sm:$0x1] }
 0x269   : > { %v5580_v18 = vpop.f32.mrf.mxu0  ;;  %3369 = vst [vmem:[#allocation3 + $0x3c8] sm:$0xf] %v3293_v11 }
 0x26a   : > { %v5581_v50 = vadd.f32 %v5580_v18, %v5492_v38  ;;  %v5318_v53 = vpop.f32.mrf.mxu1  ;;  %v2985_v38 = vrot.slane %v2984_v42, 4  ;;  %v6525_v42 = vld [vmem:[#allocation3 + $0x39c] sm:$0xf0] }
 0x26b   : > { %5533 = vmatmul.bf16.gmra.mxu3 %v6492_v5  ;;  %v3294_v5 = vrot.slane %v3292_v48, 4  ;;  %v5319_v18 = vadd.f32 %v5318_v53, %v8302_v21  ;;  %v7046_v48 = vld [vmem:[#allocation3 + $0x37c] sm:$0xf] }
 0x26c   : > { %v5652_v15 = vadd.f32 %v5651_v59, %v5581_v50  ;;  %v5691_v31 = vmul.f32 %v5581_v50, %v5581_v50  ;;  %v7165_v23 = vpack.c.bf16 %v5581_v50, %v8641_v32  ;;  %v2990_v59 = vsel %vm7889_vm13, %v2985_v38, %v2989_v47  ;;  %v2649_v32 = vld [vmem:[#allocation2 + $0xc0] sm:$0xf]  ;;  %v2313_v47 = vld [vmem:[#allocation2 + $0xb8] sm:$0xf] }
 0x26d   : > { %v3296_v1 = vsel %vm7883_vm12, %v3294_v5, %v3295_v10  ;;  %3098 = vst [vmem:[#allocation3 + $0x3e8] sm:$0xf] %v2990_v59  ;;  %v2992_v8 = vshrl.u32 %v2649_v32, 16  ;;  %v2995_v16 = vshll.u32 %v2649_v32, 16  ;;  %v2466_v11 = vrot.slane %v2313_v47, 5 }
 0x26e   : > { %v5494_v51 = vpop.f32.mrf.mxu3  ;;  %v5407_v63 = vpop.f32.mrf.mxu2  ;;  %v5722_v7 = vadd.f32 %v5721_v22, %v5691_v31  ;;  %7233 = vst [vmem:[%s8616_s26 + $0x10] sm:$0xff] %v7165_v23   ;;  %v2312_v23 = vld [vmem:[#allocation2 + $0xb4] sm:$0xe]  ;;  %v6528_v38 = vor.u32 %v7046_v48, %v6525_v42  ;;  %v3003_v32 = vrot.slane %v3001_v3, 5 }
 0x26f   : > { %v5495_v29 = vadd.f32 %v5494_v51, %v5406_v45  ;;  %3370 = vst [vmem:[#allocation3 + $0x3ec] sm:$0xf] %v3296_v1  ;;  %v2994_v22 = vrot.slane %v2992_v8, 4  ;;  %v2997_v10 = vrot.slane %v2995_v16, 5  ;;  %v5408_v45 = vadd.f32 %v5407_v63, %v5319_v18  ;;  %v3145_v8 = vld [vmem:[#allocation2 + $0xc0] sm:$0xe] }
 0x270   : > { %v3005_v51 = vshrl.u32 %v2650_v49, 16  ;;  %v6047_v63 = vrot.slane %v2312_v23, 9  ;;  %v2468_v52 = vrot.slane %v2466_v11, 4  ;;  %v2469_v1 = vrot.slane %v2314_v19, 5  ;;  %v2571_v49 = vld [vmem:[#allocation2 + $0xc0] sm:$0xf] }
 0x271   : > { %v5583_v6 = vpop.f32.mrf.mxu0  ;;  %v2998_v5 = vor.u32 %v2997_v10, %v2994_v22  ;;  %v2572_v18 = vld [vmem:[#allocation2 + $0xc4] sm:$0xf]  ;;  %v6063_v42 = vrot.slane %v3145_v8, 9  ;;  %2603 = vst [vmem:[#allocation3 + $0x408] sm:$0xf] %v2571_v49 }
 0x272   : > { %v8662_v50 = vadd.f32 %v5583_v6, %v5495_v29  ;;  %v5321_v0 = vpop.f32.mrf.mxu1  ;;  %v2651_v29 = vld [vmem:[#allocation2 + $0xc8] sm:$0x1]  ;;  %v2467_v16 = vsel %vm7883_vm12, %v6047_v63, %v2466_v11  ;;  %v3007_v48 = vrot.slane %v3005_v51, 4  ;;  %v6531_v23 = vld [vmem:[#allocation3 + $0x380] sm:$0xf] }
 0x273   : > { %5449 = vmatmul.bf16.gmra.mxu2 %v6524_v62  ;;  %v2999_v59 = vrot.slane %v2998_v5, 4  ;;  %v5322_v6 = vadd.f32 %v5321_v0, %v8318_v27  ;;  %2538 = vst [vmem:[#allocation3 + $0x404] sm:$0xf] %v2467_v16  ;;  %v3011_v22 = vshll.u32 %v2651_v29, 16 }
 0x274   : > { %5622 = vmatmul.bf16.gmra.mxu0 %v6496_v56  ;;  %v5653_v31 = vadd.f32 %v5652_v15, %v8662_v50  ;;  %v5692_v21 = vmul.f32 %v8662_v50, %v8662_v50  ;;  %v3146_v15 = vld [vmem:[#allocation2 + $0xc4] sm:$0xf]  ;;  %v2470_v56 = vsel %vm7883_vm12, %v2468_v52, %v2469_v1  ;;  %v3008_v27 = vor.u32 %v3007_v48, %v3003_v32  ;;  %v6561_v41 = vld [vmem:[#allocation3 + $0x3e4] sm:$0xf0] }
 0x275   : > { %5360 = vmatmul.bf16.gmra.mxu1 %v6520_v26  ;;  %v6559_v26 = vld [vmem:[#allocation3 + $0x3c0] sm:$0xf]  ;;  %2539 = vst [vmem:[#allocation3 + $0x428] sm:$0xf] %v2470_v56  ;;  %v3299_v47 = vrot.slane %v3146_v15, 5  ;;  %v3013_v0 = vrot.slane %v3011_v22, 5 }
 0x276   : > { %v5496_v53 = vpop.f32.mrf.mxu3  ;;  %v5410_v40 = vpop.f32.mrf.mxu2  ;;  %v5723_v43 = vadd.f32 %v5722_v7, %v5692_v21  ;;  %v3147_v7 = vld [vmem:[#allocation2 + $0xc8] sm:$0x1]  ;;  %2604 = vst [vmem:[#allocation3 + $0x42c] sm:$0xf] %v2572_v18  ;;  %v6553_v18 = vld [vmem:[#allocation3 + $0x3dc] sm:$0xf0] }
 0x277   : > { %v5497_v62 = vadd.f32 %v5496_v53, %v5408_v45  ;;  %v3004_v45 = vsel %vm7889_vm13, %v2999_v59, %v3003_v32  ;;  %v3302_v3 = vrot.slane %v3147_v7, 5  ;;  %v5411_v5 = vadd.f32 %v5410_v40, %v5322_v6  ;;  %v7059_v53 = vld [vmem:[#allocation3 + $0x3e0] sm:$0xf0]  ;;  %v402_v40 = vld [vmem:[#allocation2 + $0xd4] sm:$0xf] }
 0x278   : > { %v3300_v19 = vsel %vm7883_vm12, %v6063_v42, %v3299_v47  ;;  %v3301_v51 = vrot.slane %v3299_v47, 4  ;;  %3099 = vst [vmem:[#allocation3 + $0x40c] sm:$0xf] %v3004_v45  ;;  %v7051_v59 = vld [vmem:[#allocation3 + $0x3a0] sm:$0xf0]  ;;  %v6560_v15 = vor.u32 %v7059_v53, %v6559_v26  ;;  %v403_v48 = vsel %vm7710_vm7, 0, %v402_v40 }
 0x279   : > { %v5585_v10 = vpop.f32.mrf.mxu0  ;;  %v7054_v32 = vld [vmem:[#allocation3 + $0x3bc] sm:$0xf]  ;;  %3371 = vst [vmem:[#allocation3 + $0x410] sm:$0xf] %v3300_v19  ;;  %v2653_v6 = vld [vmem:[#allocation2 + $0xd0] sm:$0xf]  ;;  %v6532_v7 = vor.u32 %v7051_v59, %v6531_v23 }
 0x27a   : > { %v5586_v11 = vadd.f32 %v5585_v10, %v5497_v62  ;;  %v5323_v21 = vpop.f32.mrf.mxu1  ;;  %v3009_v62 = vrot.slane %v3008_v27, 4  ;;  %v3303_v16 = vsel %vm7883_vm12, %v3301_v51, %v3302_v3  ;;  %v3025_v26 = vshll.u32 %v2653_v6, 16  ;;  %v7055_v42 = vld [vmem:[#allocation3 + $0x3c4] sm:$0xf]  ;;  %v2316_v53 = vld [vmem:[#allocation2 + $0xc4] sm:$0xf] }
 0x27b   : > { %5538 = vmatmul.bf16.gmra.mxu3 %v6528_v38  ;;  %v345_v38 = vld [vmem:[#allocation2 + $0xcc] sm:$0x1]  ;;  %v3029_v22 = vshrl.u32 %v2653_v6, 16  ;;  %v5324_v10 = vadd.f32 %v5323_v21, %v8334_v44  ;;  %3372 = vst [vmem:[#allocation3 + $0x434] sm:$0xf] %v3303_v16  ;;  %v6556_v45 = vor.u32 %v7054_v32, %v6553_v18  ;;  %v2473_v27 = vrot.slane %v2316_v53, 5 }
 0x27c   : > { %v5654_v63 = vadd.f32 %v5653_v31, %v5586_v11  ;;  %v5693_v52 = vmul.f32 %v5586_v11, %v5586_v11  ;;  %v7170_v1 = vpack.c.bf16 %v5586_v11, %v8662_v50  ;;  %v3014_v31 = vsel %vm7889_vm13, %v3009_v62, %v3013_v0  ;;  %404 = vst [vmem:[#allocation2 + $0xd4] sm:$0xf] %v403_v48  ;;  %v2315_v19 = vld [vmem:[#allocation2 + $0xc0] sm:$0xe]  ;;  %v2317_v51 = vld [vmem:[#allocation2 + $0xc8] sm:$0x1] }
 0x27d   : > { %v346_v50 = vsel %vm7682_vm2, 0, %v345_v38  ;;  %3100 = vst [vmem:[#allocation3 + $0x430] sm:$0xf] %v3014_v31  ;;  %v8687_v47 = vrot.slane %v3025_v26, 5  ;;  %v3031_v3 = vrot.slane %v3029_v22, 4  ;;  %v6564_v38 = vor.u32 %v7055_v42, %v6561_v41 }
 0x27e   : > { %v5499_v29 = vpop.f32.mrf.mxu3  ;;  %v5412_v8 = vpop.f32.mrf.mxu2  ;;  %v5724_v56 = vadd.f32 %v5723_v43, %v5693_v52  ;;  %7234 = vst [vmem:[%s8616_s26 + $0x18] sm:$0xff] %v7170_v1   ;;  %v6048_v1 = vrot.slane %v2315_v19, 9  ;;  %v2476_v62 = vrot.slane %v2317_v51, 5  ;;  %v3149_v40 = vld [vmem:[#allocation2 + $0xd0] sm:$0xf] }
 0x27f   : > { %v5500_v49 = vadd.f32 %v5499_v29, %v5411_v5  ;;  %347 = vst [vmem:[#allocation2 + $0xcc] sm:$0x1] %v346_v50  ;;  %v5413_v11 = vadd.f32 %v5412_v8, %v5324_v10  ;;  %v3032_v0 = vor.u32 %v3031_v3, %v8687_v47  ;;  %v2475_v29 = vrot.slane %v2473_v27, 4  ;;  %v3148_v32 = vld [vmem:[#allocation2 + $0xcc] sm:$0xe] }
 0x280   : > { %v6064_v31 = vrot.slane %v3148_v32, 9  ;;  %v7068_v22 = vld [vmem:[#allocation3 + $0x428] sm:$0xf0] }
 0x281   : > { %v5588_v43 = vpop.f32.mrf.mxu0  ;;  %v2477_v16 = vsel %vm7883_vm12, %v2475_v29, %v2476_v62  ;;  %v3033_v18 = vrot.slane %v3032_v0, 4  ;;  %v7060_v29 = vld [vmem:[#allocation3 + $0x3e8] sm:$0xf0] }
 0x282   : > { %v8689_v2 = vadd.f32 %v5588_v43, %v5500_v49  ;;  %v5326_v5 = vpop.f32.mrf.mxu1  ;;  %v2574_v49 = vld [vmem:[#allocation2 + $0xd0] sm:$0xf]  ;;  %2541 = vst [vmem:[#allocation3 + $0x470] sm:$0xf] %v2477_v16 }
 0x283   : > { %5454 = vmatmul.bf16.gmra.mxu2 %v6560_v15  ;;  %v3306_v15 = vrot.slane %v3149_v40, 5  ;;  %v5327_v50 = vadd.f32 %v5326_v5, %v8362_v13  ;;  %v3150_v13 = vld [vmem:[#allocation2 + $0xd4] sm:$0x1]  ;;  %2606 = vst [vmem:[#allocation3 + $0x474] sm:$0xf] %v2574_v49 }
 0x284   : > { %5627 = vmatmul.bf16.gmra.mxu0 %v6532_v7  ;;  %v5655_v44 = vadd.f32 %v5654_v63, %v8689_v2  ;;  %v5694_v21 = vmul.f32 %v8689_v2, %v8689_v2  ;;  %v2474_v63 = vsel %vm7883_vm12, %v6048_v1, %v2473_v27  ;;  %v2654_v7 = vld [vmem:[#allocation2 + $0xd4] sm:$0x1]  ;;  %v3309_v0 = vrot.slane %v3150_v13, 5  ;;  %v6567_v1 = vld [vmem:[#allocation3 + $0x3c8] sm:$0xf] }
 0x285   : > { %5365 = vmatmul.bf16.gmra.mxu1 %v6556_v45  ;;  %2540 = vst [vmem:[#allocation3 + $0x44c] sm:$0xf] %v2474_v63  ;;  %v3307_v45 = vsel %vm7883_vm12, %v6064_v31, %v3306_v15  ;;  %v3035_v41 = vshll.u32 %v2654_v7, 16  ;;  %v3308_v5 = vrot.slane %v3306_v15, 4  ;;  %v7063_v15 = vld [vmem:[#allocation3 + $0x404] sm:$0xf]  ;;  %v6568_v49 = vor.u32 %v7060_v29, %v6567_v1 }
 0x286   : > { %v5501_v23 = vpop.f32.mrf.mxu3  ;;  %v5415_v52 = vpop.f32.mrf.mxu2  ;;  %v5725_v59 = vadd.f32 %v5724_v56, %v5694_v21  ;;  %v2573_v6 = vld [vmem:[#allocation2 + $0xcc] sm:$0xf]  ;;  %v6595_v56 = vld [vmem:[#allocation3 + $0x408] sm:$0xf]  ;;  %3373 = vst [vmem:[#allocation3 + $0x458] sm:$0xf] %v3307_v45 }
 0x287   : > { %v5502_v8 = vadd.f32 %v5501_v23, %v5413_v11  ;;  %v2652_v48 = vld [vmem:[#allocation2 + $0xcc] sm:$0xf]  ;;  %v5416_v3 = vadd.f32 %v5415_v52, %v5327_v50  ;;  %2605 = vst [vmem:[#allocation3 + $0x450] sm:$0xf] %v2573_v6  ;;  %v3310_v40 = vsel %vm7883_vm12, %v3308_v5, %v3309_v0  ;;  %v6589_v63 = vld [vmem:[#allocation3 + $0x424] sm:$0xf0]  ;;  %v6596_v16 = vor.u32 %v7068_v22, %v6595_v56 }
 0x288   : > { %v3016_v10 = vshrl.u32 %v2652_v48, 16  ;;  %v3019_v43 = vshll.u32 %v2652_v48, 16  ;;  %3374 = vst [vmem:[#allocation3 + $0x47c] sm:$0xf] %v3310_v40  ;;  %v6592_v6 = vor.u32 %v7063_v15, %v6589_v63  ;;  %v7064_v56 = vld [vmem:[#allocation3 + $0x40c] sm:$0xf] }
 0x289   : > { %v5590_v26 = vpop.f32.mrf.mxu0  ;;  %v6597_v22 = vld [vmem:[#allocation3 + $0x42c] sm:$0xf0] }
 0x28a   : > { %v5591_v42 = vadd.f32 %v5590_v26, %v5502_v8  ;;  %v5328_v11 = vpop.f32.mrf.mxu1  ;;  %v3018_v53 = vrot.slane %v3016_v10, 4  ;;  %v3021_v27 = vrot.slane %v3019_v43, 5  ;;  %v7077_v5 = vld [vmem:[#allocation3 + $0x470] sm:$0xf0] }
 0x28b   : > { %5543 = vmatmul.bf16.gmra.mxu3 %v6564_v38  ;;  %v3037_v38 = vrot.slane %v3035_v41, 5  ;;  %v5329_v31 = vadd.f32 %v5328_v11, %v8384_v39  ;;  %v6600_v39 = vor.u32 %v7064_v56, %v6597_v22 }
 0x28c   : > { %v5656_v21 = vadd.f32 %v5655_v44, %v5591_v42  ;;  %v5695_v23 = vmul.f32 %v5591_v42, %v5591_v42  ;;  %v7175_v19 = vpack.c.bf16 %v5591_v42, %v8689_v2  ;;  %v3022_v62 = vor.u32 %v3021_v27, %v3018_v53  ;;  %v7072_v29 = vld [vmem:[#allocation3 + $0x44c] sm:$0xf] }
 0x28d   : > { %v3038_v44 = vsel %vm7889_vm13, %v3033_v18, %v3037_v38 }
 0x28e   : > { %v5504_v51 = vpop.f32.mrf.mxu3  ;;  %v5417_v52 = vpop.f32.mrf.mxu2  ;;  %v5726_v8 = vadd.f32 %v5725_v59, %v5695_v23  ;;  %7235 = vst [vmem:[%s8616_s26 + $0x20] sm:$0xff] %v7175_v19   ;;  %v3023_v2 = vrot.slane %v3022_v62, 4  ;;  %v6631_v13 = vld [vmem:[#allocation3 + $0x450] sm:$0xf]  ;;  %v7069_v19 = vld [vmem:[#allocation3 + $0x430] sm:$0xf0] }
 0x28f   : > { %v5505_v32 = vadd.f32 %v5504_v51, %v5416_v3  ;;  %3102 = vst [vmem:[#allocation3 + $0x478] sm:$0xf] %v3038_v44  ;;  %v5418_v48 = vadd.f32 %v5417_v52, %v5329_v31  ;;  %v6603_v23 = vld [vmem:[#allocation3 + $0x410] sm:$0xf]  ;;  %v6632_v52 = vor.u32 %v7077_v5, %v6631_v13 }
 0x290   : > { %v3028_v28 = vsel %vm7889_vm13, %v3023_v2, %v8687_v47  ;;  %v6604_v62 = vor.u32 %v7069_v19, %v6603_v23 }
 0x291   : > { %v5593_v50 = vpop.f32.mrf.mxu0  ;;  %3101 = vst [vmem:[#allocation3 + $0x454] sm:$0xf] %v3028_v28 }
 0x292   : > { %v5594_v59 = vadd.f32 %v5593_v50, %v5505_v32  ;;  %v5331_v26 = vpop.f32.mrf.mxu1 }
 0x293   : > { %5459 = vmatmul.bf16.gmra.mxu2 %v6596_v16  ;;  %v5332_v3 = vadd.f32 %v5331_v26, %v8392_v57  ;;  %v6625_v57 = vld [vmem:[#allocation3 + $0x46c] sm:$0xf0] }
 0x294   : > { %5632 = vmatmul.bf16.gmra.mxu0 %v6568_v49  ;;  %v5657_v18 = vadd.f32 %v5656_v21, %v5594_v59  ;;  %v5696_v7 = vmul.f32 %v5594_v59, %v5594_v59  ;;  %v6628_v32 = vor.u32 %v7072_v29, %v6625_v57 }
 0x295   : > { %5370 = vmatmul.bf16.gmra.mxu1 %v6592_v6 }
 0x296   : > { %v5506_v10 = vpop.f32.mrf.mxu3  ;;  %v5420_v43 = vpop.f32.mrf.mxu2  ;;  %v5727_v45 = vadd.f32 %v5726_v8, %v5696_v7  ;;  %v6633_v2 = vld [vmem:[#allocation3 + $0x474] sm:$0xf0] }
 0x297   : > { %v5507_v42 = vadd.f32 %v5506_v10, %v5418_v48  ;;  %v5421_v11 = vadd.f32 %v5420_v43, %v5332_v3 }
 0x298   : > { %v7073_v44 = vld [vmem:[#allocation3 + $0x454] sm:$0xf] }
 0x299   : > { %v5595_v34 = vpop.f32.mrf.mxu0  ;;  %v6636_v6 = vor.u32 %v7073_v44, %v6633_v2 }
 0x29a   : > { %v5596_v47 = vadd.f32 %v5595_v34, %v5507_v42  ;;  %v5333_v41 = vpop.f32.mrf.mxu1  ;;  %v7078_v42 = vld [vmem:[#allocation3 + $0x478] sm:$0xf0] }
 0x29b   : > { %5548 = vmatmul.bf16.gmra.mxu3 %v6600_v39  ;;  %v5334_v40 = vadd.f32 %v5333_v41, %v8407_v55 }
 0x29c   : > { %v5658_v53 = vadd.f32 %v5657_v18, %v5596_v47  ;;  %v5697_v27 = vmul.f32 %v5596_v47, %v5596_v47  ;;  %v7180_v0 = vpack.c.bf16 %v5596_v47, %v5594_v59 }
 0x29e   : > { %v5509_v21 = vpop.f32.mrf.mxu3  ;;  %v5422_v51 = vpop.f32.mrf.mxu2  ;;  %v5728_v38 = vadd.f32 %v5727_v45, %v5697_v27  ;;  %7236 = vst [vmem:[%s8616_s26 + $0x28] sm:$0xff] %v7180_v0   ;;  %v6639_v45 = vld [vmem:[#allocation3 + $0x458] sm:$0xf] }
 0x29f   : > { %v5510_v1 = vadd.f32 %v5509_v21, %v5421_v11  ;;  %v5423_v63 = vadd.f32 %v5422_v51, %v5334_v40  ;;  %v6640_v11 = vor.u32 %v7078_v42, %v6639_v45 }
 0x2a1   : > { %v5598_v8 = vpop.f32.mrf.mxu0 }
 0x2a2   : > { %v5599_v15 = vadd.f32 %v5598_v8, %v5510_v1  ;;  %v5336_v16 = vpop.f32.mrf.mxu1 }
 0x2a3   : > { %5464 = vmatmul.bf16.gmra.mxu2 %v6632_v52  ;;  %v5337_v55 = vadd.f32 %v5336_v16, %v8417_v24 }
 0x2a4   : > { %5637 = vmatmul.bf16.gmra.mxu0 %v6604_v62  ;;  %v5659_v49 = vadd.f32 %v5658_v53, %v5599_v15  ;;  %v5698_v31 = vmul.f32 %v5599_v15, %v5599_v15 }
 0x2a5   : > { %5375 = vmatmul.bf16.gmra.mxu1 %v6628_v32 }
 0x2a6   : > { %v5511_v50 = vpop.f32.mrf.mxu3  ;;  %v5425_v28 = vpop.f32.mrf.mxu2  ;;  %v5729_v59 = vadd.f32 %v5728_v38, %v5698_v31 }
 0x2a7   : > { %v5512_v48 = vadd.f32 %v5511_v50, %v5423_v63  ;;  %v5426_v22 = vadd.f32 %v5425_v28, %v5337_v55 }
 0x2a9   : > { %v5600_v26 = vpop.f32.mrf.mxu0 }
 0x2aa   : > { %v5601_v56 = vadd.f32 %v5600_v26, %v5512_v48  ;;  %v5338_v18 = vpop.f32.mrf.mxu1 }
 0x2ab   : > { %5553 = vmatmul.bf16.gmra.mxu3 %v6636_v6  ;;  %v5339_v41 = vadd.f32 %v5338_v18, %v8429_v30 }
 0x2ac   : > { %v5660_v7 = vadd.f32 %v5659_v49, %v5601_v56  ;;  %v5699_v10 = vmul.f32 %v5601_v56, %v5601_v56  ;;  %v7185_v39 = vpack.c.bf16 %v5601_v56, %v5599_v15 }
 0x2ae   : > { %v5514_v43 = vpop.f32.mrf.mxu3  ;;  %v5427_v3 = vpop.f32.mrf.mxu2  ;;  %v5730_v34 = vadd.f32 %v5729_v59, %v5699_v10  ;;  %7237 = vst [vmem:[%s8616_s26 + $0x30] sm:$0xff] %v7185_v39  }
 0x2af   : > { %v5515_v47 = vadd.f32 %v5514_v43, %v5426_v22  ;;  %v5428_v5 = vadd.f32 %v5427_v3, %v5339_v41 }
 0x2b1   : > { %v5603_v13 = vpop.f32.mrf.mxu0 }
 0x2b2   : > { %v5604_v24 = vadd.f32 %v5603_v13, %v5515_v47  ;;  %v5341_v53 = vpop.f32.mrf.mxu1 }
 0x2b3   : > { %v5342_v38 = vadd.f32 %v5341_v53, %v8436_v37 }
 0x2b4   : > { %5642 = vmatmul.bf16.gmra.mxu0 %v6640_v11  ;;  %v5661_v27 = vadd.f32 %v5660_v7, %v5604_v24  ;;  %v5700_v0 = vmul.f32 %v5604_v24, %v5604_v24 }
 0x2b6   : > { %v5516_v21 = vpop.f32.mrf.mxu3  ;;  %v5430_v23 = vpop.f32.mrf.mxu2  ;;  %v5731_v19 = vadd.f32 %v5730_v34, %v5700_v0 }
 0x2b7   : > { %v5517_v51 = vadd.f32 %v5516_v21, %v5428_v5  ;;  %v5431_v57 = vadd.f32 %v5430_v23, %v5342_v38 }
 0x2b9   : > { %v5605_v1 = vpop.f32.mrf.mxu0 }
 0x2ba   : > { %v5606_v29 = vadd.f32 %v5605_v1, %v5517_v51  ;;  %v5343_v52 = vpop.f32.mrf.mxu1 }
 0x2bb   : > { %v5344_v16 = vadd.f32 %v5343_v52, %v8449_v33 }
 0x2bc   : > { %v5662_v62 = vadd.f32 %v5661_v27, %v5606_v29  ;;  %v5701_v30 = vmul.f32 %v5606_v29, %v5606_v29  ;;  %v7190_v40 = vpack.c.bf16 %v5606_v29, %v5604_v24 }
 0x2be   : > { %v5519_v8 = vpop.f32.mrf.mxu3  ;;  %v5432_v32 = vpop.f32.mrf.mxu2  ;;  %v5732_v15 = vadd.f32 %v5731_v19, %v5701_v30  ;;  %7238 = vst [vmem:[%s8616_s26 + $0x38] sm:$0xff] %v7190_v40  }
 0x2bf   : > { %v5520_v63 = vadd.f32 %v5519_v8, %v5431_v57  ;;  %v5433_v49 = vadd.f32 %v5432_v32, %v5344_v16 }
 0x2c1   : > { %v5608_v44 = vpop.f32.mrf.mxu0 }
 0x2c2   : > { %v5609_v2 = vadd.f32 %v5608_v44, %v5520_v63  ;;  %v5346_v31 = vpop.f32.mrf.mxu1 }
 0x2c3   : > { %v5347_v55 = vadd.f32 %v5346_v31, %v8462_v60 }
 0x2c4   : > { %v5663_v50 = vadd.f32 %v5662_v62, %v5609_v2  ;;  %v5702_v37 = vmul.f32 %v5609_v2, %v5609_v2 }
 0x2c6   : > { %v5521_v6 = vpop.f32.mrf.mxu3  ;;  %v5435_v28 = vpop.f32.mrf.mxu2  ;;  %v5733_v59 = vadd.f32 %v5732_v15, %v5702_v37 }
 0x2c7   : > { %v5522_v48 = vadd.f32 %v5521_v6, %v5433_v49  ;;  %v5436_v22 = vadd.f32 %v5435_v28, %v5347_v55 }
 0x2c9   : > { %v5610_v26 = vpop.f32.mrf.mxu0 }
 0x2ca   : > { %v5611_v56 = vadd.f32 %v5610_v26, %v5522_v48  ;;  %v5348_v18 = vpop.f32.mrf.mxu1 }
 0x2cb   : > { %v5349_v3 = vadd.f32 %v5348_v18, %v8472_v12 }
 0x2cc   : > { %v5664_v7 = vadd.f32 %v5663_v50, %v5611_v56  ;;  %v5703_v10 = vmul.f32 %v5611_v56, %v5611_v56  ;;  %v7195_v33 = vpack.c.bf16 %v5611_v56, %v5609_v2 }
 0x2ce   : > { %v5524_v39 = vpop.f32.mrf.mxu3  ;;  %v5437_v43 = vpop.f32.mrf.mxu2  ;;  %v5734_v45 = vadd.f32 %v5733_v59, %v5703_v10  ;;  %7239 = vst [vmem:[%s8616_s26 + $0x40] sm:$0xff] %v7195_v33  }
 0x2cf   : > { %v5525_v42 = vadd.f32 %v5524_v39, %v5436_v22  ;;  %v5438_v11 = vadd.f32 %v5437_v43, %v5349_v3 }
 0x2d1   : > { %v5613_v34 = vpop.f32.mrf.mxu0 }
 0x2d2   : > { %v5614_v47 = vadd.f32 %v5613_v34, %v5525_v42  ;;  %v5351_v41 = vpop.f32.mrf.mxu1 }
 0x2d3   : > { %v5352_v0 = vadd.f32 %v5351_v41, %v8483_v61 }
 0x2d4   : > { %v5665_v13 = vadd.f32 %v5664_v7, %v5614_v47  ;;  %v5704_v60 = vmul.f32 %v5614_v47, %v5614_v47 }
 0x2d6   : > { %v5526_v24 = vpop.f32.mrf.mxu3  ;;  %v5440_v5 = vpop.f32.mrf.mxu2  ;;  %v5735_v53 = vadd.f32 %v5734_v45, %v5704_v60 }
 0x2d7   : > { %v5527_v27 = vadd.f32 %v5526_v24, %v5438_v11  ;;  %v5441_v19 = vadd.f32 %v5440_v5, %v5352_v0 }
 0x2d9   : > { %v5615_v21 = vpop.f32.mrf.mxu0 }
 0x2da   : > { %v5616_v23 = vadd.f32 %v5615_v21, %v5527_v27  ;;  %v5353_v51 = vpop.f32.mrf.mxu1 }
 0x2db   : > { %v5354_v30 = vadd.f32 %v5353_v51, %v8490_v14 }
 0x2dc   : > { %v5666_v38 = vadd.f32 %v5665_v13, %v5616_v23  ;;  %v5705_v1 = vmul.f32 %v5616_v23, %v5616_v23  ;;  %v7200_v12 = vpack.c.bf16 %v5616_v23, %v5614_v47 }
 0x2de   : > { %v5529_v29 = vpop.f32.mrf.mxu3  ;;  %v5442_v57 = vpop.f32.mrf.mxu2  ;;  %v5736_v52 = vadd.f32 %v5735_v53, %v5705_v1  ;;  %7240 = vst [vmem:[%s8616_s26 + $0x48] sm:$0xff] %v7200_v12  }
 0x2df   : > { %v5530_v62 = vadd.f32 %v5529_v29, %v5441_v19  ;;  %v5443_v32 = vadd.f32 %v5442_v57, %v5354_v30 }
 0x2e1   : > { %v5618_v40 = vpop.f32.mrf.mxu0 }
 0x2e2   : > { %v5619_v8 = vadd.f32 %v5618_v40, %v5530_v62  ;;  %v5356_v15 = vpop.f32.mrf.mxu1 }
 0x2e3   : > { %v5357_v31 = vadd.f32 %v5356_v15, %v8503_v17 }
 0x2e4   : > { %v5667_v63 = vadd.f32 %v5666_v38, %v5619_v8  ;;  %v5706_v61 = vmul.f32 %v5619_v8, %v5619_v8 }
 0x2e6   : > { %v5531_v16 = vpop.f32.mrf.mxu3  ;;  %v5445_v44 = vpop.f32.mrf.mxu2  ;;  %v5737_v2 = vadd.f32 %v5736_v52, %v5706_v61 }
 0x2e7   : > { %v5532_v49 = vadd.f32 %v5531_v16, %v5443_v32  ;;  %v5446_v6 = vadd.f32 %v5445_v44, %v5357_v31 }
 0x2e9   : > { %v5620_v50 = vpop.f32.mrf.mxu0 }
 0x2ea   : > { %v5621_v37 = vadd.f32 %v5620_v50, %v5532_v49  ;;  %v5358_v28 = vpop.f32.mrf.mxu1 }
 0x2eb   : > { %v5359_v18 = vadd.f32 %v5358_v28, %v8516_v4 }
 0x2ec   : > { %v5668_v59 = vadd.f32 %v5667_v63, %v5621_v37  ;;  %v5707_v48 = vmul.f32 %v5621_v37, %v5621_v37  ;;  %v7205_v14 = vpack.c.bf16 %v5621_v37, %v5619_v8 }
 0x2ee   : > { %v5534_v55 = vpop.f32.mrf.mxu3  ;;  %v5447_v26 = vpop.f32.mrf.mxu2  ;;  %v5738_v56 = vadd.f32 %v5737_v2, %v5707_v48  ;;  %7241 = vst [vmem:[%s8616_s26 + $0x50] sm:$0xff] %v7205_v14  }
 0x2ef   : > { %v5535_v22 = vadd.f32 %v5534_v55, %v5446_v6  ;;  %v5448_v33 = vadd.f32 %v5447_v26, %v5359_v18 }
 0x2f1   : > { %v5623_v7 = vpop.f32.mrf.mxu0 }
 0x2f2   : > { %v5624_v10 = vadd.f32 %v5623_v7, %v5535_v22  ;;  %v5361_v39 = vpop.f32.mrf.mxu1 }
 0x2f3   : > { %v5362_v47 = vadd.f32 %v5361_v39, %v8527_v36 }
 0x2f4   : > { %v5669_v43 = vadd.f32 %v5668_v59, %v5624_v10  ;;  %v5708_v17 = vmul.f32 %v5624_v10, %v5624_v10 }
 0x2f6   : > { %v5536_v45 = vpop.f32.mrf.mxu3  ;;  %v5450_v42 = vpop.f32.mrf.mxu2  ;;  %v5739_v3 = vadd.f32 %v5738_v56, %v5708_v17 }
 0x2f7   : > { %v5537_v34 = vadd.f32 %v5536_v45, %v5448_v33  ;;  %v5451_v13 = vadd.f32 %v5450_v42, %v5362_v47 }
 0x2f9   : > { %v5625_v11 = vpop.f32.mrf.mxu0 }
 0x2fa   : > { %v5626_v41 = vadd.f32 %v5625_v11, %v5537_v34  ;;  %v5363_v60 = vpop.f32.mrf.mxu1 }
 0x2fb   : > { %v5364_v23 = vadd.f32 %v5363_v60, %v8537_v20 }
 0x2fc   : > { %v5670_v24 = vadd.f32 %v5669_v43, %v5626_v41  ;;  %v5709_v5 = vmul.f32 %v5626_v41, %v5626_v41  ;;  %v7210_v4 = vpack.c.bf16 %v5626_v41, %v5624_v10 }
 0x2fe   : > { %v5539_v53 = vpop.f32.mrf.mxu3  ;;  %v5452_v27 = vpop.f32.mrf.mxu2  ;;  %v5740_v0 = vadd.f32 %v5739_v3, %v5709_v5  ;;  %7242 = vst [vmem:[%s8616_s26 + $0x58] sm:$0xff] %v7210_v4  }
 0x2ff   : > { %v5540_v21 = vadd.f32 %v5539_v53, %v5451_v13  ;;  %v5453_v38 = vadd.f32 %v5452_v27, %v5364_v23 }
 0x301   : > { %v5628_v19 = vpop.f32.mrf.mxu0 }
 0x302   : > { %v5629_v51 = vadd.f32 %v5628_v19, %v5540_v21  ;;  %v5366_v1 = vpop.f32.mrf.mxu1 }
 0x303   : > { %v5367_v30 = vadd.f32 %v5366_v1, %v8546_v54 }
 0x304   : > { %v5671_v12 = vadd.f32 %v5670_v24, %v5629_v51  ;;  %v5710_v36 = vmul.f32 %v5629_v51, %v5629_v51 }
 0x306   : > { %v5541_v29 = vpop.f32.mrf.mxu3  ;;  %v5455_v57 = vpop.f32.mrf.mxu2  ;;  %v5741_v52 = vadd.f32 %v5740_v0, %v5710_v36 }
 0x307   : > { %v5542_v62 = vadd.f32 %v5541_v29, %v5453_v38  ;;  %v5456_v32 = vadd.f32 %v5455_v57, %v5367_v30 }
 0x309   : > { %v5630_v40 = vpop.f32.mrf.mxu0 }
 0x30a   : > { %v5631_v8 = vadd.f32 %v5630_v40, %v5542_v62  ;;  %v5368_v15 = vpop.f32.mrf.mxu1 }
 0x30b   : > { %v5369_v31 = vadd.f32 %v5368_v15, %v8555_v35 }
 0x30c   : > { %v5672_v63 = vadd.f32 %v5671_v12, %v5631_v8  ;;  %v5711_v61 = vmul.f32 %v5631_v8, %v5631_v8  ;;  %v7215_v20 = vpack.c.bf16 %v5631_v8, %v5629_v51 }
 0x30e   : > { %v5544_v16 = vpop.f32.mrf.mxu3  ;;  %v5457_v44 = vpop.f32.mrf.mxu2  ;;  %v5742_v2 = vadd.f32 %v5741_v52, %v5711_v61  ;;  %7243 = vst [vmem:[%s8616_s26 + $0x60] sm:$0xff] %v7215_v20  }
 0x30f   : > { %v5545_v49 = vadd.f32 %v5544_v16, %v5456_v32  ;;  %v5458_v6 = vadd.f32 %v5457_v44, %v5369_v31 }
 0x311   : > { %v5633_v50 = vpop.f32.mrf.mxu0 }
 0x312   : > { %v5634_v37 = vadd.f32 %v5633_v50, %v5545_v49  ;;  %v5371_v28 = vpop.f32.mrf.mxu1 }
 0x313   : > { %v5372_v56 = vadd.f32 %v5371_v28, %v8564_v9 }
 0x314   : > { %v5673_v59 = vadd.f32 %v5672_v63, %v5634_v37  ;;  %v5712_v54 = vmul.f32 %v5634_v37, %v5634_v37 }
 0x316   : > { %v5546_v48 = vpop.f32.mrf.mxu3  ;;  %v5460_v14 = vpop.f32.mrf.mxu2  ;;  %v5743_v55 = vadd.f32 %v5742_v2, %v5712_v54 }
 0x317   : > { %v5547_v26 = vadd.f32 %v5546_v48, %v5458_v6  ;;  %v5461_v7 = vadd.f32 %v5460_v14, %v5372_v56 }
 0x319   : > { %v5635_v22 = vpop.f32.mrf.mxu0 }
 0x31a   : > { %v5636_v18 = vadd.f32 %v5635_v22, %v5547_v26  ;;  %v5373_v10 = vpop.f32.mrf.mxu1 }
 0x31b   : > { %v5374_v3 = vadd.f32 %v5373_v10, %v8573_v46 }
 0x31c   : > { %v5674_v33 = vadd.f32 %v5673_v59, %v5636_v18  ;;  %v5713_v39 = vmul.f32 %v5636_v18, %v5636_v18  ;;  %v7220_v35 = vpack.c.bf16 %v5636_v18, %v5634_v37 }
 0x31e   : > { %v5549_v43 = vpop.f32.mrf.mxu3  ;;  %v5462_v17 = vpop.f32.mrf.mxu2  ;;  %v5744_v45 = vadd.f32 %v5743_v55, %v5713_v39  ;;  %7244 = vst [vmem:[%s8616_s26 + $0x68] sm:$0xff] %v7220_v35  }
 0x31f   : > { %v5550_v42 = vadd.f32 %v5549_v43, %v5461_v7  ;;  %v5463_v11 = vadd.f32 %v5462_v17, %v5374_v3 }
 0x321   : > { %v5638_v34 = vpop.f32.mrf.mxu0 }
 0x322   : > { %v5639_v47 = vadd.f32 %v5638_v34, %v5550_v42  ;;  %v5376_v41 = vpop.f32.mrf.mxu1 }
 0x323   : > { %v5377_v53 = vadd.f32 %v5376_v41, %v8582_v25 }
 0x324   : > { %v5675_v13 = vadd.f32 %v5674_v33, %v5639_v47  ;;  %v5714_v9 = vmul.f32 %v5639_v47, %v5639_v47 }
 0x326   : > { %v5551_v60 = vpop.f32.mrf.mxu3  ;;  %v5465_v24 = vpop.f32.mrf.mxu2  ;;  %v5745_v5 = vadd.f32 %v5744_v45, %v5714_v9 }
 0x327   : > { %v5552_v4 = vadd.f32 %v5551_v60, %v5463_v11  ;;  %v5466_v21 = vadd.f32 %v5465_v24, %v5377_v53 }
 0x329   : > { %v5640_v27 = vpop.f32.mrf.mxu0 }
 0x32a   : > { %v5641_v0 = vadd.f32 %v5640_v27, %v5552_v4  ;;  %v5378_v38 = vpop.f32.mrf.mxu1 }
 0x32b   : > { %v5379_v29 = vadd.f32 %v5378_v38, %v8590_v58 }
 0x32c   : > { %v5676_v23 = vadd.f32 %v5675_v13, %v5641_v0  ;;  %v5715_v19 = vmul.f32 %v5641_v0, %v5641_v0  ;;  %v7225_v46 = vpack.c.bf16 %v5641_v0, %v5639_v47 }
 0x32e   : > { %v5554_v51 = vpop.f32.mrf.mxu3  ;;  %v5746_v1 = vadd.f32 %v5745_v5, %v5715_v19  ;;  %7245 = vst [vmem:[%s8616_s26 + $0x70] sm:$0xff] %v7225_v46   ;;  %v5467_v36 = vpop.f32.mrf.mxu2 }
 0x32f   : > { %v5555_v12 = vadd.f32 %v5554_v51, %v5466_v21  ;;  %v5468_v62 = vadd.f32 %v5467_v36, %v5379_v29 }
 0x331   : > { %v5643_v57 = vpop.f32.mrf.mxu0 }
 0x332   : > { %v5644_v52 = vadd.f32 %v5643_v57, %v5555_v12 }
 0x334   : > { %v5677_v25 = vadd.f32 %v5676_v23, %v5644_v52  ;;  %v5716_v30 = vmul.f32 %v5644_v52, %v5644_v52 }
 0x336   : > { %v5556_v40 = vpop.f32.mrf.mxu3  ;;  %v5747_v8 = vadd.f32 %v5746_v1, %v5716_v30 }
 0x337   : > { %v5557_v32 = vadd.f32 %v5556_v40, %v5468_v62 }
 0x339   : > { %v5645_v15 = vpop.f32.mrf.mxu0 }
 0x33a   : > { %v5646_v58 = vadd.f32 %v5645_v15, %v5557_v32 }
 0x33c   : > { %v5678_v63 = vadd.f32 %v5677_v25, %v5646_v58  ;;  %v5717_v61 = vmul.f32 %v5646_v58, %v5646_v58  ;;  %v7230_v20 = vpack.c.bf16 %v5646_v58, %v5644_v52 }
 0x33e   : > { %v5679_v16 = vrot.slane %v5678_v63, 4  ;;  %v5748_v44 = vadd.f32 %v5747_v8, %v5717_v61  ;;  %7246 = vst [vmem:[%s8616_s26 + $0x78] sm:$0xff] %v7230_v20  }
 0x33f   : > { %7432 = shalt.err (!%p7429_p10)
}
 0x340   : > { %s7543_s26 = smov 64   ;;  %s7544_s24 = smov 4   ;;  %v5680_v2 = vadd.f32 %v5679_v16, %v5678_v63  ;;  %v5749_v49 = vrot.slane %v5748_v44, 4 }
 0x341   : > { %7277 = dma.vmem_to_hbm [thread:$0]  (%p7639_p7), %s5842_s11, 2048, %s5844_s12, %s5821_s13, %s7543_s26, %s7543_s26, %s7544_s24  }
 0x342   : > { %v5681_v31 = vrot.slane %v5680_v2, 2  ;;  %v5750_v50 = vadd.f32 %v5749_v49, %v5748_v44  ;;  %s5855_s30 = scalar_lea.hbm %s8831_s3, %s7591_s19  ;;  %s5825_s14 = sand.u32 1, %s7591_s19  }
 0x343   : > { %s5868_s7 = scalar_lea.hbm %s8832_s4, %s7591_s19  ;;  %s244_s5 = scalar_lea.vmem [#allocation10], %s7667_s25 }
 0x344   : > { %v5682_v37 = vadd.f32 %v5681_v31, %v5680_v2  ;;  %v5751_v6 = vrot.slane %v5750_v50, 2  ;;  %s8769_s6 = sshll.u32 %s244_s5, 4  ;;  %s8771_s11 = sshll.u32 %s5855_s30, 4  ;;  %s5858_s6 = int_to_ptr.vmem [resolvable:$true] %s8769_s6  ;;  %s5860_s11 = int_to_ptr.hbm [resolvable:$true] %s8771_s11 }
 0x345   : > { %s250_s12 = scalar_lea.vmem [#allocation12], %s7667_s25  ;;  %s8776_s21 = sshll.u32 %s5868_s7, 4  ;;  %s5873_s21 = int_to_ptr.hbm [resolvable:$true] %s8776_s21 }
 0x346   : > { %v5752_v28 = vadd.f32 %v5751_v6, %v5750_v50  ;;  %v5683_v59 = vrot.slane %v5682_v37, 1  ;;  %s8774_s13 = sshll.u32 %s250_s12, 4  ;;  %s5826_s19 = scalar_lea.sflag [#allocation11], %s5825_s14  ;;  %s5871_s13 = int_to_ptr.vmem [resolvable:$true] %s8774_s13 }
 0x347   : > { %s7447_s26 = sshra.s32 %s5860_s11, 4  ;;  %s7453_s28 = scalar_lea.hbm %s8831_s3, 2  ;;  %s7448_s26 = int_to_ptr.hbm [resolvable:$true] %s7447_s26 }
 0x348   : > { %v5684_v54 = vadd.f32 %v5683_v59, %v5682_v37  ;;  %v5753_v48 = vrot.slane %v5752_v28, 1  ;;  %s7449_s24 = scalar_lea.hbm %s7448_s26, 1  ;;  %p7454_p3 = scmp.lt.s32.totalorder %s7448_s26, %s8831_s3 }
 0x349   : > { %p7450_p12 = scmp.ne.s32.totalorder %s7448_s26, %s7449_s24  ;;  %p7455_p5 = scmp.lt.s32.totalorder %s7453_s28, %s7449_s24 }
 0x34a   : > { %5685 = vst [vmem:[%s244_s5] sm:$0x1] %v5684_v54  ;;  %v5754_v14 = vadd.f32 %v5753_v48, %v5752_v28 }
 0x34b   : > { %p7451_p13 = pnand %p7450_p12, %p7639_p7  ;;  %p7456_p1 = por %p7455_p5, %p7454_p3 }
 0x34d   : > { %p7452_p0 = pneg %p7451_p13 }
 0x34f   : > { %p7457_p4 = pnand %p7456_p1, %p7452_p0 }
 0x351   : > { %7460 = shalt.err (!%p7457_p4)
}
 0x352   : > { %7278 = dma.vmem_to_hbm [thread:$0]  (%p7639_p7), %s5858_s6, 16, %s5860_s11, %s5826_s19   ;;  %5755 = vst [vmem:[%s250_s12] sm:$0x1] %v5754_v14 }
 0x353   : > { %s7475_s14 = sshra.s32 %s5873_s21, 4  ;;  %s7481_s26 = scalar_lea.hbm %s8832_s4, 2  ;;  %s7476_s14 = int_to_ptr.hbm [resolvable:$true] %s7475_s14 }
 0x354   : > { %s7477_s23 = scalar_lea.hbm %s7476_s14, 1  ;;  %p7482_p2 = scmp.lt.s32.totalorder %s7476_s14, %s8832_s4 }
 0x355   : > { %p7478_p8 = scmp.ne.s32.totalorder %s7476_s14, %s7477_s23  ;;  %p7483_p10 = scmp.lt.s32.totalorder %s7481_s26, %s7477_s23 }
 0x357   : > { %p7479_p11 = pnand %p7478_p8, %p7639_p7  ;;  %p7484_p12 = por %p7483_p10, %p7482_p2 }
 0x359   : > { %p7480_p9 = pneg %p7479_p11 }
 0x35b   : > { %p7485_p13 = pnand %p7484_p12, %p7480_p9 }
 0x35d   : > { %7488 = shalt.err (!%p7485_p13)
}
 0x35e   : > { %7279 = dma.vmem_to_hbm [thread:$0]  (%p7639_p7), %s5871_s13, 16, %s5873_s21, %s5826_s19  }
 0x35f PF: > { %s5884_s6 = sand.u32 1, %s7523_s15   ;;  %p8867_p0 = scmp.ge.s32.totalorder %s7535_s18, 2 }
 0x360   : > { %s5885_s11 = scalar_lea.sflag [#allocation6], %s5884_s6 }
 0x361   : > { %p7292_p3 = pnand %p8867_p0, %p7607_p6 }
 0x363   : > { %p7293_p5 = pneg %p7292_p3 }
 0x365   : > { %7514 = dma.done.wait (%p7293_p5), %s5885_s11, 2048  }
 0x366   : > { %7516 = vsyncadd (%p7293_p5), %s5885_s11, 4294965248  ;;  %s5894_s9 = sand.u32 1, %s6006_s20  }
 0x367   : > { %s5895_s12 = scalar_lea.sflag [#allocation11], %s5894_s9 }
 0x368   : > { %7518 = dma.done.wait (%p7293_p5), %s5895_s12, 32  }
 0x369   : > { %7520 = vsyncadd (%p7293_p5), %s5895_s12, 4294967264  ;;  %p22_p7 = scmp.ge.s32.totalorder %s7625_s29, 4   ;;  %s8868_s15 = smov %s7527_s16 }
 0x36a   : > { %s8869_s16 = smov %s7531_s17  ;;  %s8870_s17 = smov %s7635_s8 }
 0x36b   : > { %s8871_s18 = smov %s7625_s29  ;;  %24 = sbr.rel (!%p22_p7) target bundleno = 8 (0x8), region = 112 }
 0x370   :  { %5909 = vsyncpa [#allocation5], 1 }
 0x371   :  { %5911 = vsyncpa [#allocation5 + $0x1], 1 }
 0x372   :  { %5912 = vsyncpa [#allocation8], 1 }
 0x373   :  { %5913 = vsyncpa [#allocation6], 1 }
 0x374   :  { %5915 = vsyncpa [#allocation6 + $0x1], 1 }
 0x375   :  { %5916 = vsyncpa [#allocation11], 1 }
 0x376   :  { %5918 = vsyncpa [#allocation11 + $0x1], 1 }

</bundles_post_ra>
